<compile_context>
chip_gen: v5e
topology: v5e:2x2
jax: 0.10.0
libtpu: 0.0.40
codegen_flags: <defaults>
</compile_context>

<pallas_src>
import math
import functools

import numpy as np
import jax
import jax.numpy as jnp
from jax.experimental import pallas as pl
from jax.experimental.pallas import tpu as pltpu


# ----------------------------------------------------------------------------
# small math helpers (traced inside the kernel)
# ----------------------------------------------------------------------------

def _gelu(x):
    # tanh-approx GELU (decoder FFN activation).  TODO(synk): torch default is exact erf GELU.
    c = math.sqrt(2.0 / math.pi)
    return 0.5 * x * (1.0 + jnp.tanh(c * (x + 0.044715 * x * x * x)))


def _mish(x):
    # x * tanh(softplus(x)); softplus written with exp/log only (Mosaic-safe).
    sp = jnp.maximum(x, 0.0) + jnp.log(1.0 + jnp.exp(-jnp.abs(x)))
    return x * jnp.tanh(sp)


def _layernorm(x, g, b):
    mu = jnp.mean(x, axis=-1, keepdims=True)
    var = jnp.mean(jnp.square(x - mu), axis=-1, keepdims=True)
    return (x - mu) * jax.lax.rsqrt(var + 1e-5) * g + b


def sinusoidal_emb(t, dim):
    half = dim // 2
    freqs = jnp.exp(-math.log(10000.0) * jnp.arange(half, dtype=jnp.float32) / (half - 1))
    ang = t.astype(jnp.float32)[:, None] * freqs[None, :]
    return jnp.concatenate([jnp.sin(ang), jnp.cos(ang)], axis=-1)


# ----------------------------------------------------------------------------
# the single fused kernel: add_noise -> transformer -> MSE loss
# ----------------------------------------------------------------------------

def _fused_loss_kernel(
    # per-call data
    cond_ref, traj_ref, noise_ref, sa_ref, sb_ref, ttok_ref,
    # shape constants / embeddings
    pos_ref, cpos_ref, selt_ref, selo_ref, cmask_ref, xmask_ref,
    # stem weights
    inw_ref, inb_ref, obsw_ref, obsb_ref, ew1_ref, eb1_ref, ew2_ref, eb2_ref,
    # stacked decoder-layer weights (leading axis = layer)
    sqkvw_ref, sqkvb_ref, sow_ref, sob_ref,
    cqw_ref, cqb_ref, ckvw_ref, ckvb_ref, cow_ref, cob_ref,
    lng_ref, lnb_ref, fw1_ref, fb1_ref, fw2_ref, fb2_ref,
    # head
    lnfg_ref, lnfb_ref, hw_ref, hb_ref,
    # output
    loss_ref,
    *, B, Ta, Tm, E, H, L, scale):
    f32 = jnp.float32
    dh = E // H

    def mha(q2d, k2d, v2d, nq, nk, mask2d, wo, bo):
        # q2d: (B*nq, E), k2d/v2d: (B*nk, E); wo: (E, E); bo: (1, E)
        q3 = q2d.reshape(B, nq, E)
        k3 = k2d.reshape(B, nk, E)
        v3 = v2d.reshape(B, nk, E)
        mask3 = mask2d[None, :, :]
        out = jnp.zeros((B * nq, E), f32) + bo
        for h in range(H):
            sl = slice(h * dh, (h + 1) * dh)
            s = jnp.einsum("bqd,bkd->bqk", q3[:, :, sl], k3[:, :, sl],
                           preferred_element_type=f32) * scale + mask3
            m = jnp.max(s, axis=-1, keepdims=True)
            p = jnp.exp(s - m)
            p = p * pl.reciprocal(jnp.sum(p, axis=-1, keepdims=True), approx=True)
            oh = jnp.einsum("bqk,bkd->bqd", p, v3[:, :, sl],
                            preferred_element_type=f32)
            # accumulate output projection per head: concat(heads) @ Wo == sum_h oh @ Wo[h]
            out = out + jnp.dot(oh.reshape(B * nq, dh), wo[sl, :],
                                preferred_element_type=f32)
        return out

    noise = noise_ref[...]                                               # (B*Ta, Da)

    # ---- DDPM add_noise fused with trajectory input embedding + pos embedding ----
    noisy = sa_ref[...] * traj_ref[...] + sb_ref[...] * noise            # (B*Ta, Da)
    x = (jnp.dot(noisy, inw_ref[...], preferred_element_type=f32)
         + inb_ref[...] + pos_ref[...])                                  # (B*Ta, E)

    # ---- condition path: [time token, obs tokens] -> MLP encoder -> memory ----
    ctok = (jnp.dot(cond_ref[...], obsw_ref[...], preferred_element_type=f32)
            + obsb_ref[...])                                             # (Cp, E)
    slab = (jnp.dot(selt_ref[...], ttok_ref[...], preferred_element_type=f32)
            + jnp.dot(selo_ref[...], ctok, preferred_element_type=f32)
            + cpos_ref[...])                                             # (B*Tm, E)
    henc = _mish(jnp.dot(slab, ew1_ref[...], preferred_element_type=f32) + eb1_ref[...])
    mem = jnp.dot(henc, ew2_ref[...], preferred_element_type=f32) + eb2_ref[...]  # (B*Tm, E)

    cmask = cmask_ref[...]        # (Ta, Ta) causal, additive 0/-1e9
    xmask = xmask_ref[...]        # (Ta, Tm) key-padding mask for the padded cond memory

    for l in range(L):            # static unroll (L=2)
        lg = lng_ref[l]           # (3, E)
        lb = lnb_ref[l]           # (3, E)

        # -- causal self-attention (fused QKV projection) + residual + LN --
        qkv = jnp.dot(x, sqkvw_ref[l], preferred_element_type=f32) + sqkvb_ref[l]
        attn = mha(qkv[:, 0:E], qkv[:, E:2 * E], qkv[:, 2 * E:3 * E],
                   Ta, Ta, cmask, sow_ref[l], sob_ref[l])
        x = _layernorm(x + attn, lg[0:1], lb[0:1])

        # -- cross-attention over encoded cond memory (fused KV projection) --
        q = jnp.dot(x, cqw_ref[l], preferred_element_type=f32) + cqb_ref[l]
        kv = jnp.dot(mem, ckvw_ref[l], preferred_element_type=f32) + ckvb_ref[l]
        attn = mha(q, kv[:, 0:E], kv[:, E:2 * E],
                   Ta, Tm, xmask, cow_ref[l], cob_ref[l])
        x = _layernorm(x + attn, lg[1:2], lb[1:2])

        # -- feed-forward + residual + LN --
        hid = _gelu(jnp.dot(x, fw1_ref[l], preferred_element_type=f32) + fb1_ref[l])
        ff = jnp.dot(hid, fw2_ref[l], preferred_element_type=f32) + fb2_ref[l]
        x = _layernorm(x + ff, lg[2:3], lb[2:3])

    # ---- final LN + action head + MSE(pred, noise), never leaving VMEM ----
    x = _layernorm(x, lnfg_ref[...], lnfb_ref[...])
    pred = jnp.dot(x, hw_ref[...], preferred_element_type=f32) + hb_ref[...]   # (B*Ta, Da)
    d = pred - noise
    sse = jnp.sum(jnp.sum(d * d, axis=1, keepdims=True), axis=0, keepdims=True)
    loss_ref[...] = sse * (1.0 / float(d.shape[0] * d.shape[1]))


# ----------------------------------------------------------------------------
# DiffusionPolicy.compute_loss wrapper (RNG / normalizer / tiny gathers in JAX)
# ----------------------------------------------------------------------------

def diffusion_policy_loss(params, batch, key, cfg):
    obs, action = batch["obs"], batch["action"]
    B = obs.shape[0]
    T_obs, Ta = cfg["T_obs"], cfg["T_action"]
    Da, obs_dim = cfg["action_dim"], cfg["obs_dim"]
    E, H, L, K = cfg["n_emb"], cfg["n_head"], cfg["n_layers"], cfg["K"]
    assert E % H == 0
    Tc = 1 + T_obs                       # [time token, obs tokens]
    Tm = ((Tc + 7) // 8) * 8             # cond memory padded to a sublane multiple

    # LinearNormalizer (tiny elementwise; fused by XLA under jit)
    nobs = obs * params["norm"]["obs_scale"] + params["norm"]["obs_offset"]
    nact = action * params["norm"]["act_scale"] + params["norm"]["act_offset"]
    cond2d = nobs[:, :T_obs].reshape(B * T_obs, obs_dim)
    start = T_obs - 1
    traj2d = nact[:, start:start + Ta].reshape(B * Ta, Da)

    k_noise, k_t = jax.random.split(key)
    noise2d = jax.random.normal(k_noise, (B * Ta, Da), jnp.float32)
    timesteps = jax.random.randint(k_t, (B,), 0, K)

    # DDPM add_noise coefficients, pre-broadcast to one scalar per row (B*Ta, 1)
    acp = params["sched"]["alphas_cumprod"][timesteps]
    sa = jnp.broadcast_to(jnp.sqrt(acp)[:, None], (B, Ta)).reshape(B * Ta, 1)
    sb = jnp.broadcast_to(jnp.sqrt(1.0 - acp)[:, None], (B, Ta)).reshape(B * Ta, 1)

    # sinusoidal diffusion-step embedding (B, E), row-padded to a sublane multiple
    t_tok = sinusoidal_emb(timesteps, E)
    Bp = ((B + 7) // 8) * 8
    Cp = ((B * T_obs + 7) // 8) * 8
    t_tok_p = jnp.zeros((Bp, E), jnp.float32).at[:B].set(t_tok)
    cond_p = jnp.zeros((Cp, obs_dim), jnp.float32).at[:B * T_obs].set(cond2d)

    # shape-only constants (folded by jit): token-placement selectors + attention masks
    sel_t = np.zeros((B * Tm, Bp), np.float32)
    sel_o = np.zeros((B * Tm, Cp), np.float32)
    for b in range(B):
        sel_t[b * Tm + 0, b] = 1.0
        for i in range(T_obs):
            sel_o[b * Tm + 1 + i, b * T_obs + i] = 1.0
    causal = np.where(np.tril(np.ones((Ta, Ta), dtype=bool)), 0.0, -1e9).astype(np.float32)
    key_ok = np.arange(Tm)[None, :] < Tc
    xmask = np.where(np.broadcast_to(key_ok, (Ta, Tm)), 0.0, -1e9).astype(np.float32)

    # positional embeddings, pre-tiled to lane-dense 2-D slabs
    cpos_pad = jnp.zeros((Tm, E), jnp.float32).at[:Tc].set(params["cond_pos_emb"])
    cpos_tiled = jnp.tile(cpos_pad, (B, 1))
    pos_tiled = jnp.tile(params["pos_emb"], (B, 1))

    kernel = functools.partial(
        _fused_loss_kernel, B=B, Ta=Ta, Tm=Tm, E=E, H=H, L=L,
        scale=1.0 / math.sqrt(E // H))

    args = (
        cond_p, traj2d, noise2d, sa, sb, t_tok_p,
        pos_tiled, cpos_tiled, jnp.asarray(sel_t), jnp.asarray(sel_o),
        jnp.asarray(causal), jnp.asarray(xmask),
        params["input_emb_w"], params["input_emb_b"].reshape(1, E),
        params["cond_obs_emb_w"], params["cond_obs_emb_b"].reshape(1, E),
        params["enc_w1"], params["enc_b1"].reshape(1, 4 * E),
        params["enc_w2"], params["enc_b2"].reshape(1, E),
        params["sa_wqkv"], params["sa_bqkv"], params["sa_wo"], params["sa_bo"],
        params["ca_wq"], params["ca_bq"], params["ca_wkv"], params["ca_bkv"],
        params["ca_wo"], params["ca_bo"],
        params["ln_g"], params["ln_b"],
        params["ff_w1"], params["ff_b1"], params["ff_w2"], params["ff_b2"],
        params["lnf_g"].reshape(1, E), params["lnf_b"].reshape(1, E),
        params["head_w"], params["head_b"].reshape(1, Da),
    )
    loss = pl.pallas_call(
        kernel,
        out_shape=jax.ShapeDtypeStruct((1, 1), jnp.float32),
        in_specs=[pl.BlockSpec(memory_space=pltpu.MemorySpace.VMEM) for _ in args],
        out_specs=pl.BlockSpec(memory_space=pltpu.MemorySpace.VMEM),
        compiler_params=pltpu.CompilerParams(vmem_limit_bytes=32 * 1024 * 1024),
    )(*args)
    return loss[0, 0]


# ----------------------------------------------------------------------------
# Deterministic parameter construction (per-layer weights stacked on a layer axis)
# ----------------------------------------------------------------------------

def init_params(key, cfg):
    E, H, L = cfg["n_emb"], cfg["n_head"], cfg["n_layers"]
    Da, obs_dim = cfg["action_dim"], cfg["obs_dim"]
    Tc = 1 + cfg["T_obs"]
    keys = iter(jax.random.split(key, 64))

    def w(shape):
        return (0.02 * jax.random.normal(next(keys), shape)).astype(jnp.float32)

    def zeros(shape):
        return jnp.zeros(shape, jnp.float32)

    betas = jnp.linspace(1e-4, 0.02, cfg["K"], dtype=jnp.float32)
    params = dict(
        norm=dict(
            obs_scale=0.5 + 0.01 * jnp.arange(obs_dim, dtype=jnp.float32),
            obs_offset=0.02 * jnp.arange(obs_dim, dtype=jnp.float32),
            act_scale=0.8 + 0.01 * jnp.arange(Da, dtype=jnp.float32),
            act_offset=-0.01 * jnp.arange(Da, dtype=jnp.float32),
        ),
        sched=dict(alphas_cumprod=jnp.cumprod(1.0 - betas)),
        input_emb_w=w((Da, E)), input_emb_b=zeros((E,)),
        pos_emb=w((cfg["T_action"], E)),
        cond_obs_emb_w=w((obs_dim, E)), cond_obs_emb_b=zeros((E,)),
        cond_pos_emb=w((Tc, E)),
        enc_w1=w((E, 4 * E)), enc_b1=zeros((4 * E,)),
        enc_w2=w((4 * E, E)), enc_b2=zeros((E,)),
        # stacked decoder layers (leading axis = layer) -> single fused kernel
        sa_wqkv=w((L, E, 3 * E)), sa_bqkv=zeros((L, 1, 3 * E)),
        sa_wo=w((L, E, E)), sa_bo=zeros((L, 1, E)),
        ca_wq=w((L, E, E)), ca_bq=zeros((L, 1, E)),
        ca_wkv=w((L, E, 2 * E)), ca_bkv=zeros((L, 1, 2 * E)),
        ca_wo=w((L, E, E)), ca_bo=zeros((L, 1, E)),
        ln_g=jnp.ones((L, 3, E), jnp.float32), ln_b=zeros((L, 3, E)),
        ff_w1=w((L, E, 4 * E)), ff_b1=zeros((L, 1, 4 * E)),
        ff_w2=w((L, 4 * E, E)), ff_b2=zeros((L, 1, E)),
        lnf_g=jnp.ones((E,), jnp.float32), lnf_b=zeros((E,)),
        head_w=w((E, Da)), head_b=zeros((Da,)),
    )
    return params


if __name__ == "__main__":
    cfg = dict(obs_dim=8, action_dim=4, T_obs=2, T_action=8,
               n_emb=32, n_head=4, n_layers=2, K=100)

    key = jax.random.PRNGKey(0)
    k_params, k_obs, k_act, k_loss = jax.random.split(key, 4)
    params = init_params(k_params, cfg)

    B = 2
    obs = jax.random.normal(k_obs, (B, cfg["T_obs"], cfg["obs_dim"]), jnp.float32)
    # action must cover indices [T_obs-1, T_obs-1+T_action)
    action = jax.random.normal(
        k_act, (B, cfg["T_obs"] + cfg["T_action"] - 1, cfg["action_dim"]), jnp.float32)

    loss_fn = jax.jit(functools.partial(diffusion_policy_loss, cfg=cfg))
    loss = loss_fn(params, {"obs": obs, "action": action}, k_loss)
    jax.block_until_ready(loss)
    assert loss.shape == () and bool(jnp.isfinite(loss))
    print("KERNEL_OK")
</pallas_src>

<mosaic_0001>
module attributes {stable_mosaic.version = 11 : i64} {
  func.func @_fused_loss_kernel(%arg0: memref<8x8xf32, #tpu.memory_space<vmem>>, %arg1: memref<16x4xf32, #tpu.memory_space<vmem>>, %arg2: memref<16x4xf32, #tpu.memory_space<vmem>>, %arg3: memref<16x1xf32, #tpu.memory_space<vmem>>, %arg4: memref<16x1xf32, #tpu.memory_space<vmem>>, %arg5: memref<8x32xf32, #tpu.memory_space<vmem>>, %arg6: memref<16x32xf32, #tpu.memory_space<vmem>>, %arg7: memref<16x32xf32, #tpu.memory_space<vmem>>, %arg8: memref<16x8xf32, #tpu.memory_space<vmem>>, %arg9: memref<16x8xf32, #tpu.memory_space<vmem>>, %arg10: memref<8x8xf32, #tpu.memory_space<vmem>>, %arg11: memref<8x8xf32, #tpu.memory_space<vmem>>, %arg12: memref<4x32xf32, #tpu.memory_space<vmem>>, %arg13: memref<1x32xf32, #tpu.memory_space<vmem>>, %arg14: memref<8x32xf32, #tpu.memory_space<vmem>>, %arg15: memref<1x32xf32, #tpu.memory_space<vmem>>, %arg16: memref<32x128xf32, #tpu.memory_space<vmem>>, %arg17: memref<1x128xf32, #tpu.memory_space<vmem>>, %arg18: memref<128x32xf32, #tpu.memory_space<vmem>>, %arg19: memref<1x32xf32, #tpu.memory_space<vmem>>, %arg20: memref<2x32x96xf32, #tpu.memory_space<vmem>>, %arg21: memref<2x1x96xf32, #tpu.memory_space<vmem>>, %arg22: memref<2x32x32xf32, #tpu.memory_space<vmem>>, %arg23: memref<2x1x32xf32, #tpu.memory_space<vmem>>, %arg24: memref<2x32x32xf32, #tpu.memory_space<vmem>>, %arg25: memref<2x1x32xf32, #tpu.memory_space<vmem>>, %arg26: memref<2x32x64xf32, #tpu.memory_space<vmem>>, %arg27: memref<2x1x64xf32, #tpu.memory_space<vmem>>, %arg28: memref<2x32x32xf32, #tpu.memory_space<vmem>>, %arg29: memref<2x1x32xf32, #tpu.memory_space<vmem>>, %arg30: memref<2x3x32xf32, #tpu.memory_space<vmem>>, %arg31: memref<2x3x32xf32, #tpu.memory_space<vmem>>, %arg32: memref<2x32x128xf32, #tpu.memory_space<vmem>>, %arg33: memref<2x1x128xf32, #tpu.memory_space<vmem>>, %arg34: memref<2x128x32xf32, #tpu.memory_space<vmem>>, %arg35: memref<2x1x32xf32, #tpu.memory_space<vmem>>, %arg36: memref<1x32xf32, #tpu.memory_space<vmem>>, %arg37: memref<1x32xf32, #tpu.memory_space<vmem>>, %arg38: memref<32x4xf32, #tpu.memory_space<vmem>>, %arg39: memref<1x4xf32, #tpu.memory_space<vmem>>, %arg40: memref<1x1xf32, #tpu.memory_space<vmem>>) attributes {dimension_semantics = [], scalar_prefetch = 0 : i64, scratch_operands = 0 : i64, tpu.core_type = #tpu.core_type<tc>} {
    %c0 = arith.constant 0 : index
    %c0_0 = arith.constant 0 : index
    %0 = vector.load %arg2[%c0, %c0_0] : memref<16x4xf32, #tpu.memory_space<vmem>>, vector<16x4xf32>
    %c0_1 = arith.constant 0 : index
    %c0_2 = arith.constant 0 : index
    %1 = vector.load %arg3[%c0_1, %c0_2] : memref<16x1xf32, #tpu.memory_space<vmem>>, vector<16x1xf32>
    %c0_3 = arith.constant 0 : index
    %c0_4 = arith.constant 0 : index
    %2 = vector.load %arg1[%c0_3, %c0_4] : memref<16x4xf32, #tpu.memory_space<vmem>>, vector<16x4xf32>
    %3 = vector.broadcast %1 : vector<16x1xf32> to vector<16x4xf32>
    %4 = arith.mulf %3, %2 : vector<16x4xf32>
    %c0_5 = arith.constant 0 : index
    %c0_6 = arith.constant 0 : index
    %5 = vector.load %arg4[%c0_5, %c0_6] : memref<16x1xf32, #tpu.memory_space<vmem>>, vector<16x1xf32>
    %6 = vector.broadcast %5 : vector<16x1xf32> to vector<16x4xf32>
    %7 = arith.mulf %6, %0 : vector<16x4xf32>
    %8 = arith.addf %4, %7 : vector<16x4xf32>
    %c0_7 = arith.constant 0 : index
    %c0_8 = arith.constant 0 : index
    %9 = vector.load %arg12[%c0_7, %c0_8] : memref<4x32xf32, #tpu.memory_space<vmem>>, vector<4x32xf32>
    %cst = arith.constant dense<0.000000e+00> : vector<16x32xf32>
    %10 = tpu.matmul %8, %9, %cst {dimension_numbers = #tpu.dot_dimension_numbers<[1], [0], [0], [1], [0, 0, 1, 1], [], []>} : vector<16x4xf32>, vector<4x32xf32>, vector<16x32xf32> -> vector<16x32xf32>
    %c0_9 = arith.constant 0 : index
    %c0_10 = arith.constant 0 : index
    %11 = vector.load %arg13[%c0_9, %c0_10] : memref<1x32xf32, #tpu.memory_space<vmem>>, vector<1x32xf32>
    %12 = vector.broadcast %11 : vector<1x32xf32> to vector<16x32xf32>
    %13 = arith.addf %10, %12 : vector<16x32xf32>
    %c0_11 = arith.constant 0 : index
    %c0_12 = arith.constant 0 : index
    %14 = vector.load %arg6[%c0_11, %c0_12] : memref<16x32xf32, #tpu.memory_space<vmem>>, vector<16x32xf32>
    %15 = arith.addf %13, %14 : vector<16x32xf32>
    %c0_13 = arith.constant 0 : index
    %c0_14 = arith.constant 0 : index
    %16 = vector.load %arg0[%c0_13, %c0_14] : memref<8x8xf32, #tpu.memory_space<vmem>>, vector<8x8xf32>
    %c0_15 = arith.constant 0 : index
    %c0_16 = arith.constant 0 : index
    %17 = vector.load %arg14[%c0_15, %c0_16] : memref<8x32xf32, #tpu.memory_space<vmem>>, vector<8x32xf32>
    %cst_17 = arith.constant dense<0.000000e+00> : vector<8x32xf32>
    %18 = tpu.matmul %16, %17, %cst_17 {dimension_numbers = #tpu.dot_dimension_numbers<[1], [0], [0], [1], [0, 0, 1, 1], [], []>} : vector<8x8xf32>, vector<8x32xf32>, vector<8x32xf32> -> vector<8x32xf32>
    %c0_18 = arith.constant 0 : index
    %c0_19 = arith.constant 0 : index
    %19 = vector.load %arg15[%c0_18, %c0_19] : memref<1x32xf32, #tpu.memory_space<vmem>>, vector<1x32xf32>
    %20 = vector.broadcast %19 : vector<1x32xf32> to vector<8x32xf32>
    %21 = arith.addf %18, %20 : vector<8x32xf32>
    %c0_20 = arith.constant 0 : index
    %c0_21 = arith.constant 0 : index
    %22 = vector.load %arg8[%c0_20, %c0_21] : memref<16x8xf32, #tpu.memory_space<vmem>>, vector<16x8xf32>
    %c0_22 = arith.constant 0 : index
    %c0_23 = arith.constant 0 : index
    %23 = vector.load %arg5[%c0_22, %c0_23] : memref<8x32xf32, #tpu.memory_space<vmem>>, vector<8x32xf32>
    %cst_24 = arith.constant dense<0.000000e+00> : vector<16x32xf32>
    %24 = tpu.matmul %22, %23, %cst_24 {dimension_numbers = #tpu.dot_dimension_numbers<[1], [0], [0], [1], [0, 0, 1, 1], [], []>} : vector<16x8xf32>, vector<8x32xf32>, vector<16x32xf32> -> vector<16x32xf32>
    %c0_25 = arith.constant 0 : index
    %c0_26 = arith.constant 0 : index
    %25 = vector.load %arg9[%c0_25, %c0_26] : memref<16x8xf32, #tpu.memory_space<vmem>>, vector<16x8xf32>
    %cst_27 = arith.constant dense<0.000000e+00> : vector<16x32xf32>
    %26 = tpu.matmul %25, %21, %cst_27 {dimension_numbers = #tpu.dot_dimension_numbers<[1], [0], [0], [1], [0, 0, 1, 1], [], []>} : vector<16x8xf32>, vector<8x32xf32>, vector<16x32xf32> -> vector<16x32xf32>
    %27 = arith.addf %24, %26 : vector<16x32xf32>
    %c0_28 = arith.constant 0 : index
    %c0_29 = arith.constant 0 : index
    %28 = vector.load %arg7[%c0_28, %c0_29] : memref<16x32xf32, #tpu.memory_space<vmem>>, vector<16x32xf32>
    %29 = arith.addf %27, %28 : vector<16x32xf32>
    %c0_30 = arith.constant 0 : index
    %c0_31 = arith.constant 0 : index
    %30 = vector.load %arg16[%c0_30, %c0_31] : memref<32x128xf32, #tpu.memory_space<vmem>>, vector<32x128xf32>
    %cst_32 = arith.constant dense<0.000000e+00> : vector<16x128xf32>
    %31 = tpu.matmul %29, %30, %cst_32 {dimension_numbers = #tpu.dot_dimension_numbers<[1], [0], [0], [1], [0, 0, 1, 1], [], []>} : vector<16x32xf32>, vector<32x128xf32>, vector<16x128xf32> -> vector<16x128xf32>
    %c0_33 = arith.constant 0 : index
    %c0_34 = arith.constant 0 : index
    %32 = vector.load %arg17[%c0_33, %c0_34] : memref<1x128xf32, #tpu.memory_space<vmem>>, vector<1x128xf32>
    %33 = vector.broadcast %32 : vector<1x128xf32> to vector<16x128xf32>
    %34 = arith.addf %31, %33 : vector<16x128xf32>
    %cst_35 = arith.constant 0.000000e+00 : f32
    %35 = vector.broadcast %cst_35 : f32 to vector<16x128xf32>
    %36 = arith.maximumf %34, %35 : vector<16x128xf32>
    %37 = math.absf %34 : vector<16x128xf32>
    %cst_36 = arith.constant 0.000000e+00 : f32
    %38 = vector.broadcast %cst_36 : f32 to vector<16x128xf32>
    %39 = arith.subf %38, %37 : vector<16x128xf32>
    %40 = math.exp %39 : vector<16x128xf32>
    %cst_37 = arith.constant 1.000000e+00 : f32
    %41 = vector.broadcast %cst_37 : f32 to vector<16x128xf32>
    %42 = arith.addf %41, %40 : vector<16x128xf32>
    %43 = math.log %42 : vector<16x128xf32>
    %44 = arith.addf %36, %43 : vector<16x128xf32>
    %45 = math.tanh %44 : vector<16x128xf32>
    %46 = arith.mulf %34, %45 : vector<16x128xf32>
    %c0_38 = arith.constant 0 : index
    %c0_39 = arith.constant 0 : index
    %47 = vector.load %arg18[%c0_38, %c0_39] : memref<128x32xf32, #tpu.memory_space<vmem>>, vector<128x32xf32>
    %cst_40 = arith.constant dense<0.000000e+00> : vector<16x32xf32>
    %48 = tpu.matmul %46, %47, %cst_40 {dimension_numbers = #tpu.dot_dimension_numbers<[1], [0], [0], [1], [0, 0, 1, 1], [], []>} : vector<16x128xf32>, vector<128x32xf32>, vector<16x32xf32> -> vector<16x32xf32>
    %c0_41 = arith.constant 0 : index
    %c0_42 = arith.constant 0 : index
    %49 = vector.load %arg19[%c0_41, %c0_42] : memref<1x32xf32, #tpu.memory_space<vmem>>, vector<1x32xf32>
    %50 = vector.broadcast %49 : vector<1x32xf32> to vector<16x32xf32>
    %51 = arith.addf %48, %50 : vector<16x32xf32>
    %c0_43 = arith.constant 0 : index
    %c0_44 = arith.constant 0 : index
    %52 = vector.load %arg10[%c0_43, %c0_44] : memref<8x8xf32, #tpu.memory_space<vmem>>, vector<8x8xf32>
    %c0_45 = arith.constant 0 : index
    %c0_46 = arith.constant 0 : index
    %53 = vector.load %arg11[%c0_45, %c0_46] : memref<8x8xf32, #tpu.memory_space<vmem>>, vector<8x8xf32>
    %c0_47 = arith.constant 0 : index
    %c0_48 = arith.constant 0 : index
    %c0_49 = arith.constant 0 : index
    %54 = vector.load %arg30[%c0_47, %c0_48, %c0_49] : memref<2x3x32xf32, #tpu.memory_space<vmem>>, vector<1x3x32xf32>
    %55 = vector.shape_cast %54 : vector<1x3x32xf32> to vector<3x32xf32>
    %c0_50 = arith.constant 0 : index
    %c0_51 = arith.constant 0 : index
    %c0_52 = arith.constant 0 : index
    %56 = vector.load %arg31[%c0_50, %c0_51, %c0_52] : memref<2x3x32xf32, #tpu.memory_space<vmem>>, vector<1x3x32xf32>
    %57 = vector.shape_cast %56 : vector<1x3x32xf32> to vector<3x32xf32>
    %c0_53 = arith.constant 0 : index
    %c0_54 = arith.constant 0 : index
    %c0_55 = arith.constant 0 : index
    %58 = vector.load %arg20[%c0_53, %c0_54, %c0_55] : memref<2x32x96xf32, #tpu.memory_space<vmem>>, vector<1x32x96xf32>
    %59 = vector.shape_cast %58 : vector<1x32x96xf32> to vector<32x96xf32>
    %cst_56 = arith.constant dense<0.000000e+00> : vector<16x96xf32>
    %60 = tpu.matmul %15, %59, %cst_56 {dimension_numbers = #tpu.dot_dimension_numbers<[1], [0], [0], [1], [0, 0, 1, 1], [], []>} : vector<16x32xf32>, vector<32x96xf32>, vector<16x96xf32> -> vector<16x96xf32>
    %c0_57 = arith.constant 0 : index
    %c0_58 = arith.constant 0 : index
    %c0_59 = arith.constant 0 : index
    %61 = vector.load %arg21[%c0_57, %c0_58, %c0_59] : memref<2x1x96xf32, #tpu.memory_space<vmem>>, vector<1x1x96xf32>
    %62 = vector.shape_cast %61 : vector<1x1x96xf32> to vector<1x96xf32>
    %63 = vector.broadcast %62 : vector<1x96xf32> to vector<16x96xf32>
    %64 = arith.addf %60, %63 : vector<16x96xf32>
    %65 = vector.extract_strided_slice %64 {offsets = [0, 0], sizes = [16, 32], strides = [1, 1]} : vector<16x96xf32> to vector<16x32xf32>
    %66 = vector.extract_strided_slice %64 {offsets = [0, 32], sizes = [16, 32], strides = [1, 1]} : vector<16x96xf32> to vector<16x32xf32>
    %67 = vector.extract_strided_slice %64 {offsets = [0, 64], sizes = [16, 32], strides = [1, 1]} : vector<16x96xf32> to vector<16x32xf32>
    %c0_60 = arith.constant 0 : index
    %c0_61 = arith.constant 0 : index
    %c0_62 = arith.constant 0 : index
    %68 = vector.load %arg22[%c0_60, %c0_61, %c0_62] : memref<2x32x32xf32, #tpu.memory_space<vmem>>, vector<1x32x32xf32>
    %69 = vector.shape_cast %68 : vector<1x32x32xf32> to vector<32x32xf32>
    %c0_63 = arith.constant 0 : index
    %c0_64 = arith.constant 0 : index
    %c0_65 = arith.constant 0 : index
    %70 = vector.load %arg23[%c0_63, %c0_64, %c0_65] : memref<2x1x32xf32, #tpu.memory_space<vmem>>, vector<1x1x32xf32>
    %71 = vector.shape_cast %70 : vector<1x1x32xf32> to vector<1x32xf32>
    %72 = vector.shape_cast %65 : vector<16x32xf32> to vector<2x8x32xf32>
    %73 = vector.shape_cast %66 : vector<16x32xf32> to vector<2x8x32xf32>
    %74 = vector.shape_cast %67 : vector<16x32xf32> to vector<2x8x32xf32>
    %75 = vector.shape_cast %52 : vector<8x8xf32> to vector<1x8x8xf32>
    %cst_66 = arith.constant 0.000000e+00 : f32
    %76 = vector.broadcast %cst_66 : f32 to vector<16x32xf32>
    %77 = vector.broadcast %71 : vector<1x32xf32> to vector<16x32xf32>
    %78 = arith.addf %76, %77 : vector<16x32xf32>
    %79 = vector.extract_strided_slice %72 {offsets = [0, 0, 0], sizes = [2, 8, 8], strides = [1, 1, 1]} : vector<2x8x32xf32> to vector<2x8x8xf32>
    %80 = vector.extract_strided_slice %73 {offsets = [0, 0, 0], sizes = [2, 8, 8], strides = [1, 1, 1]} : vector<2x8x32xf32> to vector<2x8x8xf32>
    "tpu.trace_start"() <{level = 10 : i32, message = "bqd,bkd->bqk"}> : () -> ()
    %cst_67 = arith.constant dense<0.000000e+00> : vector<2x8x8xf32>
    %81 = tpu.matmul %79, %80, %cst_67 {dimension_numbers = #tpu.dot_dimension_numbers<[2], [2], [1], [1], [0, 0, 0, 1, 1, 1], [0], [0]>} : vector<2x8x8xf32>, vector<2x8x8xf32>, vector<2x8x8xf32> -> vector<2x8x8xf32>
    "tpu.trace_stop"() : () -> ()
    %cst_68 = arith.constant 0.353553385 : f32
    %82 = vector.broadcast %cst_68 : f32 to vector<2x8x8xf32>
    %83 = arith.mulf %81, %82 : vector<2x8x8xf32>
    %84 = vector.broadcast %75 : vector<1x8x8xf32> to vector<2x8x8xf32>
    %85 = arith.addf %83, %84 : vector<2x8x8xf32>
    %cst_69 = arith.constant dense<0xFF800000> : vector<2x8xf32>
    %86 = vector.multi_reduction <maximumf>, %85, %cst_69 [2] : vector<2x8x8xf32> to vector<2x8xf32>
    %87 = vector.shape_cast %86 : vector<2x8xf32> to vector<2x8x1xf32>
    %88 = vector.broadcast %87 : vector<2x8x1xf32> to vector<2x8x8xf32>
    %89 = arith.subf %85, %88 : vector<2x8x8xf32>
    %90 = math.exp %89 : vector<2x8x8xf32>
    %cst_70 = arith.constant dense<0.000000e+00> : vector<2x8xf32>
    %91 = vector.multi_reduction <add>, %90, %cst_70 [2] : vector<2x8x8xf32> to vector<2x8xf32>
    %92 = vector.shape_cast %91 : vector<2x8xf32> to vector<2x8x1xf32>
    %93 = tpu.reciprocal %92 {approx = true} : vector<2x8x1xf32> -> vector<2x8x1xf32>
    %94 = vector.broadcast %93 : vector<2x8x1xf32> to vector<2x8x8xf32>
    %95 = arith.mulf %90, %94 : vector<2x8x8xf32>
    %96 = vector.extract_strided_slice %74 {offsets = [0, 0, 0], sizes = [2, 8, 8], strides = [1, 1, 1]} : vector<2x8x32xf32> to vector<2x8x8xf32>
    "tpu.trace_start"() <{level = 10 : i32, message = "bqk,bkd->bqd"}> : () -> ()
    %cst_71 = arith.constant dense<0.000000e+00> : vector<2x8x8xf32>
    %97 = tpu.matmul %95, %96, %cst_71 {dimension_numbers = #tpu.dot_dimension_numbers<[2], [1], [1], [2], [0, 0, 0, 1, 1, 2], [0], [0]>} : vector<2x8x8xf32>, vector<2x8x8xf32>, vector<2x8x8xf32> -> vector<2x8x8xf32>
    "tpu.trace_stop"() : () -> ()
    %98 = vector.shape_cast %97 : vector<2x8x8xf32> to vector<16x8xf32>
    %99 = vector.extract_strided_slice %69 {offsets = [0, 0], sizes = [8, 32], strides = [1, 1]} : vector<32x32xf32> to vector<8x32xf32>
    %cst_72 = arith.constant dense<0.000000e+00> : vector<16x32xf32>
    %100 = tpu.matmul %98, %99, %cst_72 {dimension_numbers = #tpu.dot_dimension_numbers<[1], [0], [0], [1], [0, 0, 1, 1], [], []>} : vector<16x8xf32>, vector<8x32xf32>, vector<16x32xf32> -> vector<16x32xf32>
    %101 = arith.addf %78, %100 : vector<16x32xf32>
    %102 = vector.extract_strided_slice %72 {offsets = [0, 0, 8], sizes = [2, 8, 8], strides = [1, 1, 1]} : vector<2x8x32xf32> to vector<2x8x8xf32>
    %103 = vector.extract_strided_slice %73 {offsets = [0, 0, 8], sizes = [2, 8, 8], strides = [1, 1, 1]} : vector<2x8x32xf32> to vector<2x8x8xf32>
    "tpu.trace_start"() <{level = 10 : i32, message = "bqd,bkd->bqk"}> : () -> ()
    %cst_73 = arith.constant dense<0.000000e+00> : vector<2x8x8xf32>
    %104 = tpu.matmul %102, %103, %cst_73 {dimension_numbers = #tpu.dot_dimension_numbers<[2], [2], [1], [1], [0, 0, 0, 1, 1, 1], [0], [0]>} : vector<2x8x8xf32>, vector<2x8x8xf32>, vector<2x8x8xf32> -> vector<2x8x8xf32>
    "tpu.trace_stop"() : () -> ()
    %cst_74 = arith.constant 0.353553385 : f32
    %105 = vector.broadcast %cst_74 : f32 to vector<2x8x8xf32>
    %106 = arith.mulf %104, %105 : vector<2x8x8xf32>
    %107 = vector.broadcast %75 : vector<1x8x8xf32> to vector<2x8x8xf32>
    %108 = arith.addf %106, %107 : vector<2x8x8xf32>
    %cst_75 = arith.constant dense<0xFF800000> : vector<2x8xf32>
    %109 = vector.multi_reduction <maximumf>, %108, %cst_75 [2] : vector<2x8x8xf32> to vector<2x8xf32>
    %110 = vector.shape_cast %109 : vector<2x8xf32> to vector<2x8x1xf32>
    %111 = vector.broadcast %110 : vector<2x8x1xf32> to vector<2x8x8xf32>
    %112 = arith.subf %108, %111 : vector<2x8x8xf32>
    %113 = math.exp %112 : vector<2x8x8xf32>
    %cst_76 = arith.constant dense<0.000000e+00> : vector<2x8xf32>
    %114 = vector.multi_reduction <add>, %113, %cst_76 [2] : vector<2x8x8xf32> to vector<2x8xf32>
    %115 = vector.shape_cast %114 : vector<2x8xf32> to vector<2x8x1xf32>
    %116 = tpu.reciprocal %115 {approx = true} : vector<2x8x1xf32> -> vector<2x8x1xf32>
    %117 = vector.broadcast %116 : vector<2x8x1xf32> to vector<2x8x8xf32>
    %118 = arith.mulf %113, %117 : vector<2x8x8xf32>
    %119 = vector.extract_strided_slice %74 {offsets = [0, 0, 8], sizes = [2, 8, 8], strides = [1, 1, 1]} : vector<2x8x32xf32> to vector<2x8x8xf32>
    "tpu.trace_start"() <{level = 10 : i32, message = "bqk,bkd->bqd"}> : () -> ()
    %cst_77 = arith.constant dense<0.000000e+00> : vector<2x8x8xf32>
    %120 = tpu.matmul %118, %119, %cst_77 {dimension_numbers = #tpu.dot_dimension_numbers<[2], [1], [1], [2], [0, 0, 0, 1, 1, 2], [0], [0]>} : vector<2x8x8xf32>, vector<2x8x8xf32>, vector<2x8x8xf32> -> vector<2x8x8xf32>
    "tpu.trace_stop"() : () -> ()
    %121 = vector.shape_cast %120 : vector<2x8x8xf32> to vector<16x8xf32>
    %122 = vector.extract_strided_slice %69 {offsets = [8, 0], sizes = [8, 32], strides = [1, 1]} : vector<32x32xf32> to vector<8x32xf32>
    %cst_78 = arith.constant dense<0.000000e+00> : vector<16x32xf32>
    %123 = tpu.matmul %121, %122, %cst_78 {dimension_numbers = #tpu.dot_dimension_numbers<[1], [0], [0], [1], [0, 0, 1, 1], [], []>} : vector<16x8xf32>, vector<8x32xf32>, vector<16x32xf32> -> vector<16x32xf32>
    %124 = arith.addf %101, %123 : vector<16x32xf32>
    %125 = vector.extract_strided_slice %72 {offsets = [0, 0, 16], sizes = [2, 8, 8], strides = [1, 1, 1]} : vector<2x8x32xf32> to vector<2x8x8xf32>
    %126 = vector.extract_strided_slice %73 {offsets = [0, 0, 16], sizes = [2, 8, 8], strides = [1, 1, 1]} : vector<2x8x32xf32> to vector<2x8x8xf32>
    "tpu.trace_start"() <{level = 10 : i32, message = "bqd,bkd->bqk"}> : () -> ()
    %cst_79 = arith.constant dense<0.000000e+00> : vector<2x8x8xf32>
    %127 = tpu.matmul %125, %126, %cst_79 {dimension_numbers = #tpu.dot_dimension_numbers<[2], [2], [1], [1], [0, 0, 0, 1, 1, 1], [0], [0]>} : vector<2x8x8xf32>, vector<2x8x8xf32>, vector<2x8x8xf32> -> vector<2x8x8xf32>
    "tpu.trace_stop"() : () -> ()
    %cst_80 = arith.constant 0.353553385 : f32
    %128 = vector.broadcast %cst_80 : f32 to vector<2x8x8xf32>
    %129 = arith.mulf %127, %128 : vector<2x8x8xf32>
    %130 = vector.broadcast %75 : vector<1x8x8xf32> to vector<2x8x8xf32>
    %131 = arith.addf %129, %130 : vector<2x8x8xf32>
    %cst_81 = arith.constant dense<0xFF800000> : vector<2x8xf32>
    %132 = vector.multi_reduction <maximumf>, %131, %cst_81 [2] : vector<2x8x8xf32> to vector<2x8xf32>
    %133 = vector.shape_cast %132 : vector<2x8xf32> to vector<2x8x1xf32>
    %134 = vector.broadcast %133 : vector<2x8x1xf32> to vector<2x8x8xf32>
    %135 = arith.subf %131, %134 : vector<2x8x8xf32>
    %136 = math.exp %135 : vector<2x8x8xf32>
    %cst_82 = arith.constant dense<0.000000e+00> : vector<2x8xf32>
    %137 = vector.multi_reduction <add>, %136, %cst_82 [2] : vector<2x8x8xf32> to vector<2x8xf32>
    %138 = vector.shape_cast %137 : vector<2x8xf32> to vector<2x8x1xf32>
    %139 = tpu.reciprocal %138 {approx = true} : vector<2x8x1xf32> -> vector<2x8x1xf32>
    %140 = vector.broadcast %139 : vector<2x8x1xf32> to vector<2x8x8xf32>
    %141 = arith.mulf %136, %140 : vector<2x8x8xf32>
    %142 = vector.extract_strided_slice %74 {offsets = [0, 0, 16], sizes = [2, 8, 8], strides = [1, 1, 1]} : vector<2x8x32xf32> to vector<2x8x8xf32>
    "tpu.trace_start"() <{level = 10 : i32, message = "bqk,bkd->bqd"}> : () -> ()
    %cst_83 = arith.constant dense<0.000000e+00> : vector<2x8x8xf32>
    %143 = tpu.matmul %141, %142, %cst_83 {dimension_numbers = #tpu.dot_dimension_numbers<[2], [1], [1], [2], [0, 0, 0, 1, 1, 2], [0], [0]>} : vector<2x8x8xf32>, vector<2x8x8xf32>, vector<2x8x8xf32> -> vector<2x8x8xf32>
    "tpu.trace_stop"() : () -> ()
    %144 = vector.shape_cast %143 : vector<2x8x8xf32> to vector<16x8xf32>
    %145 = vector.extract_strided_slice %69 {offsets = [16, 0], sizes = [8, 32], strides = [1, 1]} : vector<32x32xf32> to vector<8x32xf32>
    %cst_84 = arith.constant dense<0.000000e+00> : vector<16x32xf32>
    %146 = tpu.matmul %144, %145, %cst_84 {dimension_numbers = #tpu.dot_dimension_numbers<[1], [0], [0], [1], [0, 0, 1, 1], [], []>} : vector<16x8xf32>, vector<8x32xf32>, vector<16x32xf32> -> vector<16x32xf32>
    %147 = arith.addf %124, %146 : vector<16x32xf32>
    %148 = vector.extract_strided_slice %72 {offsets = [0, 0, 24], sizes = [2, 8, 8], strides = [1, 1, 1]} : vector<2x8x32xf32> to vector<2x8x8xf32>
    %149 = vector.extract_strided_slice %73 {offsets = [0, 0, 24], sizes = [2, 8, 8], strides = [1, 1, 1]} : vector<2x8x32xf32> to vector<2x8x8xf32>
    "tpu.trace_start"() <{level = 10 : i32, message = "bqd,bkd->bqk"}> : () -> ()
    %cst_85 = arith.constant dense<0.000000e+00> : vector<2x8x8xf32>
    %150 = tpu.matmul %148, %149, %cst_85 {dimension_numbers = #tpu.dot_dimension_numbers<[2], [2], [1], [1], [0, 0, 0, 1, 1, 1], [0], [0]>} : vector<2x8x8xf32>, vector<2x8x8xf32>, vector<2x8x8xf32> -> vector<2x8x8xf32>
    "tpu.trace_stop"() : () -> ()
    %cst_86 = arith.constant 0.353553385 : f32
    %151 = vector.broadcast %cst_86 : f32 to vector<2x8x8xf32>
    %152 = arith.mulf %150, %151 : vector<2x8x8xf32>
    %153 = vector.broadcast %75 : vector<1x8x8xf32> to vector<2x8x8xf32>
    %154 = arith.addf %152, %153 : vector<2x8x8xf32>
    %cst_87 = arith.constant dense<0xFF800000> : vector<2x8xf32>
    %155 = vector.multi_reduction <maximumf>, %154, %cst_87 [2] : vector<2x8x8xf32> to vector<2x8xf32>
    %156 = vector.shape_cast %155 : vector<2x8xf32> to vector<2x8x1xf32>
    %157 = vector.broadcast %156 : vector<2x8x1xf32> to vector<2x8x8xf32>
    %158 = arith.subf %154, %157 : vector<2x8x8xf32>
    %159 = math.exp %158 : vector<2x8x8xf32>
    %cst_88 = arith.constant dense<0.000000e+00> : vector<2x8xf32>
    %160 = vector.multi_reduction <add>, %159, %cst_88 [2] : vector<2x8x8xf32> to vector<2x8xf32>
    %161 = vector.shape_cast %160 : vector<2x8xf32> to vector<2x8x1xf32>
    %162 = tpu.reciprocal %161 {approx = true} : vector<2x8x1xf32> -> vector<2x8x1xf32>
    %163 = vector.broadcast %162 : vector<2x8x1xf32> to vector<2x8x8xf32>
    %164 = arith.mulf %159, %163 : vector<2x8x8xf32>
    %165 = vector.extract_strided_slice %74 {offsets = [0, 0, 24], sizes = [2, 8, 8], strides = [1, 1, 1]} : vector<2x8x32xf32> to vector<2x8x8xf32>
    "tpu.trace_start"() <{level = 10 : i32, message = "bqk,bkd->bqd"}> : () -> ()
    %cst_89 = arith.constant dense<0.000000e+00> : vector<2x8x8xf32>
    %166 = tpu.matmul %164, %165, %cst_89 {dimension_numbers = #tpu.dot_dimension_numbers<[2], [1], [1], [2], [0, 0, 0, 1, 1, 2], [0], [0]>} : vector<2x8x8xf32>, vector<2x8x8xf32>, vector<2x8x8xf32> -> vector<2x8x8xf32>
    "tpu.trace_stop"() : () -> ()
    %167 = vector.shape_cast %166 : vector<2x8x8xf32> to vector<16x8xf32>
    %168 = vector.extract_strided_slice %69 {offsets = [24, 0], sizes = [8, 32], strides = [1, 1]} : vector<32x32xf32> to vector<8x32xf32>
    %cst_90 = arith.constant dense<0.000000e+00> : vector<16x32xf32>
    %169 = tpu.matmul %167, %168, %cst_90 {dimension_numbers = #tpu.dot_dimension_numbers<[1], [0], [0], [1], [0, 0, 1, 1], [], []>} : vector<16x8xf32>, vector<8x32xf32>, vector<16x32xf32> -> vector<16x32xf32>
    %170 = arith.addf %147, %169 : vector<16x32xf32>
    %171 = arith.addf %15, %170 : vector<16x32xf32>
    %172 = vector.extract_strided_slice %55 {offsets = [0, 0], sizes = [1, 32], strides = [1, 1]} : vector<3x32xf32> to vector<1x32xf32>
    %173 = vector.extract_strided_slice %57 {offsets = [0, 0], sizes = [1, 32], strides = [1, 1]} : vector<3x32xf32> to vector<1x32xf32>
    %cst_91 = arith.constant dense<0.000000e+00> : vector<16xf32>
    %174 = vector.multi_reduction <add>, %171, %cst_91 [1] : vector<16x32xf32> to vector<16xf32>
    %175 = vector.shape_cast %174 : vector<16xf32> to vector<16x1xf32>
    %cst_92 = arith.constant 3.200000e+01 : f32
    %176 = vector.broadcast %cst_92 : f32 to vector<16x1xf32>
    %177 = arith.divf %175, %176 : vector<16x1xf32>
    %178 = vector.broadcast %177 : vector<16x1xf32> to vector<16x32xf32>
    %179 = arith.subf %171, %178 : vector<16x32xf32>
    %180 = arith.mulf %179, %179 : vector<16x32xf32>
    %cst_93 = arith.constant dense<0.000000e+00> : vector<16xf32>
    %181 = vector.multi_reduction <add>, %180, %cst_93 [1] : vector<16x32xf32> to vector<16xf32>
    %182 = vector.shape_cast %181 : vector<16xf32> to vector<16x1xf32>
    %cst_94 = arith.constant 3.200000e+01 : f32
    %183 = vector.broadcast %cst_94 : f32 to vector<16x1xf32>
    %184 = arith.divf %182, %183 : vector<16x1xf32>
    %185 = vector.broadcast %177 : vector<16x1xf32> to vector<16x32xf32>
    %186 = arith.subf %171, %185 : vector<16x32xf32>
    %cst_95 = arith.constant 9.99999974E-6 : f32
    %187 = vector.broadcast %cst_95 : f32 to vector<16x1xf32>
    %188 = arith.addf %184, %187 : vector<16x1xf32>
    %189 = math.rsqrt %188 : vector<16x1xf32>
    %190 = vector.broadcast %189 : vector<16x1xf32> to vector<16x32xf32>
    %191 = arith.mulf %186, %190 : vector<16x32xf32>
    %192 = vector.broadcast %172 : vector<1x32xf32> to vector<16x32xf32>
    %193 = arith.mulf %191, %192 : vector<16x32xf32>
    %194 = vector.broadcast %173 : vector<1x32xf32> to vector<16x32xf32>
    %195 = arith.addf %193, %194 : vector<16x32xf32>
    %c0_96 = arith.constant 0 : index
    %c0_97 = arith.constant 0 : index
    %c0_98 = arith.constant 0 : index
    %196 = vector.load %arg24[%c0_96, %c0_97, %c0_98] : memref<2x32x32xf32, #tpu.memory_space<vmem>>, vector<1x32x32xf32>
    %197 = vector.shape_cast %196 : vector<1x32x32xf32> to vector<32x32xf32>
    %cst_99 = arith.constant dense<0.000000e+00> : vector<16x32xf32>
    %198 = tpu.matmul %195, %197, %cst_99 {dimension_numbers = #tpu.dot_dimension_numbers<[1], [0], [0], [1], [0, 0, 1, 1], [], []>} : vector<16x32xf32>, vector<32x32xf32>, vector<16x32xf32> -> vector<16x32xf32>
    %c0_100 = arith.constant 0 : index
    %c0_101 = arith.constant 0 : index
    %c0_102 = arith.constant 0 : index
    %199 = vector.load %arg25[%c0_100, %c0_101, %c0_102] : memref<2x1x32xf32, #tpu.memory_space<vmem>>, vector<1x1x32xf32>
    %200 = vector.shape_cast %199 : vector<1x1x32xf32> to vector<1x32xf32>
    %201 = vector.broadcast %200 : vector<1x32xf32> to vector<16x32xf32>
    %202 = arith.addf %198, %201 : vector<16x32xf32>
    %c0_103 = arith.constant 0 : index
    %c0_104 = arith.constant 0 : index
    %c0_105 = arith.constant 0 : index
    %203 = vector.load %arg26[%c0_103, %c0_104, %c0_105] : memref<2x32x64xf32, #tpu.memory_space<vmem>>, vector<1x32x64xf32>
    %204 = vector.shape_cast %203 : vector<1x32x64xf32> to vector<32x64xf32>
    %cst_106 = arith.constant dense<0.000000e+00> : vector<16x64xf32>
    %205 = tpu.matmul %51, %204, %cst_106 {dimension_numbers = #tpu.dot_dimension_numbers<[1], [0], [0], [1], [0, 0, 1, 1], [], []>} : vector<16x32xf32>, vector<32x64xf32>, vector<16x64xf32> -> vector<16x64xf32>
    %c0_107 = arith.constant 0 : index
    %c0_108 = arith.constant 0 : index
    %c0_109 = arith.constant 0 : index
    %206 = vector.load %arg27[%c0_107, %c0_108, %c0_109] : memref<2x1x64xf32, #tpu.memory_space<vmem>>, vector<1x1x64xf32>
    %207 = vector.shape_cast %206 : vector<1x1x64xf32> to vector<1x64xf32>
    %208 = vector.broadcast %207 : vector<1x64xf32> to vector<16x64xf32>
    %209 = arith.addf %205, %208 : vector<16x64xf32>
    %210 = vector.extract_strided_slice %209 {offsets = [0, 0], sizes = [16, 32], strides = [1, 1]} : vector<16x64xf32> to vector<16x32xf32>
    %211 = vector.extract_strided_slice %209 {offsets = [0, 32], sizes = [16, 32], strides = [1, 1]} : vector<16x64xf32> to vector<16x32xf32>
    %c0_110 = arith.constant 0 : index
    %c0_111 = arith.constant 0 : index
    %c0_112 = arith.constant 0 : index
    %212 = vector.load %arg28[%c0_110, %c0_111, %c0_112] : memref<2x32x32xf32, #tpu.memory_space<vmem>>, vector<1x32x32xf32>
    %213 = vector.shape_cast %212 : vector<1x32x32xf32> to vector<32x32xf32>
    %c0_113 = arith.constant 0 : index
    %c0_114 = arith.constant 0 : index
    %c0_115 = arith.constant 0 : index
    %214 = vector.load %arg29[%c0_113, %c0_114, %c0_115] : memref<2x1x32xf32, #tpu.memory_space<vmem>>, vector<1x1x32xf32>
    %215 = vector.shape_cast %214 : vector<1x1x32xf32> to vector<1x32xf32>
    %216 = vector.shape_cast %202 : vector<16x32xf32> to vector<2x8x32xf32>
    %217 = vector.shape_cast %210 : vector<16x32xf32> to vector<2x8x32xf32>
    %218 = vector.shape_cast %211 : vector<16x32xf32> to vector<2x8x32xf32>
    %219 = vector.shape_cast %53 : vector<8x8xf32> to vector<1x8x8xf32>
    %cst_116 = arith.constant 0.000000e+00 : f32
    %220 = vector.broadcast %cst_116 : f32 to vector<16x32xf32>
    %221 = vector.broadcast %215 : vector<1x32xf32> to vector<16x32xf32>
    %222 = arith.addf %220, %221 : vector<16x32xf32>
    %223 = vector.extract_strided_slice %216 {offsets = [0, 0, 0], sizes = [2, 8, 8], strides = [1, 1, 1]} : vector<2x8x32xf32> to vector<2x8x8xf32>
    %224 = vector.extract_strided_slice %217 {offsets = [0, 0, 0], sizes = [2, 8, 8], strides = [1, 1, 1]} : vector<2x8x32xf32> to vector<2x8x8xf32>
    "tpu.trace_start"() <{level = 10 : i32, message = "bqd,bkd->bqk"}> : () -> ()
    %cst_117 = arith.constant dense<0.000000e+00> : vector<2x8x8xf32>
    %225 = tpu.matmul %223, %224, %cst_117 {dimension_numbers = #tpu.dot_dimension_numbers<[2], [2], [1], [1], [0, 0, 0, 1, 1, 1], [0], [0]>} : vector<2x8x8xf32>, vector<2x8x8xf32>, vector<2x8x8xf32> -> vector<2x8x8xf32>
    "tpu.trace_stop"() : () -> ()
    %cst_118 = arith.constant 0.353553385 : f32
    %226 = vector.broadcast %cst_118 : f32 to vector<2x8x8xf32>
    %227 = arith.mulf %225, %226 : vector<2x8x8xf32>
    %228 = vector.broadcast %219 : vector<1x8x8xf32> to vector<2x8x8xf32>
    %229 = arith.addf %227, %228 : vector<2x8x8xf32>
    %cst_119 = arith.constant dense<0xFF800000> : vector<2x8xf32>
    %230 = vector.multi_reduction <maximumf>, %229, %cst_119 [2] : vector<2x8x8xf32> to vector<2x8xf32>
    %231 = vector.shape_cast %230 : vector<2x8xf32> to vector<2x8x1xf32>
    %232 = vector.broadcast %231 : vector<2x8x1xf32> to vector<2x8x8xf32>
    %233 = arith.subf %229, %232 : vector<2x8x8xf32>
    %234 = math.exp %233 : vector<2x8x8xf32>
    %cst_120 = arith.constant dense<0.000000e+00> : vector<2x8xf32>
    %235 = vector.multi_reduction <add>, %234, %cst_120 [2] : vector<2x8x8xf32> to vector<2x8xf32>
    %236 = vector.shape_cast %235 : vector<2x8xf32> to vector<2x8x1xf32>
    %237 = tpu.reciprocal %236 {approx = true} : vector<2x8x1xf32> -> vector<2x8x1xf32>
    %238 = vector.broadcast %237 : vector<2x8x1xf32> to vector<2x8x8xf32>
    %239 = arith.mulf %234, %238 : vector<2x8x8xf32>
    %240 = vector.extract_strided_slice %218 {offsets = [0, 0, 0], sizes = [2, 8, 8], strides = [1, 1, 1]} : vector<2x8x32xf32> to vector<2x8x8xf32>
    "tpu.trace_start"() <{level = 10 : i32, message = "bqk,bkd->bqd"}> : () -> ()
    %cst_121 = arith.constant dense<0.000000e+00> : vector<2x8x8xf32>
    %241 = tpu.matmul %239, %240, %cst_121 {dimension_numbers = #tpu.dot_dimension_numbers<[2], [1], [1], [2], [0, 0, 0, 1, 1, 2], [0], [0]>} : vector<2x8x8xf32>, vector<2x8x8xf32>, vector<2x8x8xf32> -> vector<2x8x8xf32>
    "tpu.trace_stop"() : () -> ()
    %242 = vector.shape_cast %241 : vector<2x8x8xf32> to vector<16x8xf32>
    %243 = vector.extract_strided_slice %213 {offsets = [0, 0], sizes = [8, 32], strides = [1, 1]} : vector<32x32xf32> to vector<8x32xf32>
    %cst_122 = arith.constant dense<0.000000e+00> : vector<16x32xf32>
    %244 = tpu.matmul %242, %243, %cst_122 {dimension_numbers = #tpu.dot_dimension_numbers<[1], [0], [0], [1], [0, 0, 1, 1], [], []>} : vector<16x8xf32>, vector<8x32xf32>, vector<16x32xf32> -> vector<16x32xf32>
    %245 = arith.addf %222, %244 : vector<16x32xf32>
    %246 = vector.extract_strided_slice %216 {offsets = [0, 0, 8], sizes = [2, 8, 8], strides = [1, 1, 1]} : vector<2x8x32xf32> to vector<2x8x8xf32>
    %247 = vector.extract_strided_slice %217 {offsets = [0, 0, 8], sizes = [2, 8, 8], strides = [1, 1, 1]} : vector<2x8x32xf32> to vector<2x8x8xf32>
    "tpu.trace_start"() <{level = 10 : i32, message = "bqd,bkd->bqk"}> : () -> ()
    %cst_123 = arith.constant dense<0.000000e+00> : vector<2x8x8xf32>
    %248 = tpu.matmul %246, %247, %cst_123 {dimension_numbers = #tpu.dot_dimension_numbers<[2], [2], [1], [1], [0, 0, 0, 1, 1, 1], [0], [0]>} : vector<2x8x8xf32>, vector<2x8x8xf32>, vector<2x8x8xf32> -> vector<2x8x8xf32>
    "tpu.trace_stop"() : () -> ()
    %cst_124 = arith.constant 0.353553385 : f32
    %249 = vector.broadcast %cst_124 : f32 to vector<2x8x8xf32>
    %250 = arith.mulf %248, %249 : vector<2x8x8xf32>
    %251 = vector.broadcast %219 : vector<1x8x8xf32> to vector<2x8x8xf32>
    %252 = arith.addf %250, %251 : vector<2x8x8xf32>
    %cst_125 = arith.constant dense<0xFF800000> : vector<2x8xf32>
    %253 = vector.multi_reduction <maximumf>, %252, %cst_125 [2] : vector<2x8x8xf32> to vector<2x8xf32>
    %254 = vector.shape_cast %253 : vector<2x8xf32> to vector<2x8x1xf32>
    %255 = vector.broadcast %254 : vector<2x8x1xf32> to vector<2x8x8xf32>
    %256 = arith.subf %252, %255 : vector<2x8x8xf32>
    %257 = math.exp %256 : vector<2x8x8xf32>
    %cst_126 = arith.constant dense<0.000000e+00> : vector<2x8xf32>
    %258 = vector.multi_reduction <add>, %257, %cst_126 [2] : vector<2x8x8xf32> to vector<2x8xf32>
    %259 = vector.shape_cast %258 : vector<2x8xf32> to vector<2x8x1xf32>
    %260 = tpu.reciprocal %259 {approx = true} : vector<2x8x1xf32> -> vector<2x8x1xf32>
    %261 = vector.broadcast %260 : vector<2x8x1xf32> to vector<2x8x8xf32>
    %262 = arith.mulf %257, %261 : vector<2x8x8xf32>
    %263 = vector.extract_strided_slice %218 {offsets = [0, 0, 8], sizes = [2, 8, 8], strides = [1, 1, 1]} : vector<2x8x32xf32> to vector<2x8x8xf32>
    "tpu.trace_start"() <{level = 10 : i32, message = "bqk,bkd->bqd"}> : () -> ()
    %cst_127 = arith.constant dense<0.000000e+00> : vector<2x8x8xf32>
    %264 = tpu.matmul %262, %263, %cst_127 {dimension_numbers = #tpu.dot_dimension_numbers<[2], [1], [1], [2], [0, 0, 0, 1, 1, 2], [0], [0]>} : vector<2x8x8xf32>, vector<2x8x8xf32>, vector<2x8x8xf32> -> vector<2x8x8xf32>
    "tpu.trace_stop"() : () -> ()
    %265 = vector.shape_cast %264 : vector<2x8x8xf32> to vector<16x8xf32>
    %266 = vector.extract_strided_slice %213 {offsets = [8, 0], sizes = [8, 32], strides = [1, 1]} : vector<32x32xf32> to vector<8x32xf32>
    %cst_128 = arith.constant dense<0.000000e+00> : vector<16x32xf32>
    %267 = tpu.matmul %265, %266, %cst_128 {dimension_numbers = #tpu.dot_dimension_numbers<[1], [0], [0], [1], [0, 0, 1, 1], [], []>} : vector<16x8xf32>, vector<8x32xf32>, vector<16x32xf32> -> vector<16x32xf32>
    %268 = arith.addf %245, %267 : vector<16x32xf32>
    %269 = vector.extract_strided_slice %216 {offsets = [0, 0, 16], sizes = [2, 8, 8], strides = [1, 1, 1]} : vector<2x8x32xf32> to vector<2x8x8xf32>
    %270 = vector.extract_strided_slice %217 {offsets = [0, 0, 16], sizes = [2, 8, 8], strides = [1, 1, 1]} : vector<2x8x32xf32> to vector<2x8x8xf32>
    "tpu.trace_start"() <{level = 10 : i32, message = "bqd,bkd->bqk"}> : () -> ()
    %cst_129 = arith.constant dense<0.000000e+00> : vector<2x8x8xf32>
    %271 = tpu.matmul %269, %270, %cst_129 {dimension_numbers = #tpu.dot_dimension_numbers<[2], [2], [1], [1], [0, 0, 0, 1, 1, 1], [0], [0]>} : vector<2x8x8xf32>, vector<2x8x8xf32>, vector<2x8x8xf32> -> vector<2x8x8xf32>
    "tpu.trace_stop"() : () -> ()
    %cst_130 = arith.constant 0.353553385 : f32
    %272 = vector.broadcast %cst_130 : f32 to vector<2x8x8xf32>
    %273 = arith.mulf %271, %272 : vector<2x8x8xf32>
    %274 = vector.broadcast %219 : vector<1x8x8xf32> to vector<2x8x8xf32>
    %275 = arith.addf %273, %274 : vector<2x8x8xf32>
    %cst_131 = arith.constant dense<0xFF800000> : vector<2x8xf32>
    %276 = vector.multi_reduction <maximumf>, %275, %cst_131 [2] : vector<2x8x8xf32> to vector<2x8xf32>
    %277 = vector.shape_cast %276 : vector<2x8xf32> to vector<2x8x1xf32>
    %278 = vector.broadcast %277 : vector<2x8x1xf32> to vector<2x8x8xf32>
    %279 = arith.subf %275, %278 : vector<2x8x8xf32>
    %280 = math.exp %279 : vector<2x8x8xf32>
    %cst_132 = arith.constant dense<0.000000e+00> : vector<2x8xf32>
    %281 = vector.multi_reduction <add>, %280, %cst_132 [2] : vector<2x8x8xf32> to vector<2x8xf32>
    %282 = vector.shape_cast %281 : vector<2x8xf32> to vector<2x8x1xf32>
    %283 = tpu.reciprocal %282 {approx = true} : vector<2x8x1xf32> -> vector<2x8x1xf32>
    %284 = vector.broadcast %283 : vector<2x8x1xf32> to vector<2x8x8xf32>
    %285 = arith.mulf %280, %284 : vector<2x8x8xf32>
    %286 = vector.extract_strided_slice %218 {offsets = [0, 0, 16], sizes = [2, 8, 8], strides = [1, 1, 1]} : vector<2x8x32xf32> to vector<2x8x8xf32>
    "tpu.trace_start"() <{level = 10 : i32, message = "bqk,bkd->bqd"}> : () -> ()
    %cst_133 = arith.constant dense<0.000000e+00> : vector<2x8x8xf32>
    %287 = tpu.matmul %285, %286, %cst_133 {dimension_numbers = #tpu.dot_dimension_numbers<[2], [1], [1], [2], [0, 0, 0, 1, 1, 2], [0], [0]>} : vector<2x8x8xf32>, vector<2x8x8xf32>, vector<2x8x8xf32> -> vector<2x8x8xf32>
    "tpu.trace_stop"() : () -> ()
    %288 = vector.shape_cast %287 : vector<2x8x8xf32> to vector<16x8xf32>
    %289 = vector.extract_strided_slice %213 {offsets = [16, 0], sizes = [8, 32], strides = [1, 1]} : vector<32x32xf32> to vector<8x32xf32>
    %cst_134 = arith.constant dense<0.000000e+00> : vector<16x32xf32>
    %290 = tpu.matmul %288, %289, %cst_134 {dimension_numbers = #tpu.dot_dimension_numbers<[1], [0], [0], [1], [0, 0, 1, 1], [], []>} : vector<16x8xf32>, vector<8x32xf32>, vector<16x32xf32> -> vector<16x32xf32>
    %291 = arith.addf %268, %290 : vector<16x32xf32>
    %292 = vector.extract_strided_slice %216 {offsets = [0, 0, 24], sizes = [2, 8, 8], strides = [1, 1, 1]} : vector<2x8x32xf32> to vector<2x8x8xf32>
    %293 = vector.extract_strided_slice %217 {offsets = [0, 0, 24], sizes = [2, 8, 8], strides = [1, 1, 1]} : vector<2x8x32xf32> to vector<2x8x8xf32>
    "tpu.trace_start"() <{level = 10 : i32, message = "bqd,bkd->bqk"}> : () -> ()
    %cst_135 = arith.constant dense<0.000000e+00> : vector<2x8x8xf32>
    %294 = tpu.matmul %292, %293, %cst_135 {dimension_numbers = #tpu.dot_dimension_numbers<[2], [2], [1], [1], [0, 0, 0, 1, 1, 1], [0], [0]>} : vector<2x8x8xf32>, vector<2x8x8xf32>, vector<2x8x8xf32> -> vector<2x8x8xf32>
    "tpu.trace_stop"() : () -> ()
    %cst_136 = arith.constant 0.353553385 : f32
    %295 = vector.broadcast %cst_136 : f32 to vector<2x8x8xf32>
    %296 = arith.mulf %294, %295 : vector<2x8x8xf32>
    %297 = vector.broadcast %219 : vector<1x8x8xf32> to vector<2x8x8xf32>
    %298 = arith.addf %296, %297 : vector<2x8x8xf32>
    %cst_137 = arith.constant dense<0xFF800000> : vector<2x8xf32>
    %299 = vector.multi_reduction <maximumf>, %298, %cst_137 [2] : vector<2x8x8xf32> to vector<2x8xf32>
    %300 = vector.shape_cast %299 : vector<2x8xf32> to vector<2x8x1xf32>
    %301 = vector.broadcast %300 : vector<2x8x1xf32> to vector<2x8x8xf32>
    %302 = arith.subf %298, %301 : vector<2x8x8xf32>
    %303 = math.exp %302 : vector<2x8x8xf32>
    %cst_138 = arith.constant dense<0.000000e+00> : vector<2x8xf32>
    %304 = vector.multi_reduction <add>, %303, %cst_138 [2] : vector<2x8x8xf32> to vector<2x8xf32>
    %305 = vector.shape_cast %304 : vector<2x8xf32> to vector<2x8x1xf32>
    %306 = tpu.reciprocal %305 {approx = true} : vector<2x8x1xf32> -> vector<2x8x1xf32>
    %307 = vector.broadcast %306 : vector<2x8x1xf32> to vector<2x8x8xf32>
    %308 = arith.mulf %303, %307 : vector<2x8x8xf32>
    %309 = vector.extract_strided_slice %218 {offsets = [0, 0, 24], sizes = [2, 8, 8], strides = [1, 1, 1]} : vector<2x8x32xf32> to vector<2x8x8xf32>
    "tpu.trace_start"() <{level = 10 : i32, message = "bqk,bkd->bqd"}> : () -> ()
    %cst_139 = arith.constant dense<0.000000e+00> : vector<2x8x8xf32>
    %310 = tpu.matmul %308, %309, %cst_139 {dimension_numbers = #tpu.dot_dimension_numbers<[2], [1], [1], [2], [0, 0, 0, 1, 1, 2], [0], [0]>} : vector<2x8x8xf32>, vector<2x8x8xf32>, vector<2x8x8xf32> -> vector<2x8x8xf32>
    "tpu.trace_stop"() : () -> ()
    %311 = vector.shape_cast %310 : vector<2x8x8xf32> to vector<16x8xf32>
    %312 = vector.extract_strided_slice %213 {offsets = [24, 0], sizes = [8, 32], strides = [1, 1]} : vector<32x32xf32> to vector<8x32xf32>
    %cst_140 = arith.constant dense<0.000000e+00> : vector<16x32xf32>
    %313 = tpu.matmul %311, %312, %cst_140 {dimension_numbers = #tpu.dot_dimension_numbers<[1], [0], [0], [1], [0, 0, 1, 1], [], []>} : vector<16x8xf32>, vector<8x32xf32>, vector<16x32xf32> -> vector<16x32xf32>
    %314 = arith.addf %291, %313 : vector<16x32xf32>
    %315 = arith.addf %195, %314 : vector<16x32xf32>
    %316 = vector.extract_strided_slice %55 {offsets = [1, 0], sizes = [1, 32], strides = [1, 1]} : vector<3x32xf32> to vector<1x32xf32>
    %317 = vector.extract_strided_slice %57 {offsets = [1, 0], sizes = [1, 32], strides = [1, 1]} : vector<3x32xf32> to vector<1x32xf32>
    %cst_141 = arith.constant dense<0.000000e+00> : vector<16xf32>
    %318 = vector.multi_reduction <add>, %315, %cst_141 [1] : vector<16x32xf32> to vector<16xf32>
    %319 = vector.shape_cast %318 : vector<16xf32> to vector<16x1xf32>
    %cst_142 = arith.constant 3.200000e+01 : f32
    %320 = vector.broadcast %cst_142 : f32 to vector<16x1xf32>
    %321 = arith.divf %319, %320 : vector<16x1xf32>
    %322 = vector.broadcast %321 : vector<16x1xf32> to vector<16x32xf32>
    %323 = arith.subf %315, %322 : vector<16x32xf32>
    %324 = arith.mulf %323, %323 : vector<16x32xf32>
    %cst_143 = arith.constant dense<0.000000e+00> : vector<16xf32>
    %325 = vector.multi_reduction <add>, %324, %cst_143 [1] : vector<16x32xf32> to vector<16xf32>
    %326 = vector.shape_cast %325 : vector<16xf32> to vector<16x1xf32>
    %cst_144 = arith.constant 3.200000e+01 : f32
    %327 = vector.broadcast %cst_144 : f32 to vector<16x1xf32>
    %328 = arith.divf %326, %327 : vector<16x1xf32>
    %329 = vector.broadcast %321 : vector<16x1xf32> to vector<16x32xf32>
    %330 = arith.subf %315, %329 : vector<16x32xf32>
    %cst_145 = arith.constant 9.99999974E-6 : f32
    %331 = vector.broadcast %cst_145 : f32 to vector<16x1xf32>
    %332 = arith.addf %328, %331 : vector<16x1xf32>
    %333 = math.rsqrt %332 : vector<16x1xf32>
    %334 = vector.broadcast %333 : vector<16x1xf32> to vector<16x32xf32>
    %335 = arith.mulf %330, %334 : vector<16x32xf32>
    %336 = vector.broadcast %316 : vector<1x32xf32> to vector<16x32xf32>
    %337 = arith.mulf %335, %336 : vector<16x32xf32>
    %338 = vector.broadcast %317 : vector<1x32xf32> to vector<16x32xf32>
    %339 = arith.addf %337, %338 : vector<16x32xf32>
    %c0_146 = arith.constant 0 : index
    %c0_147 = arith.constant 0 : index
    %c0_148 = arith.constant 0 : index
    %340 = vector.load %arg32[%c0_146, %c0_147, %c0_148] : memref<2x32x128xf32, #tpu.memory_space<vmem>>, vector<1x32x128xf32>
    %341 = vector.shape_cast %340 : vector<1x32x128xf32> to vector<32x128xf32>
    %cst_149 = arith.constant dense<0.000000e+00> : vector<16x128xf32>
    %342 = tpu.matmul %339, %341, %cst_149 {dimension_numbers = #tpu.dot_dimension_numbers<[1], [0], [0], [1], [0, 0, 1, 1], [], []>} : vector<16x32xf32>, vector<32x128xf32>, vector<16x128xf32> -> vector<16x128xf32>
    %c0_150 = arith.constant 0 : index
    %c0_151 = arith.constant 0 : index
    %c0_152 = arith.constant 0 : index
    %343 = vector.load %arg33[%c0_150, %c0_151, %c0_152] : memref<2x1x128xf32, #tpu.memory_space<vmem>>, vector<1x1x128xf32>
    %344 = vector.shape_cast %343 : vector<1x1x128xf32> to vector<1x128xf32>
    %345 = vector.broadcast %344 : vector<1x128xf32> to vector<16x128xf32>
    %346 = arith.addf %342, %345 : vector<16x128xf32>
    %cst_153 = arith.constant 5.000000e-01 : f32
    %347 = vector.broadcast %cst_153 : f32 to vector<16x128xf32>
    %348 = arith.mulf %347, %346 : vector<16x128xf32>
    %cst_154 = arith.constant 4.471500e-02 : f32
    %349 = vector.broadcast %cst_154 : f32 to vector<16x128xf32>
    %350 = arith.mulf %349, %346 : vector<16x128xf32>
    %351 = arith.mulf %350, %346 : vector<16x128xf32>
    %352 = arith.mulf %351, %346 : vector<16x128xf32>
    %353 = arith.addf %346, %352 : vector<16x128xf32>
    %cst_155 = arith.constant 0.797884583 : f32
    %354 = vector.broadcast %cst_155 : f32 to vector<16x128xf32>
    %355 = arith.mulf %354, %353 : vector<16x128xf32>
    %356 = math.tanh %355 : vector<16x128xf32>
    %cst_156 = arith.constant 1.000000e+00 : f32
    %357 = vector.broadcast %cst_156 : f32 to vector<16x128xf32>
    %358 = arith.addf %357, %356 : vector<16x128xf32>
    %359 = arith.mulf %348, %358 : vector<16x128xf32>
    %c0_157 = arith.constant 0 : index
    %c0_158 = arith.constant 0 : index
    %c0_159 = arith.constant 0 : index
    %360 = vector.load %arg34[%c0_157, %c0_158, %c0_159] : memref<2x128x32xf32, #tpu.memory_space<vmem>>, vector<1x128x32xf32>
    %361 = vector.shape_cast %360 : vector<1x128x32xf32> to vector<128x32xf32>
    %cst_160 = arith.constant dense<0.000000e+00> : vector<16x32xf32>
    %362 = tpu.matmul %359, %361, %cst_160 {dimension_numbers = #tpu.dot_dimension_numbers<[1], [0], [0], [1], [0, 0, 1, 1], [], []>} : vector<16x128xf32>, vector<128x32xf32>, vector<16x32xf32> -> vector<16x32xf32>
    %c0_161 = arith.constant 0 : index
    %c0_162 = arith.constant 0 : index
    %c0_163 = arith.constant 0 : index
    %363 = vector.load %arg35[%c0_161, %c0_162, %c0_163] : memref<2x1x32xf32, #tpu.memory_space<vmem>>, vector<1x1x32xf32>
    %364 = vector.shape_cast %363 : vector<1x1x32xf32> to vector<1x32xf32>
    %365 = vector.broadcast %364 : vector<1x32xf32> to vector<16x32xf32>
    %366 = arith.addf %362, %365 : vector<16x32xf32>
    %367 = arith.addf %339, %366 : vector<16x32xf32>
    %368 = vector.extract_strided_slice %55 {offsets = [2, 0], sizes = [1, 32], strides = [1, 1]} : vector<3x32xf32> to vector<1x32xf32>
    %369 = vector.extract_strided_slice %57 {offsets = [2, 0], sizes = [1, 32], strides = [1, 1]} : vector<3x32xf32> to vector<1x32xf32>
    %cst_164 = arith.constant dense<0.000000e+00> : vector<16xf32>
    %370 = vector.multi_reduction <add>, %367, %cst_164 [1] : vector<16x32xf32> to vector<16xf32>
    %371 = vector.shape_cast %370 : vector<16xf32> to vector<16x1xf32>
    %cst_165 = arith.constant 3.200000e+01 : f32
    %372 = vector.broadcast %cst_165 : f32 to vector<16x1xf32>
    %373 = arith.divf %371, %372 : vector<16x1xf32>
    %374 = vector.broadcast %373 : vector<16x1xf32> to vector<16x32xf32>
    %375 = arith.subf %367, %374 : vector<16x32xf32>
    %376 = arith.mulf %375, %375 : vector<16x32xf32>
    %cst_166 = arith.constant dense<0.000000e+00> : vector<16xf32>
    %377 = vector.multi_reduction <add>, %376, %cst_166 [1] : vector<16x32xf32> to vector<16xf32>
    %378 = vector.shape_cast %377 : vector<16xf32> to vector<16x1xf32>
    %cst_167 = arith.constant 3.200000e+01 : f32
    %379 = vector.broadcast %cst_167 : f32 to vector<16x1xf32>
    %380 = arith.divf %378, %379 : vector<16x1xf32>
    %381 = vector.broadcast %373 : vector<16x1xf32> to vector<16x32xf32>
    %382 = arith.subf %367, %381 : vector<16x32xf32>
    %cst_168 = arith.constant 9.99999974E-6 : f32
    %383 = vector.broadcast %cst_168 : f32 to vector<16x1xf32>
    %384 = arith.addf %380, %383 : vector<16x1xf32>
    %385 = math.rsqrt %384 : vector<16x1xf32>
    %386 = vector.broadcast %385 : vector<16x1xf32> to vector<16x32xf32>
    %387 = arith.mulf %382, %386 : vector<16x32xf32>
    %388 = vector.broadcast %368 : vector<1x32xf32> to vector<16x32xf32>
    %389 = arith.mulf %387, %388 : vector<16x32xf32>
    %390 = vector.broadcast %369 : vector<1x32xf32> to vector<16x32xf32>
    %391 = arith.addf %389, %390 : vector<16x32xf32>
    %c1 = arith.constant 1 : index
    %c0_169 = arith.constant 0 : index
    %c0_170 = arith.constant 0 : index
    %392 = vector.load %arg30[%c1, %c0_169, %c0_170] : memref<2x3x32xf32, #tpu.memory_space<vmem>>, vector<1x3x32xf32>
    %393 = vector.shape_cast %392 : vector<1x3x32xf32> to vector<3x32xf32>
    %c1_171 = arith.constant 1 : index
    %c0_172 = arith.constant 0 : index
    %c0_173 = arith.constant 0 : index
    %394 = vector.load %arg31[%c1_171, %c0_172, %c0_173] : memref<2x3x32xf32, #tpu.memory_space<vmem>>, vector<1x3x32xf32>
    %395 = vector.shape_cast %394 : vector<1x3x32xf32> to vector<3x32xf32>
    %c1_174 = arith.constant 1 : index
    %c0_175 = arith.constant 0 : index
    %c0_176 = arith.constant 0 : index
    %396 = vector.load %arg20[%c1_174, %c0_175, %c0_176] : memref<2x32x96xf32, #tpu.memory_space<vmem>>, vector<1x32x96xf32>
    %397 = vector.shape_cast %396 : vector<1x32x96xf32> to vector<32x96xf32>
    %cst_177 = arith.constant dense<0.000000e+00> : vector<16x96xf32>
    %398 = tpu.matmul %391, %397, %cst_177 {dimension_numbers = #tpu.dot_dimension_numbers<[1], [0], [0], [1], [0, 0, 1, 1], [], []>} : vector<16x32xf32>, vector<32x96xf32>, vector<16x96xf32> -> vector<16x96xf32>
    %c1_178 = arith.constant 1 : index
    %c0_179 = arith.constant 0 : index
    %c0_180 = arith.constant 0 : index
    %399 = vector.load %arg21[%c1_178, %c0_179, %c0_180] : memref<2x1x96xf32, #tpu.memory_space<vmem>>, vector<1x1x96xf32>
    %400 = vector.shape_cast %399 : vector<1x1x96xf32> to vector<1x96xf32>
    %401 = vector.broadcast %400 : vector<1x96xf32> to vector<16x96xf32>
    %402 = arith.addf %398, %401 : vector<16x96xf32>
    %403 = vector.extract_strided_slice %402 {offsets = [0, 0], sizes = [16, 32], strides = [1, 1]} : vector<16x96xf32> to vector<16x32xf32>
    %404 = vector.extract_strided_slice %402 {offsets = [0, 32], sizes = [16, 32], strides = [1, 1]} : vector<16x96xf32> to vector<16x32xf32>
    %405 = vector.extract_strided_slice %402 {offsets = [0, 64], sizes = [16, 32], strides = [1, 1]} : vector<16x96xf32> to vector<16x32xf32>
    %c1_181 = arith.constant 1 : index
    %c0_182 = arith.constant 0 : index
    %c0_183 = arith.constant 0 : index
    %406 = vector.load %arg22[%c1_181, %c0_182, %c0_183] : memref<2x32x32xf32, #tpu.memory_space<vmem>>, vector<1x32x32xf32>
    %407 = vector.shape_cast %406 : vector<1x32x32xf32> to vector<32x32xf32>
    %c1_184 = arith.constant 1 : index
    %c0_185 = arith.constant 0 : index
    %c0_186 = arith.constant 0 : index
    %408 = vector.load %arg23[%c1_184, %c0_185, %c0_186] : memref<2x1x32xf32, #tpu.memory_space<vmem>>, vector<1x1x32xf32>
    %409 = vector.shape_cast %408 : vector<1x1x32xf32> to vector<1x32xf32>
    %410 = vector.shape_cast %403 : vector<16x32xf32> to vector<2x8x32xf32>
    %411 = vector.shape_cast %404 : vector<16x32xf32> to vector<2x8x32xf32>
    %412 = vector.shape_cast %405 : vector<16x32xf32> to vector<2x8x32xf32>
    %413 = vector.shape_cast %52 : vector<8x8xf32> to vector<1x8x8xf32>
    %cst_187 = arith.constant 0.000000e+00 : f32
    %414 = vector.broadcast %cst_187 : f32 to vector<16x32xf32>
    %415 = vector.broadcast %409 : vector<1x32xf32> to vector<16x32xf32>
    %416 = arith.addf %414, %415 : vector<16x32xf32>
    %417 = vector.extract_strided_slice %410 {offsets = [0, 0, 0], sizes = [2, 8, 8], strides = [1, 1, 1]} : vector<2x8x32xf32> to vector<2x8x8xf32>
    %418 = vector.extract_strided_slice %411 {offsets = [0, 0, 0], sizes = [2, 8, 8], strides = [1, 1, 1]} : vector<2x8x32xf32> to vector<2x8x8xf32>
    "tpu.trace_start"() <{level = 10 : i32, message = "bqd,bkd->bqk"}> : () -> ()
    %cst_188 = arith.constant dense<0.000000e+00> : vector<2x8x8xf32>
    %419 = tpu.matmul %417, %418, %cst_188 {dimension_numbers = #tpu.dot_dimension_numbers<[2], [2], [1], [1], [0, 0, 0, 1, 1, 1], [0], [0]>} : vector<2x8x8xf32>, vector<2x8x8xf32>, vector<2x8x8xf32> -> vector<2x8x8xf32>
    "tpu.trace_stop"() : () -> ()
    %cst_189 = arith.constant 0.353553385 : f32
    %420 = vector.broadcast %cst_189 : f32 to vector<2x8x8xf32>
    %421 = arith.mulf %419, %420 : vector<2x8x8xf32>
    %422 = vector.broadcast %413 : vector<1x8x8xf32> to vector<2x8x8xf32>
    %423 = arith.addf %421, %422 : vector<2x8x8xf32>
    %cst_190 = arith.constant dense<0xFF800000> : vector<2x8xf32>
    %424 = vector.multi_reduction <maximumf>, %423, %cst_190 [2] : vector<2x8x8xf32> to vector<2x8xf32>
    %425 = vector.shape_cast %424 : vector<2x8xf32> to vector<2x8x1xf32>
    %426 = vector.broadcast %425 : vector<2x8x1xf32> to vector<2x8x8xf32>
    %427 = arith.subf %423, %426 : vector<2x8x8xf32>
    %428 = math.exp %427 : vector<2x8x8xf32>
    %cst_191 = arith.constant dense<0.000000e+00> : vector<2x8xf32>
    %429 = vector.multi_reduction <add>, %428, %cst_191 [2] : vector<2x8x8xf32> to vector<2x8xf32>
    %430 = vector.shape_cast %429 : vector<2x8xf32> to vector<2x8x1xf32>
    %431 = tpu.reciprocal %430 {approx = true} : vector<2x8x1xf32> -> vector<2x8x1xf32>
    %432 = vector.broadcast %431 : vector<2x8x1xf32> to vector<2x8x8xf32>
    %433 = arith.mulf %428, %432 : vector<2x8x8xf32>
    %434 = vector.extract_strided_slice %412 {offsets = [0, 0, 0], sizes = [2, 8, 8], strides = [1, 1, 1]} : vector<2x8x32xf32> to vector<2x8x8xf32>
    "tpu.trace_start"() <{level = 10 : i32, message = "bqk,bkd->bqd"}> : () -> ()
    %cst_192 = arith.constant dense<0.000000e+00> : vector<2x8x8xf32>
    %435 = tpu.matmul %433, %434, %cst_192 {dimension_numbers = #tpu.dot_dimension_numbers<[2], [1], [1], [2], [0, 0, 0, 1, 1, 2], [0], [0]>} : vector<2x8x8xf32>, vector<2x8x8xf32>, vector<2x8x8xf32> -> vector<2x8x8xf32>
    "tpu.trace_stop"() : () -> ()
    %436 = vector.shape_cast %435 : vector<2x8x8xf32> to vector<16x8xf32>
    %437 = vector.extract_strided_slice %407 {offsets = [0, 0], sizes = [8, 32], strides = [1, 1]} : vector<32x32xf32> to vector<8x32xf32>
    %cst_193 = arith.constant dense<0.000000e+00> : vector<16x32xf32>
    %438 = tpu.matmul %436, %437, %cst_193 {dimension_numbers = #tpu.dot_dimension_numbers<[1], [0], [0], [1], [0, 0, 1, 1], [], []>} : vector<16x8xf32>, vector<8x32xf32>, vector<16x32xf32> -> vector<16x32xf32>
    %439 = arith.addf %416, %438 : vector<16x32xf32>
    %440 = vector.extract_strided_slice %410 {offsets = [0, 0, 8], sizes = [2, 8, 8], strides = [1, 1, 1]} : vector<2x8x32xf32> to vector<2x8x8xf32>
    %441 = vector.extract_strided_slice %411 {offsets = [0, 0, 8], sizes = [2, 8, 8], strides = [1, 1, 1]} : vector<2x8x32xf32> to vector<2x8x8xf32>
    "tpu.trace_start"() <{level = 10 : i32, message = "bqd,bkd->bqk"}> : () -> ()
    %cst_194 = arith.constant dense<0.000000e+00> : vector<2x8x8xf32>
    %442 = tpu.matmul %440, %441, %cst_194 {dimension_numbers = #tpu.dot_dimension_numbers<[2], [2], [1], [1], [0, 0, 0, 1, 1, 1], [0], [0]>} : vector<2x8x8xf32>, vector<2x8x8xf32>, vector<2x8x8xf32> -> vector<2x8x8xf32>
    "tpu.trace_stop"() : () -> ()
    %cst_195 = arith.constant 0.353553385 : f32
    %443 = vector.broadcast %cst_195 : f32 to vector<2x8x8xf32>
    %444 = arith.mulf %442, %443 : vector<2x8x8xf32>
    %445 = vector.broadcast %413 : vector<1x8x8xf32> to vector<2x8x8xf32>
    %446 = arith.addf %444, %445 : vector<2x8x8xf32>
    %cst_196 = arith.constant dense<0xFF800000> : vector<2x8xf32>
    %447 = vector.multi_reduction <maximumf>, %446, %cst_196 [2] : vector<2x8x8xf32> to vector<2x8xf32>
    %448 = vector.shape_cast %447 : vector<2x8xf32> to vector<2x8x1xf32>
    %449 = vector.broadcast %448 : vector<2x8x1xf32> to vector<2x8x8xf32>
    %450 = arith.subf %446, %449 : vector<2x8x8xf32>
    %451 = math.exp %450 : vector<2x8x8xf32>
    %cst_197 = arith.constant dense<0.000000e+00> : vector<2x8xf32>
    %452 = vector.multi_reduction <add>, %451, %cst_197 [2] : vector<2x8x8xf32> to vector<2x8xf32>
    %453 = vector.shape_cast %452 : vector<2x8xf32> to vector<2x8x1xf32>
    %454 = tpu.reciprocal %453 {approx = true} : vector<2x8x1xf32> -> vector<2x8x1xf32>
    %455 = vector.broadcast %454 : vector<2x8x1xf32> to vector<2x8x8xf32>
    %456 = arith.mulf %451, %455 : vector<2x8x8xf32>
    %457 = vector.extract_strided_slice %412 {offsets = [0, 0, 8], sizes = [2, 8, 8], strides = [1, 1, 1]} : vector<2x8x32xf32> to vector<2x8x8xf32>
    "tpu.trace_start"() <{level = 10 : i32, message = "bqk,bkd->bqd"}> : () -> ()
    %cst_198 = arith.constant dense<0.000000e+00> : vector<2x8x8xf32>
    %458 = tpu.matmul %456, %457, %cst_198 {dimension_numbers = #tpu.dot_dimension_numbers<[2], [1], [1], [2], [0, 0, 0, 1, 1, 2], [0], [0]>} : vector<2x8x8xf32>, vector<2x8x8xf32>, vector<2x8x8xf32> -> vector<2x8x8xf32>
    "tpu.trace_stop"() : () -> ()
    %459 = vector.shape_cast %458 : vector<2x8x8xf32> to vector<16x8xf32>
    %460 = vector.extract_strided_slice %407 {offsets = [8, 0], sizes = [8, 32], strides = [1, 1]} : vector<32x32xf32> to vector<8x32xf32>
    %cst_199 = arith.constant dense<0.000000e+00> : vector<16x32xf32>
    %461 = tpu.matmul %459, %460, %cst_199 {dimension_numbers = #tpu.dot_dimension_numbers<[1], [0], [0], [1], [0, 0, 1, 1], [], []>} : vector<16x8xf32>, vector<8x32xf32>, vector<16x32xf32> -> vector<16x32xf32>
    %462 = arith.addf %439, %461 : vector<16x32xf32>
    %463 = vector.extract_strided_slice %410 {offsets = [0, 0, 16], sizes = [2, 8, 8], strides = [1, 1, 1]} : vector<2x8x32xf32> to vector<2x8x8xf32>
    %464 = vector.extract_strided_slice %411 {offsets = [0, 0, 16], sizes = [2, 8, 8], strides = [1, 1, 1]} : vector<2x8x32xf32> to vector<2x8x8xf32>
    "tpu.trace_start"() <{level = 10 : i32, message = "bqd,bkd->bqk"}> : () -> ()
    %cst_200 = arith.constant dense<0.000000e+00> : vector<2x8x8xf32>
    %465 = tpu.matmul %463, %464, %cst_200 {dimension_numbers = #tpu.dot_dimension_numbers<[2], [2], [1], [1], [0, 0, 0, 1, 1, 1], [0], [0]>} : vector<2x8x8xf32>, vector<2x8x8xf32>, vector<2x8x8xf32> -> vector<2x8x8xf32>
    "tpu.trace_stop"() : () -> ()
    %cst_201 = arith.constant 0.353553385 : f32
    %466 = vector.broadcast %cst_201 : f32 to vector<2x8x8xf32>
    %467 = arith.mulf %465, %466 : vector<2x8x8xf32>
    %468 = vector.broadcast %413 : vector<1x8x8xf32> to vector<2x8x8xf32>
    %469 = arith.addf %467, %468 : vector<2x8x8xf32>
    %cst_202 = arith.constant dense<0xFF800000> : vector<2x8xf32>
    %470 = vector.multi_reduction <maximumf>, %469, %cst_202 [2] : vector<2x8x8xf32> to vector<2x8xf32>
    %471 = vector.shape_cast %470 : vector<2x8xf32> to vector<2x8x1xf32>
    %472 = vector.broadcast %471 : vector<2x8x1xf32> to vector<2x8x8xf32>
    %473 = arith.subf %469, %472 : vector<2x8x8xf32>
    %474 = math.exp %473 : vector<2x8x8xf32>
    %cst_203 = arith.constant dense<0.000000e+00> : vector<2x8xf32>
    %475 = vector.multi_reduction <add>, %474, %cst_203 [2] : vector<2x8x8xf32> to vector<2x8xf32>
    %476 = vector.shape_cast %475 : vector<2x8xf32> to vector<2x8x1xf32>
    %477 = tpu.reciprocal %476 {approx = true} : vector<2x8x1xf32> -> vector<2x8x1xf32>
    %478 = vector.broadcast %477 : vector<2x8x1xf32> to vector<2x8x8xf32>
    %479 = arith.mulf %474, %478 : vector<2x8x8xf32>
    %480 = vector.extract_strided_slice %412 {offsets = [0, 0, 16], sizes = [2, 8, 8], strides = [1, 1, 1]} : vector<2x8x32xf32> to vector<2x8x8xf32>
    "tpu.trace_start"() <{level = 10 : i32, message = "bqk,bkd->bqd"}> : () -> ()
    %cst_204 = arith.constant dense<0.000000e+00> : vector<2x8x8xf32>
    %481 = tpu.matmul %479, %480, %cst_204 {dimension_numbers = #tpu.dot_dimension_numbers<[2], [1], [1], [2], [0, 0, 0, 1, 1, 2], [0], [0]>} : vector<2x8x8xf32>, vector<2x8x8xf32>, vector<2x8x8xf32> -> vector<2x8x8xf32>
    "tpu.trace_stop"() : () -> ()
    %482 = vector.shape_cast %481 : vector<2x8x8xf32> to vector<16x8xf32>
    %483 = vector.extract_strided_slice %407 {offsets = [16, 0], sizes = [8, 32], strides = [1, 1]} : vector<32x32xf32> to vector<8x32xf32>
    %cst_205 = arith.constant dense<0.000000e+00> : vector<16x32xf32>
    %484 = tpu.matmul %482, %483, %cst_205 {dimension_numbers = #tpu.dot_dimension_numbers<[1], [0], [0], [1], [0, 0, 1, 1], [], []>} : vector<16x8xf32>, vector<8x32xf32>, vector<16x32xf32> -> vector<16x32xf32>
    %485 = arith.addf %462, %484 : vector<16x32xf32>
    %486 = vector.extract_strided_slice %410 {offsets = [0, 0, 24], sizes = [2, 8, 8], strides = [1, 1, 1]} : vector<2x8x32xf32> to vector<2x8x8xf32>
    %487 = vector.extract_strided_slice %411 {offsets = [0, 0, 24], sizes = [2, 8, 8], strides = [1, 1, 1]} : vector<2x8x32xf32> to vector<2x8x8xf32>
    "tpu.trace_start"() <{level = 10 : i32, message = "bqd,bkd->bqk"}> : () -> ()
    %cst_206 = arith.constant dense<0.000000e+00> : vector<2x8x8xf32>
    %488 = tpu.matmul %486, %487, %cst_206 {dimension_numbers = #tpu.dot_dimension_numbers<[2], [2], [1], [1], [0, 0, 0, 1, 1, 1], [0], [0]>} : vector<2x8x8xf32>, vector<2x8x8xf32>, vector<2x8x8xf32> -> vector<2x8x8xf32>
    "tpu.trace_stop"() : () -> ()
    %cst_207 = arith.constant 0.353553385 : f32
    %489 = vector.broadcast %cst_207 : f32 to vector<2x8x8xf32>
    %490 = arith.mulf %488, %489 : vector<2x8x8xf32>
    %491 = vector.broadcast %413 : vector<1x8x8xf32> to vector<2x8x8xf32>
    %492 = arith.addf %490, %491 : vector<2x8x8xf32>
    %cst_208 = arith.constant dense<0xFF800000> : vector<2x8xf32>
    %493 = vector.multi_reduction <maximumf>, %492, %cst_208 [2] : vector<2x8x8xf32> to vector<2x8xf32>
    %494 = vector.shape_cast %493 : vector<2x8xf32> to vector<2x8x1xf32>
    %495 = vector.broadcast %494 : vector<2x8x1xf32> to vector<2x8x8xf32>
    %496 = arith.subf %492, %495 : vector<2x8x8xf32>
    %497 = math.exp %496 : vector<2x8x8xf32>
    %cst_209 = arith.constant dense<0.000000e+00> : vector<2x8xf32>
    %498 = vector.multi_reduction <add>, %497, %cst_209 [2] : vector<2x8x8xf32> to vector<2x8xf32>
    %499 = vector.shape_cast %498 : vector<2x8xf32> to vector<2x8x1xf32>
    %500 = tpu.reciprocal %499 {approx = true} : vector<2x8x1xf32> -> vector<2x8x1xf32>
    %501 = vector.broadcast %500 : vector<2x8x1xf32> to vector<2x8x8xf32>
    %502 = arith.mulf %497, %501 : vector<2x8x8xf32>
    %503 = vector.extract_strided_slice %412 {offsets = [0, 0, 24], sizes = [2, 8, 8], strides = [1, 1, 1]} : vector<2x8x32xf32> to vector<2x8x8xf32>
    "tpu.trace_start"() <{level = 10 : i32, message = "bqk,bkd->bqd"}> : () -> ()
    %cst_210 = arith.constant dense<0.000000e+00> : vector<2x8x8xf32>
    %504 = tpu.matmul %502, %503, %cst_210 {dimension_numbers = #tpu.dot_dimension_numbers<[2], [1], [1], [2], [0, 0, 0, 1, 1, 2], [0], [0]>} : vector<2x8x8xf32>, vector<2x8x8xf32>, vector<2x8x8xf32> -> vector<2x8x8xf32>
    "tpu.trace_stop"() : () -> ()
    %505 = vector.shape_cast %504 : vector<2x8x8xf32> to vector<16x8xf32>
    %506 = vector.extract_strided_slice %407 {offsets = [24, 0], sizes = [8, 32], strides = [1, 1]} : vector<32x32xf32> to vector<8x32xf32>
    %cst_211 = arith.constant dense<0.000000e+00> : vector<16x32xf32>
    %507 = tpu.matmul %505, %506, %cst_211 {dimension_numbers = #tpu.dot_dimension_numbers<[1], [0], [0], [1], [0, 0, 1, 1], [], []>} : vector<16x8xf32>, vector<8x32xf32>, vector<16x32xf32> -> vector<16x32xf32>
    %508 = arith.addf %485, %507 : vector<16x32xf32>
    %509 = arith.addf %391, %508 : vector<16x32xf32>
    %510 = vector.extract_strided_slice %393 {offsets = [0, 0], sizes = [1, 32], strides = [1, 1]} : vector<3x32xf32> to vector<1x32xf32>
    %511 = vector.extract_strided_slice %395 {offsets = [0, 0], sizes = [1, 32], strides = [1, 1]} : vector<3x32xf32> to vector<1x32xf32>
    %cst_212 = arith.constant dense<0.000000e+00> : vector<16xf32>
    %512 = vector.multi_reduction <add>, %509, %cst_212 [1] : vector<16x32xf32> to vector<16xf32>
    %513 = vector.shape_cast %512 : vector<16xf32> to vector<16x1xf32>
    %cst_213 = arith.constant 3.200000e+01 : f32
    %514 = vector.broadcast %cst_213 : f32 to vector<16x1xf32>
    %515 = arith.divf %513, %514 : vector<16x1xf32>
    %516 = vector.broadcast %515 : vector<16x1xf32> to vector<16x32xf32>
    %517 = arith.subf %509, %516 : vector<16x32xf32>
    %518 = arith.mulf %517, %517 : vector<16x32xf32>
    %cst_214 = arith.constant dense<0.000000e+00> : vector<16xf32>
    %519 = vector.multi_reduction <add>, %518, %cst_214 [1] : vector<16x32xf32> to vector<16xf32>
    %520 = vector.shape_cast %519 : vector<16xf32> to vector<16x1xf32>
    %cst_215 = arith.constant 3.200000e+01 : f32
    %521 = vector.broadcast %cst_215 : f32 to vector<16x1xf32>
    %522 = arith.divf %520, %521 : vector<16x1xf32>
    %523 = vector.broadcast %515 : vector<16x1xf32> to vector<16x32xf32>
    %524 = arith.subf %509, %523 : vector<16x32xf32>
    %cst_216 = arith.constant 9.99999974E-6 : f32
    %525 = vector.broadcast %cst_216 : f32 to vector<16x1xf32>
    %526 = arith.addf %522, %525 : vector<16x1xf32>
    %527 = math.rsqrt %526 : vector<16x1xf32>
    %528 = vector.broadcast %527 : vector<16x1xf32> to vector<16x32xf32>
    %529 = arith.mulf %524, %528 : vector<16x32xf32>
    %530 = vector.broadcast %510 : vector<1x32xf32> to vector<16x32xf32>
    %531 = arith.mulf %529, %530 : vector<16x32xf32>
    %532 = vector.broadcast %511 : vector<1x32xf32> to vector<16x32xf32>
    %533 = arith.addf %531, %532 : vector<16x32xf32>
    %c1_217 = arith.constant 1 : index
    %c0_218 = arith.constant 0 : index
    %c0_219 = arith.constant 0 : index
    %534 = vector.load %arg24[%c1_217, %c0_218, %c0_219] : memref<2x32x32xf32, #tpu.memory_space<vmem>>, vector<1x32x32xf32>
    %535 = vector.shape_cast %534 : vector<1x32x32xf32> to vector<32x32xf32>
    %cst_220 = arith.constant dense<0.000000e+00> : vector<16x32xf32>
    %536 = tpu.matmul %533, %535, %cst_220 {dimension_numbers = #tpu.dot_dimension_numbers<[1], [0], [0], [1], [0, 0, 1, 1], [], []>} : vector<16x32xf32>, vector<32x32xf32>, vector<16x32xf32> -> vector<16x32xf32>
    %c1_221 = arith.constant 1 : index
    %c0_222 = arith.constant 0 : index
    %c0_223 = arith.constant 0 : index
    %537 = vector.load %arg25[%c1_221, %c0_222, %c0_223] : memref<2x1x32xf32, #tpu.memory_space<vmem>>, vector<1x1x32xf32>
    %538 = vector.shape_cast %537 : vector<1x1x32xf32> to vector<1x32xf32>
    %539 = vector.broadcast %538 : vector<1x32xf32> to vector<16x32xf32>
    %540 = arith.addf %536, %539 : vector<16x32xf32>
    %c1_224 = arith.constant 1 : index
    %c0_225 = arith.constant 0 : index
    %c0_226 = arith.constant 0 : index
    %541 = vector.load %arg26[%c1_224, %c0_225, %c0_226] : memref<2x32x64xf32, #tpu.memory_space<vmem>>, vector<1x32x64xf32>
    %542 = vector.shape_cast %541 : vector<1x32x64xf32> to vector<32x64xf32>
    %cst_227 = arith.constant dense<0.000000e+00> : vector<16x64xf32>
    %543 = tpu.matmul %51, %542, %cst_227 {dimension_numbers = #tpu.dot_dimension_numbers<[1], [0], [0], [1], [0, 0, 1, 1], [], []>} : vector<16x32xf32>, vector<32x64xf32>, vector<16x64xf32> -> vector<16x64xf32>
    %c1_228 = arith.constant 1 : index
    %c0_229 = arith.constant 0 : index
    %c0_230 = arith.constant 0 : index
    %544 = vector.load %arg27[%c1_228, %c0_229, %c0_230] : memref<2x1x64xf32, #tpu.memory_space<vmem>>, vector<1x1x64xf32>
    %545 = vector.shape_cast %544 : vector<1x1x64xf32> to vector<1x64xf32>
    %546 = vector.broadcast %545 : vector<1x64xf32> to vector<16x64xf32>
    %547 = arith.addf %543, %546 : vector<16x64xf32>
    %548 = vector.extract_strided_slice %547 {offsets = [0, 0], sizes = [16, 32], strides = [1, 1]} : vector<16x64xf32> to vector<16x32xf32>
    %549 = vector.extract_strided_slice %547 {offsets = [0, 32], sizes = [16, 32], strides = [1, 1]} : vector<16x64xf32> to vector<16x32xf32>
    %c1_231 = arith.constant 1 : index
    %c0_232 = arith.constant 0 : index
    %c0_233 = arith.constant 0 : index
    %550 = vector.load %arg28[%c1_231, %c0_232, %c0_233] : memref<2x32x32xf32, #tpu.memory_space<vmem>>, vector<1x32x32xf32>
    %551 = vector.shape_cast %550 : vector<1x32x32xf32> to vector<32x32xf32>
    %c1_234 = arith.constant 1 : index
    %c0_235 = arith.constant 0 : index
    %c0_236 = arith.constant 0 : index
    %552 = vector.load %arg29[%c1_234, %c0_235, %c0_236] : memref<2x1x32xf32, #tpu.memory_space<vmem>>, vector<1x1x32xf32>
    %553 = vector.shape_cast %552 : vector<1x1x32xf32> to vector<1x32xf32>
    %554 = vector.shape_cast %540 : vector<16x32xf32> to vector<2x8x32xf32>
    %555 = vector.shape_cast %548 : vector<16x32xf32> to vector<2x8x32xf32>
    %556 = vector.shape_cast %549 : vector<16x32xf32> to vector<2x8x32xf32>
    %557 = vector.shape_cast %53 : vector<8x8xf32> to vector<1x8x8xf32>
    %cst_237 = arith.constant 0.000000e+00 : f32
    %558 = vector.broadcast %cst_237 : f32 to vector<16x32xf32>
    %559 = vector.broadcast %553 : vector<1x32xf32> to vector<16x32xf32>
    %560 = arith.addf %558, %559 : vector<16x32xf32>
    %561 = vector.extract_strided_slice %554 {offsets = [0, 0, 0], sizes = [2, 8, 8], strides = [1, 1, 1]} : vector<2x8x32xf32> to vector<2x8x8xf32>
    %562 = vector.extract_strided_slice %555 {offsets = [0, 0, 0], sizes = [2, 8, 8], strides = [1, 1, 1]} : vector<2x8x32xf32> to vector<2x8x8xf32>
    "tpu.trace_start"() <{level = 10 : i32, message = "bqd,bkd->bqk"}> : () -> ()
    %cst_238 = arith.constant dense<0.000000e+00> : vector<2x8x8xf32>
    %563 = tpu.matmul %561, %562, %cst_238 {dimension_numbers = #tpu.dot_dimension_numbers<[2], [2], [1], [1], [0, 0, 0, 1, 1, 1], [0], [0]>} : vector<2x8x8xf32>, vector<2x8x8xf32>, vector<2x8x8xf32> -> vector<2x8x8xf32>
    "tpu.trace_stop"() : () -> ()
    %cst_239 = arith.constant 0.353553385 : f32
    %564 = vector.broadcast %cst_239 : f32 to vector<2x8x8xf32>
    %565 = arith.mulf %563, %564 : vector<2x8x8xf32>
    %566 = vector.broadcast %557 : vector<1x8x8xf32> to vector<2x8x8xf32>
    %567 = arith.addf %565, %566 : vector<2x8x8xf32>
    %cst_240 = arith.constant dense<0xFF800000> : vector<2x8xf32>
    %568 = vector.multi_reduction <maximumf>, %567, %cst_240 [2] : vector<2x8x8xf32> to vector<2x8xf32>
    %569 = vector.shape_cast %568 : vector<2x8xf32> to vector<2x8x1xf32>
    %570 = vector.broadcast %569 : vector<2x8x1xf32> to vector<2x8x8xf32>
    %571 = arith.subf %567, %570 : vector<2x8x8xf32>
    %572 = math.exp %571 : vector<2x8x8xf32>
    %cst_241 = arith.constant dense<0.000000e+00> : vector<2x8xf32>
    %573 = vector.multi_reduction <add>, %572, %cst_241 [2] : vector<2x8x8xf32> to vector<2x8xf32>
    %574 = vector.shape_cast %573 : vector<2x8xf32> to vector<2x8x1xf32>
    %575 = tpu.reciprocal %574 {approx = true} : vector<2x8x1xf32> -> vector<2x8x1xf32>
    %576 = vector.broadcast %575 : vector<2x8x1xf32> to vector<2x8x8xf32>
    %577 = arith.mulf %572, %576 : vector<2x8x8xf32>
    %578 = vector.extract_strided_slice %556 {offsets = [0, 0, 0], sizes = [2, 8, 8], strides = [1, 1, 1]} : vector<2x8x32xf32> to vector<2x8x8xf32>
    "tpu.trace_start"() <{level = 10 : i32, message = "bqk,bkd->bqd"}> : () -> ()
    %cst_242 = arith.constant dense<0.000000e+00> : vector<2x8x8xf32>
    %579 = tpu.matmul %577, %578, %cst_242 {dimension_numbers = #tpu.dot_dimension_numbers<[2], [1], [1], [2], [0, 0, 0, 1, 1, 2], [0], [0]>} : vector<2x8x8xf32>, vector<2x8x8xf32>, vector<2x8x8xf32> -> vector<2x8x8xf32>
    "tpu.trace_stop"() : () -> ()
    %580 = vector.shape_cast %579 : vector<2x8x8xf32> to vector<16x8xf32>
    %581 = vector.extract_strided_slice %551 {offsets = [0, 0], sizes = [8, 32], strides = [1, 1]} : vector<32x32xf32> to vector<8x32xf32>
    %cst_243 = arith.constant dense<0.000000e+00> : vector<16x32xf32>
    %582 = tpu.matmul %580, %581, %cst_243 {dimension_numbers = #tpu.dot_dimension_numbers<[1], [0], [0], [1], [0, 0, 1, 1], [], []>} : vector<16x8xf32>, vector<8x32xf32>, vector<16x32xf32> -> vector<16x32xf32>
    %583 = arith.addf %560, %582 : vector<16x32xf32>
    %584 = vector.extract_strided_slice %554 {offsets = [0, 0, 8], sizes = [2, 8, 8], strides = [1, 1, 1]} : vector<2x8x32xf32> to vector<2x8x8xf32>
    %585 = vector.extract_strided_slice %555 {offsets = [0, 0, 8], sizes = [2, 8, 8], strides = [1, 1, 1]} : vector<2x8x32xf32> to vector<2x8x8xf32>
    "tpu.trace_start"() <{level = 10 : i32, message = "bqd,bkd->bqk"}> : () -> ()
    %cst_244 = arith.constant dense<0.000000e+00> : vector<2x8x8xf32>
    %586 = tpu.matmul %584, %585, %cst_244 {dimension_numbers = #tpu.dot_dimension_numbers<[2], [2], [1], [1], [0, 0, 0, 1, 1, 1], [0], [0]>} : vector<2x8x8xf32>, vector<2x8x8xf32>, vector<2x8x8xf32> -> vector<2x8x8xf32>
    "tpu.trace_stop"() : () -> ()
    %cst_245 = arith.constant 0.353553385 : f32
    %587 = vector.broadcast %cst_245 : f32 to vector<2x8x8xf32>
    %588 = arith.mulf %586, %587 : vector<2x8x8xf32>
    %589 = vector.broadcast %557 : vector<1x8x8xf32> to vector<2x8x8xf32>
    %590 = arith.addf %588, %589 : vector<2x8x8xf32>
    %cst_246 = arith.constant dense<0xFF800000> : vector<2x8xf32>
    %591 = vector.multi_reduction <maximumf>, %590, %cst_246 [2] : vector<2x8x8xf32> to vector<2x8xf32>
    %592 = vector.shape_cast %591 : vector<2x8xf32> to vector<2x8x1xf32>
    %593 = vector.broadcast %592 : vector<2x8x1xf32> to vector<2x8x8xf32>
    %594 = arith.subf %590, %593 : vector<2x8x8xf32>
    %595 = math.exp %594 : vector<2x8x8xf32>
    %cst_247 = arith.constant dense<0.000000e+00> : vector<2x8xf32>
    %596 = vector.multi_reduction <add>, %595, %cst_247 [2] : vector<2x8x8xf32> to vector<2x8xf32>
    %597 = vector.shape_cast %596 : vector<2x8xf32> to vector<2x8x1xf32>
    %598 = tpu.reciprocal %597 {approx = true} : vector<2x8x1xf32> -> vector<2x8x1xf32>
    %599 = vector.broadcast %598 : vector<2x8x1xf32> to vector<2x8x8xf32>
    %600 = arith.mulf %595, %599 : vector<2x8x8xf32>
    %601 = vector.extract_strided_slice %556 {offsets = [0, 0, 8], sizes = [2, 8, 8], strides = [1, 1, 1]} : vector<2x8x32xf32> to vector<2x8x8xf32>
    "tpu.trace_start"() <{level = 10 : i32, message = "bqk,bkd->bqd"}> : () -> ()
    %cst_248 = arith.constant dense<0.000000e+00> : vector<2x8x8xf32>
    %602 = tpu.matmul %600, %601, %cst_248 {dimension_numbers = #tpu.dot_dimension_numbers<[2], [1], [1], [2], [0, 0, 0, 1, 1, 2], [0], [0]>} : vector<2x8x8xf32>, vector<2x8x8xf32>, vector<2x8x8xf32> -> vector<2x8x8xf32>
    "tpu.trace_stop"() : () -> ()
    %603 = vector.shape_cast %602 : vector<2x8x8xf32> to vector<16x8xf32>
    %604 = vector.extract_strided_slice %551 {offsets = [8, 0], sizes = [8, 32], strides = [1, 1]} : vector<32x32xf32> to vector<8x32xf32>
    %cst_249 = arith.constant dense<0.000000e+00> : vector<16x32xf32>
    %605 = tpu.matmul %603, %604, %cst_249 {dimension_numbers = #tpu.dot_dimension_numbers<[1], [0], [0], [1], [0, 0, 1, 1], [], []>} : vector<16x8xf32>, vector<8x32xf32>, vector<16x32xf32> -> vector<16x32xf32>
    %606 = arith.addf %583, %605 : vector<16x32xf32>
    %607 = vector.extract_strided_slice %554 {offsets = [0, 0, 16], sizes = [2, 8, 8], strides = [1, 1, 1]} : vector<2x8x32xf32> to vector<2x8x8xf32>
    %608 = vector.extract_strided_slice %555 {offsets = [0, 0, 16], sizes = [2, 8, 8], strides = [1, 1, 1]} : vector<2x8x32xf32> to vector<2x8x8xf32>
    "tpu.trace_start"() <{level = 10 : i32, message = "bqd,bkd->bqk"}> : () -> ()
    %cst_250 = arith.constant dense<0.000000e+00> : vector<2x8x8xf32>
    %609 = tpu.matmul %607, %608, %cst_250 {dimension_numbers = #tpu.dot_dimension_numbers<[2], [2], [1], [1], [0, 0, 0, 1, 1, 1], [0], [0]>} : vector<2x8x8xf32>, vector<2x8x8xf32>, vector<2x8x8xf32> -> vector<2x8x8xf32>
    "tpu.trace_stop"() : () -> ()
    %cst_251 = arith.constant 0.353553385 : f32
    %610 = vector.broadcast %cst_251 : f32 to vector<2x8x8xf32>
    %611 = arith.mulf %609, %610 : vector<2x8x8xf32>
    %612 = vector.broadcast %557 : vector<1x8x8xf32> to vector<2x8x8xf32>
    %613 = arith.addf %611, %612 : vector<2x8x8xf32>
    %cst_252 = arith.constant dense<0xFF800000> : vector<2x8xf32>
    %614 = vector.multi_reduction <maximumf>, %613, %cst_252 [2] : vector<2x8x8xf32> to vector<2x8xf32>
    %615 = vector.shape_cast %614 : vector<2x8xf32> to vector<2x8x1xf32>
    %616 = vector.broadcast %615 : vector<2x8x1xf32> to vector<2x8x8xf32>
    %617 = arith.subf %613, %616 : vector<2x8x8xf32>
    %618 = math.exp %617 : vector<2x8x8xf32>
    %cst_253 = arith.constant dense<0.000000e+00> : vector<2x8xf32>
    %619 = vector.multi_reduction <add>, %618, %cst_253 [2] : vector<2x8x8xf32> to vector<2x8xf32>
    %620 = vector.shape_cast %619 : vector<2x8xf32> to vector<2x8x1xf32>
    %621 = tpu.reciprocal %620 {approx = true} : vector<2x8x1xf32> -> vector<2x8x1xf32>
    %622 = vector.broadcast %621 : vector<2x8x1xf32> to vector<2x8x8xf32>
    %623 = arith.mulf %618, %622 : vector<2x8x8xf32>
    %624 = vector.extract_strided_slice %556 {offsets = [0, 0, 16], sizes = [2, 8, 8], strides = [1, 1, 1]} : vector<2x8x32xf32> to vector<2x8x8xf32>
    "tpu.trace_start"() <{level = 10 : i32, message = "bqk,bkd->bqd"}> : () -> ()
    %cst_254 = arith.constant dense<0.000000e+00> : vector<2x8x8xf32>
    %625 = tpu.matmul %623, %624, %cst_254 {dimension_numbers = #tpu.dot_dimension_numbers<[2], [1], [1], [2], [0, 0, 0, 1, 1, 2], [0], [0]>} : vector<2x8x8xf32>, vector<2x8x8xf32>, vector<2x8x8xf32> -> vector<2x8x8xf32>
    "tpu.trace_stop"() : () -> ()
    %626 = vector.shape_cast %625 : vector<2x8x8xf32> to vector<16x8xf32>
    %627 = vector.extract_strided_slice %551 {offsets = [16, 0], sizes = [8, 32], strides = [1, 1]} : vector<32x32xf32> to vector<8x32xf32>
    %cst_255 = arith.constant dense<0.000000e+00> : vector<16x32xf32>
    %628 = tpu.matmul %626, %627, %cst_255 {dimension_numbers = #tpu.dot_dimension_numbers<[1], [0], [0], [1], [0, 0, 1, 1], [], []>} : vector<16x8xf32>, vector<8x32xf32>, vector<16x32xf32> -> vector<16x32xf32>
    %629 = arith.addf %606, %628 : vector<16x32xf32>
    %630 = vector.extract_strided_slice %554 {offsets = [0, 0, 24], sizes = [2, 8, 8], strides = [1, 1, 1]} : vector<2x8x32xf32> to vector<2x8x8xf32>
    %631 = vector.extract_strided_slice %555 {offsets = [0, 0, 24], sizes = [2, 8, 8], strides = [1, 1, 1]} : vector<2x8x32xf32> to vector<2x8x8xf32>
    "tpu.trace_start"() <{level = 10 : i32, message = "bqd,bkd->bqk"}> : () -> ()
    %cst_256 = arith.constant dense<0.000000e+00> : vector<2x8x8xf32>
    %632 = tpu.matmul %630, %631, %cst_256 {dimension_numbers = #tpu.dot_dimension_numbers<[2], [2], [1], [1], [0, 0, 0, 1, 1, 1], [0], [0]>} : vector<2x8x8xf32>, vector<2x8x8xf32>, vector<2x8x8xf32> -> vector<2x8x8xf32>
    "tpu.trace_stop"() : () -> ()
    %cst_257 = arith.constant 0.353553385 : f32
    %633 = vector.broadcast %cst_257 : f32 to vector<2x8x8xf32>
    %634 = arith.mulf %632, %633 : vector<2x8x8xf32>
    %635 = vector.broadcast %557 : vector<1x8x8xf32> to vector<2x8x8xf32>
    %636 = arith.addf %634, %635 : vector<2x8x8xf32>
    %cst_258 = arith.constant dense<0xFF800000> : vector<2x8xf32>
    %637 = vector.multi_reduction <maximumf>, %636, %cst_258 [2] : vector<2x8x8xf32> to vector<2x8xf32>
    %638 = vector.shape_cast %637 : vector<2x8xf32> to vector<2x8x1xf32>
    %639 = vector.broadcast %638 : vector<2x8x1xf32> to vector<2x8x8xf32>
    %640 = arith.subf %636, %639 : vector<2x8x8xf32>
    %641 = math.exp %640 : vector<2x8x8xf32>
    %cst_259 = arith.constant dense<0.000000e+00> : vector<2x8xf32>
    %642 = vector.multi_reduction <add>, %641, %cst_259 [2] : vector<2x8x8xf32> to vector<2x8xf32>
    %643 = vector.shape_cast %642 : vector<2x8xf32> to vector<2x8x1xf32>
    %644 = tpu.reciprocal %643 {approx = true} : vector<2x8x1xf32> -> vector<2x8x1xf32>
    %645 = vector.broadcast %644 : vector<2x8x1xf32> to vector<2x8x8xf32>
    %646 = arith.mulf %641, %645 : vector<2x8x8xf32>
    %647 = vector.extract_strided_slice %556 {offsets = [0, 0, 24], sizes = [2, 8, 8], strides = [1, 1, 1]} : vector<2x8x32xf32> to vector<2x8x8xf32>
    "tpu.trace_start"() <{level = 10 : i32, message = "bqk,bkd->bqd"}> : () -> ()
    %cst_260 = arith.constant dense<0.000000e+00> : vector<2x8x8xf32>
    %648 = tpu.matmul %646, %647, %cst_260 {dimension_numbers = #tpu.dot_dimension_numbers<[2], [1], [1], [2], [0, 0, 0, 1, 1, 2], [0], [0]>} : vector<2x8x8xf32>, vector<2x8x8xf32>, vector<2x8x8xf32> -> vector<2x8x8xf32>
    "tpu.trace_stop"() : () -> ()
    %649 = vector.shape_cast %648 : vector<2x8x8xf32> to vector<16x8xf32>
    %650 = vector.extract_strided_slice %551 {offsets = [24, 0], sizes = [8, 32], strides = [1, 1]} : vector<32x32xf32> to vector<8x32xf32>
    %cst_261 = arith.constant dense<0.000000e+00> : vector<16x32xf32>
    %651 = tpu.matmul %649, %650, %cst_261 {dimension_numbers = #tpu.dot_dimension_numbers<[1], [0], [0], [1], [0, 0, 1, 1], [], []>} : vector<16x8xf32>, vector<8x32xf32>, vector<16x32xf32> -> vector<16x32xf32>
    %652 = arith.addf %629, %651 : vector<16x32xf32>
    %653 = arith.addf %533, %652 : vector<16x32xf32>
    %654 = vector.extract_strided_slice %393 {offsets = [1, 0], sizes = [1, 32], strides = [1, 1]} : vector<3x32xf32> to vector<1x32xf32>
    %655 = vector.extract_strided_slice %395 {offsets = [1, 0], sizes = [1, 32], strides = [1, 1]} : vector<3x32xf32> to vector<1x32xf32>
    %cst_262 = arith.constant dense<0.000000e+00> : vector<16xf32>
    %656 = vector.multi_reduction <add>, %653, %cst_262 [1] : vector<16x32xf32> to vector<16xf32>
    %657 = vector.shape_cast %656 : vector<16xf32> to vector<16x1xf32>
    %cst_263 = arith.constant 3.200000e+01 : f32
    %658 = vector.broadcast %cst_263 : f32 to vector<16x1xf32>
    %659 = arith.divf %657, %658 : vector<16x1xf32>
    %660 = vector.broadcast %659 : vector<16x1xf32> to vector<16x32xf32>
    %661 = arith.subf %653, %660 : vector<16x32xf32>
    %662 = arith.mulf %661, %661 : vector<16x32xf32>
    %cst_264 = arith.constant dense<0.000000e+00> : vector<16xf32>
    %663 = vector.multi_reduction <add>, %662, %cst_264 [1] : vector<16x32xf32> to vector<16xf32>
    %664 = vector.shape_cast %663 : vector<16xf32> to vector<16x1xf32>
    %cst_265 = arith.constant 3.200000e+01 : f32
    %665 = vector.broadcast %cst_265 : f32 to vector<16x1xf32>
    %666 = arith.divf %664, %665 : vector<16x1xf32>
    %667 = vector.broadcast %659 : vector<16x1xf32> to vector<16x32xf32>
    %668 = arith.subf %653, %667 : vector<16x32xf32>
    %cst_266 = arith.constant 9.99999974E-6 : f32
    %669 = vector.broadcast %cst_266 : f32 to vector<16x1xf32>
    %670 = arith.addf %666, %669 : vector<16x1xf32>
    %671 = math.rsqrt %670 : vector<16x1xf32>
    %672 = vector.broadcast %671 : vector<16x1xf32> to vector<16x32xf32>
    %673 = arith.mulf %668, %672 : vector<16x32xf32>
    %674 = vector.broadcast %654 : vector<1x32xf32> to vector<16x32xf32>
    %675 = arith.mulf %673, %674 : vector<16x32xf32>
    %676 = vector.broadcast %655 : vector<1x32xf32> to vector<16x32xf32>
    %677 = arith.addf %675, %676 : vector<16x32xf32>
    %c1_267 = arith.constant 1 : index
    %c0_268 = arith.constant 0 : index
    %c0_269 = arith.constant 0 : index
    %678 = vector.load %arg32[%c1_267, %c0_268, %c0_269] : memref<2x32x128xf32, #tpu.memory_space<vmem>>, vector<1x32x128xf32>
    %679 = vector.shape_cast %678 : vector<1x32x128xf32> to vector<32x128xf32>
    %cst_270 = arith.constant dense<0.000000e+00> : vector<16x128xf32>
    %680 = tpu.matmul %677, %679, %cst_270 {dimension_numbers = #tpu.dot_dimension_numbers<[1], [0], [0], [1], [0, 0, 1, 1], [], []>} : vector<16x32xf32>, vector<32x128xf32>, vector<16x128xf32> -> vector<16x128xf32>
    %c1_271 = arith.constant 1 : index
    %c0_272 = arith.constant 0 : index
    %c0_273 = arith.constant 0 : index
    %681 = vector.load %arg33[%c1_271, %c0_272, %c0_273] : memref<2x1x128xf32, #tpu.memory_space<vmem>>, vector<1x1x128xf32>
    %682 = vector.shape_cast %681 : vector<1x1x128xf32> to vector<1x128xf32>
    %683 = vector.broadcast %682 : vector<1x128xf32> to vector<16x128xf32>
    %684 = arith.addf %680, %683 : vector<16x128xf32>
    %cst_274 = arith.constant 5.000000e-01 : f32
    %685 = vector.broadcast %cst_274 : f32 to vector<16x128xf32>
    %686 = arith.mulf %685, %684 : vector<16x128xf32>
    %cst_275 = arith.constant 4.471500e-02 : f32
    %687 = vector.broadcast %cst_275 : f32 to vector<16x128xf32>
    %688 = arith.mulf %687, %684 : vector<16x128xf32>
    %689 = arith.mulf %688, %684 : vector<16x128xf32>
    %690 = arith.mulf %689, %684 : vector<16x128xf32>
    %691 = arith.addf %684, %690 : vector<16x128xf32>
    %cst_276 = arith.constant 0.797884583 : f32
    %692 = vector.broadcast %cst_276 : f32 to vector<16x128xf32>
    %693 = arith.mulf %692, %691 : vector<16x128xf32>
    %694 = math.tanh %693 : vector<16x128xf32>
    %cst_277 = arith.constant 1.000000e+00 : f32
    %695 = vector.broadcast %cst_277 : f32 to vector<16x128xf32>
    %696 = arith.addf %695, %694 : vector<16x128xf32>
    %697 = arith.mulf %686, %696 : vector<16x128xf32>
    %c1_278 = arith.constant 1 : index
    %c0_279 = arith.constant 0 : index
    %c0_280 = arith.constant 0 : index
    %698 = vector.load %arg34[%c1_278, %c0_279, %c0_280] : memref<2x128x32xf32, #tpu.memory_space<vmem>>, vector<1x128x32xf32>
    %699 = vector.shape_cast %698 : vector<1x128x32xf32> to vector<128x32xf32>
    %cst_281 = arith.constant dense<0.000000e+00> : vector<16x32xf32>
    %700 = tpu.matmul %697, %699, %cst_281 {dimension_numbers = #tpu.dot_dimension_numbers<[1], [0], [0], [1], [0, 0, 1, 1], [], []>} : vector<16x128xf32>, vector<128x32xf32>, vector<16x32xf32> -> vector<16x32xf32>
    %c1_282 = arith.constant 1 : index
    %c0_283 = arith.constant 0 : index
    %c0_284 = arith.constant 0 : index
    %701 = vector.load %arg35[%c1_282, %c0_283, %c0_284] : memref<2x1x32xf32, #tpu.memory_space<vmem>>, vector<1x1x32xf32>
    %702 = vector.shape_cast %701 : vector<1x1x32xf32> to vector<1x32xf32>
    %703 = vector.broadcast %702 : vector<1x32xf32> to vector<16x32xf32>
    %704 = arith.addf %700, %703 : vector<16x32xf32>
    %705 = arith.addf %677, %704 : vector<16x32xf32>
    %706 = vector.extract_strided_slice %393 {offsets = [2, 0], sizes = [1, 32], strides = [1, 1]} : vector<3x32xf32> to vector<1x32xf32>
    %707 = vector.extract_strided_slice %395 {offsets = [2, 0], sizes = [1, 32], strides = [1, 1]} : vector<3x32xf32> to vector<1x32xf32>
    %cst_285 = arith.constant dense<0.000000e+00> : vector<16xf32>
    %708 = vector.multi_reduction <add>, %705, %cst_285 [1] : vector<16x32xf32> to vector<16xf32>
    %709 = vector.shape_cast %708 : vector<16xf32> to vector<16x1xf32>
    %cst_286 = arith.constant 3.200000e+01 : f32
    %710 = vector.broadcast %cst_286 : f32 to vector<16x1xf32>
    %711 = arith.divf %709, %710 : vector<16x1xf32>
    %712 = vector.broadcast %711 : vector<16x1xf32> to vector<16x32xf32>
    %713 = arith.subf %705, %712 : vector<16x32xf32>
    %714 = arith.mulf %713, %713 : vector<16x32xf32>
    %cst_287 = arith.constant dense<0.000000e+00> : vector<16xf32>
    %715 = vector.multi_reduction <add>, %714, %cst_287 [1] : vector<16x32xf32> to vector<16xf32>
    %716 = vector.shape_cast %715 : vector<16xf32> to vector<16x1xf32>
    %cst_288 = arith.constant 3.200000e+01 : f32
    %717 = vector.broadcast %cst_288 : f32 to vector<16x1xf32>
    %718 = arith.divf %716, %717 : vector<16x1xf32>
    %719 = vector.broadcast %711 : vector<16x1xf32> to vector<16x32xf32>
    %720 = arith.subf %705, %719 : vector<16x32xf32>
    %cst_289 = arith.constant 9.99999974E-6 : f32
    %721 = vector.broadcast %cst_289 : f32 to vector<16x1xf32>
    %722 = arith.addf %718, %721 : vector<16x1xf32>
    %723 = math.rsqrt %722 : vector<16x1xf32>
    %724 = vector.broadcast %723 : vector<16x1xf32> to vector<16x32xf32>
    %725 = arith.mulf %720, %724 : vector<16x32xf32>
    %726 = vector.broadcast %706 : vector<1x32xf32> to vector<16x32xf32>
    %727 = arith.mulf %725, %726 : vector<16x32xf32>
    %728 = vector.broadcast %707 : vector<1x32xf32> to vector<16x32xf32>
    %729 = arith.addf %727, %728 : vector<16x32xf32>
    %c0_290 = arith.constant 0 : index
    %c0_291 = arith.constant 0 : index
    %730 = vector.load %arg36[%c0_290, %c0_291] : memref<1x32xf32, #tpu.memory_space<vmem>>, vector<1x32xf32>
    %c0_292 = arith.constant 0 : index
    %c0_293 = arith.constant 0 : index
    %731 = vector.load %arg37[%c0_292, %c0_293] : memref<1x32xf32, #tpu.memory_space<vmem>>, vector<1x32xf32>
    %cst_294 = arith.constant dense<0.000000e+00> : vector<16xf32>
    %732 = vector.multi_reduction <add>, %729, %cst_294 [1] : vector<16x32xf32> to vector<16xf32>
    %733 = vector.shape_cast %732 : vector<16xf32> to vector<16x1xf32>
    %cst_295 = arith.constant 3.200000e+01 : f32
    %734 = vector.broadcast %cst_295 : f32 to vector<16x1xf32>
    %735 = arith.divf %733, %734 : vector<16x1xf32>
    %736 = vector.broadcast %735 : vector<16x1xf32> to vector<16x32xf32>
    %737 = arith.subf %729, %736 : vector<16x32xf32>
    %738 = arith.mulf %737, %737 : vector<16x32xf32>
    %cst_296 = arith.constant dense<0.000000e+00> : vector<16xf32>
    %739 = vector.multi_reduction <add>, %738, %cst_296 [1] : vector<16x32xf32> to vector<16xf32>
    %740 = vector.shape_cast %739 : vector<16xf32> to vector<16x1xf32>
    %cst_297 = arith.constant 3.200000e+01 : f32
    %741 = vector.broadcast %cst_297 : f32 to vector<16x1xf32>
    %742 = arith.divf %740, %741 : vector<16x1xf32>
    %743 = vector.broadcast %735 : vector<16x1xf32> to vector<16x32xf32>
    %744 = arith.subf %729, %743 : vector<16x32xf32>
    %cst_298 = arith.constant 9.99999974E-6 : f32
    %745 = vector.broadcast %cst_298 : f32 to vector<16x1xf32>
    %746 = arith.addf %742, %745 : vector<16x1xf32>
    %747 = math.rsqrt %746 : vector<16x1xf32>
    %748 = vector.broadcast %747 : vector<16x1xf32> to vector<16x32xf32>
    %749 = arith.mulf %744, %748 : vector<16x32xf32>
    %750 = vector.broadcast %730 : vector<1x32xf32> to vector<16x32xf32>
    %751 = arith.mulf %749, %750 : vector<16x32xf32>
    %752 = vector.broadcast %731 : vector<1x32xf32> to vector<16x32xf32>
    %753 = arith.addf %751, %752 : vector<16x32xf32>
    %c0_299 = arith.constant 0 : index
    %c0_300 = arith.constant 0 : index
    %754 = vector.load %arg38[%c0_299, %c0_300] : memref<32x4xf32, #tpu.memory_space<vmem>>, vector<32x4xf32>
    %cst_301 = arith.constant dense<0.000000e+00> : vector<16x4xf32>
    %755 = tpu.matmul %753, %754, %cst_301 {dimension_numbers = #tpu.dot_dimension_numbers<[1], [0], [0], [1], [0, 0, 1, 1], [], []>} : vector<16x32xf32>, vector<32x4xf32>, vector<16x4xf32> -> vector<16x4xf32>
    %c0_302 = arith.constant 0 : index
    %c0_303 = arith.constant 0 : index
    %756 = vector.load %arg39[%c0_302, %c0_303] : memref<1x4xf32, #tpu.memory_space<vmem>>, vector<1x4xf32>
    %757 = vector.broadcast %756 : vector<1x4xf32> to vector<16x4xf32>
    %758 = arith.addf %755, %757 : vector<16x4xf32>
    %759 = arith.subf %758, %0 : vector<16x4xf32>
    %760 = arith.mulf %759, %759 : vector<16x4xf32>
    %cst_304 = arith.constant dense<0.000000e+00> : vector<16xf32>
    %761 = vector.multi_reduction <add>, %760, %cst_304 [1] : vector<16x4xf32> to vector<16xf32>
    %762 = vector.shape_cast %761 : vector<16xf32> to vector<16x1xf32>
    %cst_305 = arith.constant dense<0.000000e+00> : vector<1xf32>
    %763 = vector.multi_reduction <add>, %762, %cst_305 [0] : vector<16x1xf32> to vector<1xf32>
    %764 = vector.shape_cast %763 : vector<1xf32> to vector<1x1xf32>
    %cst_306 = arith.constant 1.562500e-02 : f32
    %765 = vector.broadcast %cst_306 : f32 to vector<1x1xf32>
    %766 = arith.mulf %764, %765 : vector<1x1xf32>
    %c0_307 = arith.constant 0 : index
    %c0_308 = arith.constant 0 : index
    %767 = vector.load %arg40[%c0_307, %c0_308] : memref<1x1xf32, #tpu.memory_space<vmem>>, vector<1x1xf32>
    tpu.vector_store %arg40[%c0_307, %c0_308], %766 {strides = array<i32>} : memref<1x1xf32, #tpu.memory_space<vmem>>, vector<1x1xf32>,
    return
  }
}

</mosaic_0001>

<bundles_post_ra>
// kernel: diffusion_policy_loss.21
= control target key start
LH: loop header
LB: loop body
LE: loop exit
PB: predicated region body
PF: predicated region fallthrough
CT: control target
= control target key end

     0   :  { %s4521_s6 = smov 1   ;;  %s4522_s10 = smov 2   ;;  %s5592_s0 = inlined_call_operand.smem [shape: u32[41], index: -1, kind: input, shape index: {}] }
   0x1   :  { %s4583_s5 = sld [smem:[%s5592_s0]]   ;;  %s4523_s14 = smov 3  }
   0x2   :  { %s4588_s9 = sld [smem:[%s5592_s0 + %s4521_s6]]   ;;  %s4524_s18 = smov 4  }
   0x3   :  { %s4593_s13 = sld [smem:[%s5592_s0 + %s4522_s10]]   ;;  %s4525_s22 = smov 5  }
   0x4   :  { %s4598_s17 = sld [smem:[%s5592_s0 + %s4523_s14]]   ;;  %s4526_s26 = smov 6  }
   0x5   :  { %s4603_s21 = sld [smem:[%s5592_s0 + %s4524_s18]]   ;;  %s4527_s30 = smov 7  }
   0x6   :  { %s4608_s25 = sld [smem:[%s5592_s0 + %s4525_s22]]   ;;  %s4528_s4 = smov 8  }
   0x7   :  { %s4613_s29 = sld [smem:[%s5592_s0 + %s4526_s26]]   ;;  %s4529_s10 = smov 9  }
   0x8   :  { %s4618_s3 = sld [smem:[%s5592_s0 + %s4527_s30]]   ;;  %s4530_s15 = smov 10  }
   0x9   :  { %s4623_s8 = sld [smem:[%s5592_s0 + %s4528_s4]]   ;;  %s4531_s20 = smov 11  }
   0xa   :  { %s4628_s14 = sld [smem:[%s5592_s0 + %s4529_s10]]   ;;  %s4532_s26 = smov 12  }
   0xb   :  { %s4633_s19 = sld [smem:[%s5592_s0 + %s4530_s15]]   ;;  %s4533_s1 = smov 13  }
   0xc   :  { %s4638_s24 = sld [smem:[%s5592_s0 + %s4531_s20]]   ;;  %s4534_s7 = smov 14  }
   0xd   :  { %5619 = sst [smem:[#allocation5_spill]] %s4613_s29  ;;  %s4535_s15 = smov 15  }
   0xe   :  { %5620 = sst [smem:[#allocation6_spill]] %s4618_s3  ;;  %s4536_s22 = smov 16  }
   0xf   :  { %s4643_s30 = sld [smem:[%s5592_s0 + %s4532_s26]]   ;;  %s4537_s28 = smov 17  }
  0x10   :  { %s4648_s6 = sld [smem:[%s5592_s0 + %s4533_s1]]  }
  0x11   :  { %5621 = sst [smem:[#allocation7_spill]] %s4633_s19 }
  0x12   :  { %5622 = sst [smem:[#allocation8_spill]] %s4638_s24 }
  0x13   :  { %s4653_s12 = sld [smem:[%s5592_s0 + %s4534_s7]]   ;;  %s4538_s7 = smov 18  }
  0x14   :  { %s4658_s20 = sld [smem:[%s5592_s0 + %s4535_s15]]   ;;  %s4539_s15 = smov 19  }
  0x15   :  { %s4663_s27 = sld [smem:[%s5592_s0 + %s4536_s22]]   ;;  %s4540_s22 = smov 20  }
  0x16   :  { %s4668_s4 = sld [smem:[%s5592_s0 + %s4537_s28]]   ;;  %s4541_s28 = smov 21  }
  0x17   :  { %s4673_s24 = sld [smem:[%s5592_s0 + %s4538_s7]]   ;;  %s4542_s7 = smov 22  }
  0x18   :  { %s4678_s19 = sld [smem:[%s5592_s0 + %s4539_s15]]   ;;  %s4543_s15 = smov 23  }
  0x19   :  { %s4683_s3 = sld [smem:[%s5592_s0 + %s4540_s22]]   ;;  %s4544_s22 = smov 24  }
  0x1a   :  { %s4703_s29 = sld [smem:[%s5592_s0 + %s4544_s22]]   ;;  %s4548_s22 = smov 28  }
  0x1c   :  { %5623 = sst [smem:[#allocation9_spill]] %s4668_s4 }
  0x1d   :  { %5624 = sst [smem:[#allocation10_spill]] %s4673_s24 }
  0x1e   :  { %5625 = sst [smem:[#allocation11_spill]] %s4678_s19 }
  0x1f   :  { %s4688_s4 = sld [smem:[%s5592_s0 + %s4541_s28]]   ;;  %s4545_s28 = smov 25  }
  0x20   :  { %s4693_s24 = sld [smem:[%s5592_s0 + %s4542_s7]]   ;;  %s4546_s7 = smov 26  }
  0x21   :  { %s4698_s19 = sld [smem:[%s5592_s0 + %s4543_s15]]   ;;  %s4547_s15 = smov 27  }
  0x22   :  { %5629 = sst [smem:[#allocation15_spill]] %s4703_s29 }
  0x23   :  { %s4723_s29 = sld [smem:[%s5592_s0 + %s4548_s22]]   ;;  %s4552_s22 = smov 32  }
  0x25   :  { %5626 = sst [smem:[#allocation12_spill]] %s4688_s4 }
  0x26   :  { %5627 = sst [smem:[#allocation13_spill]] %s4693_s24 }
  0x27   :  { %5628 = sst [smem:[#allocation14_spill]] %s4698_s19 }
  0x28   :  { %s4708_s4 = sld [smem:[%s5592_s0 + %s4545_s28]]   ;;  %s4549_s28 = smov 29  }
  0x29   :  { %s4713_s24 = sld [smem:[%s5592_s0 + %s4546_s7]]   ;;  %s4550_s7 = smov 30  }
  0x2a   :  { %s4718_s19 = sld [smem:[%s5592_s0 + %s4547_s15]]   ;;  %s4551_s15 = smov 31  }
  0x2b   :  { %5633 = sst [smem:[#allocation19_spill]] %s4723_s29 }
  0x2c   :  { %s4743_s29 = sld [smem:[%s5592_s0 + %s4552_s22]]   ;;  %s4556_s22 = smov 36  }
  0x2e   :  { %5630 = sst [smem:[#allocation16_spill]] %s4708_s4 }
  0x2f   :  { %5631 = sst [smem:[#allocation17_spill]] %s4713_s24 }
  0x30   :  { %5632 = sst [smem:[#allocation18_spill]] %s4718_s19 }
  0x31   :  { %s4728_s4 = sld [smem:[%s5592_s0 + %s4549_s28]]   ;;  %s4553_s28 = smov 33  }
  0x32   :  { %s4733_s24 = sld [smem:[%s5592_s0 + %s4550_s7]]   ;;  %s4554_s7 = smov 34  }
  0x33   :  { %s4738_s19 = sld [smem:[%s5592_s0 + %s4551_s15]]   ;;  %s4555_s15 = smov 35  }
  0x34   :  { %5637 = sst [smem:[#allocation23_spill]] %s4743_s29 }
  0x35   :  { %s4763_s29 = sld [smem:[%s5592_s0 + %s4556_s22]]   ;;  %s4560_s22 = smov 40  }
  0x37   :  { %5634 = sst [smem:[#allocation20_spill]] %s4728_s4 }
  0x38   :  { %5635 = sst [smem:[#allocation21_spill]] %s4733_s24 }
  0x39   :  { %5636 = sst [smem:[#allocation22_spill]] %s4738_s19 }
  0x3a   :  { %s4748_s4 = sld [smem:[%s5592_s0 + %s4553_s28]]   ;;  %s4557_s28 = smov 37  }
  0x3b   :  { %s4753_s24 = sld [smem:[%s5592_s0 + %s4554_s7]]   ;;  %s4558_s7 = smov 38  }
  0x3c   :  { %s4758_s19 = sld [smem:[%s5592_s0 + %s4555_s15]]   ;;  %s4559_s15 = smov 39  }
  0x3d   :  { %5641 = sst [smem:[#allocation27_spill]] %s4763_s29 }
  0x3e   :  { %s4783_s29 = sld [smem:[%s5592_s0 + %s4560_s22]]  }
  0x40   :  { %5638 = sst [smem:[#allocation24_spill]] %s4748_s4 }
  0x41   :  { %5639 = sst [smem:[#allocation25_spill]] %s4753_s24 }
  0x42   :  { %5640 = sst [smem:[#allocation26_spill]] %s4758_s19 }
  0x43   :  { %s4768_s4 = sld [smem:[%s5592_s0 + %s4557_s28]]  }
  0x44   :  { %s4773_s24 = sld [smem:[%s5592_s0 + %s4558_s7]]  }
  0x45   :  { %s4778_s19 = sld [smem:[%s5592_s0 + %s4559_s15]]  }
  0x46   :  { %v169_v0 = vld [vmem:[%s4598_s17] sm:$0xff]  ;;  %v170_v1 = vld [vmem:[%s4598_s17 + $0x8] sm:$0xff]  ;;  %v4561_v2 = vmov 0   ;;  %vm250_vm0 = vcmask 64512  }
  0x47   :  { %4290 = vset.pattern.permute.xlu0 %v4561_v2  ;;  %4291 = vset.pattern.permute.xlu1 %v4561_v2  ;;  %v245_v3 = vld [vmem:[%s4653_s12] sm:$0xff]  ;;  %v186_v6 = vld [vmem:[%s4603_s21 + $0x8] sm:$0xff] }
  0x48   :  { %v244_v4 = vld [vmem:[%s4583_s5] sm:$0xff]  ;;  %175 = vperm.xlu0 %4290, %v169_v0   ;;  %180 = vperm.xlu1 %4291, %v170_v1  }
  0x49   :  { %269 = vmatpush.msra.mxu1 %v245_v3  ;;  %v185_v5 = vld [vmem:[%s4603_s21] sm:$0xff] }
  0x4a   :  { %4033 = vmatmul.msk.f32.vlgmr.msra.gmra.mxu1 %vm250_vm0, %v244_v4 }
  0x4b   :  { %86 = vsyncpa [#allocation3], 0  ;;  %v201_v7 = vld [vmem:[%s4643_s30] sm:$0xf]  ;;  %vm213_vm1 = vcmask 1043456   ;;  %v275_v10 = vld [vmem:[%s4623_s8 + $0x8] sm:$0xff] }
  0x4c   :  { %4030 = vmatpush.msk.msra.mxu0 %vm213_vm1, %v201_v7  ;;  %v276_v8 = vld [vmem:[%s4608_s25] sm:$0xff]  ;;  %v172_v18 = vld [vmem:[%s4588_s9 + $0x8] sm:$0xff]  ;;  %vm206_vm2 = vcmask 31744   ;;  %v451_v28 = vld [vmem:[%s4683_s3 + $0x18] sm:$0xff]  ;;  %s5642_s0 = sld [smem:[#allocation5_spill]]  ;;  %vm349_vm3 = vcmask 261120  }
  0x4d   :  { %329 = vmatpush.msrb.mxu1 %v276_v8  ;;  %v274_v9 = vld [vmem:[%s4623_s8] sm:$0xff]  ;;  %4235 = vmatpush.msra.mxu3 %v276_v8  ;;  %v168_v20 = vld [vmem:[%s4593_s13 + $0x8] sm:$0xff]  ;;  %v450_v31 = vld [vmem:[%s4683_s3 + $0x10] sm:$0xff]  ;;  %s5643_s5 = sld [smem:[#allocation6_spill]]  ;;  %s4562_s25 = smov 96  }
  0x4e   :  { %4037 = vmatmul.msk.f32.vlgmr.msra.gmra.mxu3 %vm250_vm0, %v275_v10  ;;  %v171_v13 = vld [vmem:[%s4588_s9] sm:$0xff]  ;;  %v278_v30 = vld [vmem:[%s4628_s14 + $0x8] sm:$0xff]  ;;  %v344_v34 = vld [vmem:[%s4663_s27 + $0x18] sm:$0xff]  ;;  %s5644_s9 = sld [smem:[#allocation12_spill]]  ;;  %s4564_s30 = smov 88  }
  0x4f   :  { %v167_v14 = vld [vmem:[%s4593_s13] sm:$0xff]  ;;  %v449_v32 = vld [vmem:[%s4683_s3 + $0x8] sm:$0xff]  ;;  %v343_v35 = vld [vmem:[%s4663_s27 + $0x10] sm:$0xff]  ;;  %368 = vmatpush.msra.mxu1 %v344_v34  ;;  %s5645_s17 = sld [smem:[#allocation10_spill]]  ;;  %s4568_s28 = smov 56  }
  0x50   :  { %189 = vperm.xlu0 %4290, %v185_v5   ;;  %194 = vperm.xlu1 %4291, %v186_v6   ;;  %v4292_v21 = vld [vmem:[%s4658_s20] ss:$0 sm:$0xff]  ;;  %v342_v36 = vld [vmem:[%s4663_s27 + $0x8] sm:$0xff]  ;;  %s5646_s21 = sld [smem:[#allocation9_spill]]  ;;  %s4566_s20 = smov 120  }
  0x51   :  { %v277_v27 = vld [vmem:[%s4628_s14] sm:$0xff]  ;;  %369 = vmatpush.msra.mxu1 %v343_v35  ;;  %s5647_s8 = sld [smem:[#allocation7_spill]]  ;;  %s4563_s14 = smov 64  }
  0x52   :  { %4036 = vmatmul.msk.f32.vlgmr.msrb.gmra.mxu1 %vm250_vm0, %v274_v9  ;;  %v448_v33 = vld [vmem:[%s4683_s3] sm:$0xff]  ;;  %v241_v44 = vld [vmem:[%s5642_s0 + $0x8] sm:$0xff]  ;;  %s5648_s12 = sld [smem:[#allocation13_spill]]  ;;  %s5617_s1 = smov 72  }
  0x53   :  { %v341_v37 = vld [vmem:[%s4663_s27] sm:$0xff]  ;;  %370 = vmatpush.msra.mxu1 %v342_v36  ;;  %v338_v54 = vld [vmem:[%s5643_s5 + $0x8] sm:$0xff]  ;;  %s4567_s27 = smov 80   ;;  %s4570_s2 = smov 48  }
  0x54   :  { %v4293_v38 = vld [vmem:[%s4648_s6] ss:$0 sm:$0xff]  ;;  %s4565_s6 = smov 112   ;;  %s5615_s7 = smov 104  }
  0x55   :  { %371 = vmatpush.msra.mxu1 %v341_v37  ;;  %v240_v40 = vld [vmem:[%s5642_s0] sm:$0xff]  ;;  %v416_v60 = vld [vmem:[%s5645_s17 + $0x78] sm:$0xff]  ;;  %v415_v61 = vld [vmem:[%s5645_s17 + $0x70] sm:$0xff]  ;;  %s5613_s10 = smov 40   ;;  %s5649_s11 = sld [smem:[#allocation17_spill]] }
  0x56   :  { %v337_v48 = vld [vmem:[%s5643_s5] sm:$0xff]  ;;  %421 = vmatpush.msrb.mxu0 %v416_v60  ;;  %v414_v62 = vld [vmem:[%s5645_s17 + $0x68] sm:$0xff]  ;;  %v403_v34 = vld [vmem:[%s5645_s17 + $0x10] sm:$0xff]  ;;  %s5650_s15 = sld [smem:[#allocation11_spill]] }
  0x57   :  { %v4294_v57 = vld [vmem:[%s5644_s9] ss:$0 sm:$0xff]  ;;  %v402_v36 = vld [vmem:[%s5645_s17 + $0x8] sm:$0xff]  ;;  %s5651_s16 = sld [smem:[#allocation14_spill]] }
  0x58   :  { %422 = vmatpush.msrb.mxu0 %v415_v61  ;;  %v4295_v2 = vld [vmem:[%s5646_s21] ss:$0 sm:$0xff]  ;;  %s5652_s18 = sld [smem:[#allocation18_spill]] }
  0x59   :  { %v401_v37 = vld [vmem:[%s5645_s17] sm:$0xff]  ;;  %s5653_s22 = sld [smem:[#allocation15_spill]] }
  0x5a   :  { %423 = vmatpush.msrb.mxu0 %v414_v62  ;;  %s5654_s23 = sld [smem:[#allocation21_spill]] }
  0x5b   :  { %s5655_s26 = sld [smem:[#allocation22_spill]] }
  0x5c   :  { %s5656_s0 = sld [smem:[#allocation16_spill]] }
  0x5d   :  { %s5657_s5 = sld [smem:[#allocation8_spill]] }
  0x5e   :  { %s5659_s21 = sld [smem:[#allocation20_spill]] }
  0xba   :  { %v176_v11 = vpop.permute.xlu0 %175  ;;  %v181_v12 = vpop.permute.xlu1 %180 }
  0xbb   :  { %v183_v16 = vmul.f32 %v176_v11, %v171_v13  ;;  %v184_v23 = vmul.f32 %v181_v12, %v172_v18 }
  0xc2   :  { %v190_v15 = vpop.permute.xlu0 %189  ;;  %v195_v19 = vpop.permute.xlu1 %194 }
  0xc3   :  { %v197_v17 = vmul.f32 %v190_v15, %v167_v14  ;;  %v198_v24 = vmul.f32 %v195_v19, %v168_v20  ;;  %v411_v19 = vld [vmem:[%s5645_s17 + $0x50] sm:$0xff]  ;;  %v410_v20 = vld [vmem:[%s5645_s17 + $0x48] sm:$0xff] }
  0xc5   :  { %v199_v22 = vadd.f32 %v197_v17, %v183_v16  ;;  %v200_v29 = vadd.f32 %v198_v24, %v184_v23  ;;  %v413_v16 = vld [vmem:[%s5645_s17 + $0x60] sm:$0xff]  ;;  %v412_v17 = vld [vmem:[%s5645_s17 + $0x58] sm:$0xff] }
  0xc6   :  { %424 = vmatpush.msrb.mxu0 %v413_v16  ;;  %v409_v23 = vld [vmem:[%s5645_s17 + $0x40] sm:$0xff] }
  0xc7   :  { %4031 = vmatmul.msk.f32.vlgmr.msra.gmra.mxu0 %vm206_vm2, %v199_v22  ;;  %v271_v25 = vpop.f32.mrf.mxu1 }
  0xc8   :  { %v272_v26 = vadd.f32 %v4292_v21, %v271_v25  ;;  %425 = vmatpush.msrb.mxu0 %v412_v17  ;;  %v408_v25 = vld [vmem:[%s5645_s17 + $0x38] sm:$0xff] }
  0xca   :  { %300 = vmatpush.msra.mxu2 %v272_v26  ;;  %426 = vmatpush.msrb.mxu0 %v411_v19 }
  0xcb   :  { %4034 = vmatmul.msk.f32.vlgmr.msra.gmra.mxu2 %vm250_vm0, %v277_v27  ;;  %v407_v27 = vld [vmem:[%s5645_s17 + $0x30] sm:$0xff] }
  0xcc   :  { %474 = vmatpush.msrb.mxu2 %v451_v28  ;;  %427 = vmatpush.msrb.mxu0 %v410_v20  ;;  %v406_v28 = vld [vmem:[%s5645_s17 + $0x28] sm:$0xff] }
  0xce   :  { %475 = vmatpush.msrb.mxu2 %v450_v31  ;;  %428 = vmatpush.msrb.mxu0 %v409_v23  ;;  %v405_v31 = vld [vmem:[%s5645_s17 + $0x20] sm:$0xff] }
  0xcf   :  { %4032 = vmatmul.msk.f32.gmra.mxu0 %vm206_vm2, %v200_v29  ;;  %v331_v45 = vpop.f32.mrf.mxu1 }
  0xd0   :  { %476 = vmatpush.msrb.mxu2 %v449_v32  ;;  %429 = vmatpush.msrb.mxu0 %v408_v25  ;;  %v404_v32 = vld [vmem:[%s5645_s17 + $0x18] sm:$0xff]  ;;  %s5658_s17 = sld [smem:[#allocation19_spill]] }
  0xd1   :  { %v334_v52 = vpop.f32.mrf.mxu3 }
  0xd2   :  { %477 = vmatpush.msrb.mxu2 %v448_v33  ;;  %430 = vmatpush.msrb.mxu0 %v407_v27  ;;  %v486_v27 = vld [vmem:[%s5648_s12 + $0x8] sm:$0xff] }
  0xd3   :  { %4035 = vmatmul.msk.f32.gmra.mxu2 %vm250_vm0, %v278_v30 }
  0xd4   :  { %431 = vmatpush.msrb.mxu0 %v406_v28 }
  0xd6   :  { %432 = vmatpush.msrb.mxu0 %v405_v31 }
  0xd8   :  { %433 = vmatpush.msrb.mxu0 %v404_v32 }
  0xda   :  { %434 = vmatpush.msrb.mxu0 %v403_v34 }
  0xdc   :  { %435 = vmatpush.msrb.mxu0 %v402_v36 }
  0xde   :  { %436 = vmatpush.msrb.mxu0 %v401_v37 }
 0x144   :  { %v234_v39 = vpop.f32.mrf.mxu0 }
 0x145   :  { %v235_v41 = vadd.f32 %v4293_v38, %v234_v39 }
 0x147   :  { %v4819_v42 = vadd.f32 %v240_v40, %v235_v41 }
 0x149   :  { %4040 = vmatmul.msk.f32.vlgmr.msrb.gmra.mxu2 %vm349_vm3, %v4819_v42 }
 0x14c   :  { %v237_v43 = vpop.f32.mrf.mxu0 }
 0x14d   :  { %v238_v46 = vadd.f32 %v4293_v38, %v237_v43 }
 0x14e   :  { %v302_v47 = vpop.f32.mrf.mxu2 }
 0x14f   :  { %v4825_v49 = vadd.f32 %v241_v44, %v238_v46  ;;  %v332_v50 = vadd.f32 %v331_v45, %v302_v47  ;;  %v4865_v45 = vld [vmem:[%s5647_s8] sm:$0xff] }
 0x151   :  { %4041 = vmatmul.msk.f32.gmra.mxu2 %vm349_vm3, %v4825_v49  ;;  %v339_v51 = vadd.f32 %v337_v48, %v332_v50 }
 0x153   :  { %4038 = vmatmul.msk.f32.vlgmr.msra.gmra.mxu1 %vm349_vm3, %v339_v51 }
 0x156   :  { %v305_v53 = vpop.f32.mrf.mxu2 }
 0x157   :  { %v335_v55 = vadd.f32 %v334_v52, %v305_v53 }
 0x159   :  { %v340_v56 = vadd.f32 %v338_v54, %v335_v55 }
 0x15b   :  { %4039 = vmatmul.msk.f32.gmra.mxu1 %vm349_vm3, %v340_v56 }
 0x1cc   :  { %v479_v58 = vpop.f32.mrf.mxu2 }
 0x1cd   :  { %v4833_v59 = vadd.f32 %v4294_v57, %v479_v58 }
 0x1cf   :  { %495 = vrot.lane.b32.xlu2 %v4833_v59, %s4562_s25 }
 0x1d0   :  { %v373_v1 = vpop.f32.mrf.mxu1 }
 0x1d1   :  { %v374_v3 = vadd.f32 %v4295_v2, %v373_v1 }
 0x1d3   :  { %v381_v4 = vand.u32 2147483647, %v374_v3  ;;  %v379_v21 = vmax.f32 %v374_v3, 0.0 }
 0x1d4   :  { %v482_v63 = vpop.f32.mrf.mxu2 }
 0x1d5   :  { %v4840_v0 = vadd.f32 %v4294_v57, %v482_v63  ;;  %v383_v6 = vsub.f32 0.0, %v381_v4  ;;  %v485_v4 = vld [vmem:[%s5648_s12] sm:$0xff] }
 0x1d6   :  { %647 = vmatpush.msra.mxu2 %v485_v4 }
 0x1d7   :  { %522 = vrot.lane.b32.xlu2 %v4840_v0, %s4562_s25  ;;  %v385_v8 = vmul.f32 1.442695, %v383_v6 }
 0x1d8   :  { %v376_v5 = vpop.f32.mrf.mxu1 }
 0x1d9   :  { %v377_v7 = vadd.f32 %v4295_v2, %v376_v5  ;;  %4313 = vpow2.f32 %v385_v8 }
 0x1db   :  { %v382_v9 = vand.u32 2147483647, %v377_v7  ;;  %v380_v29 = vmax.f32 %v377_v7, 0.0 }
 0x1dd   :  { %v384_v10 = vsub.f32 0.0, %v382_v9 }
 0x1df   :  { %v387_v11 = vmul.f32 1.442695, %v384_v10  ;;  %v4314_v12 = vpop.eup %4313 }
 0x1e0   :  { %v389_v13 = vadd.f32 1.0, %v4314_v12 }
 0x1e1   :  { %4315 = vpow2.f32 %v387_v11 }
 0x1e2   :  { %4317 = vlog2.f32 %v389_v13 }
 0x1e7   :  { %v4316_v14 = vpop.eup %4315 }
 0x1e8   :  { %v390_v15 = vadd.f32 1.0, %v4316_v14  ;;  %v4318_v18 = vpop.eup %4317 }
 0x1e9   :  { %v392_v22 = vmul.f32 0.6931472, %v4318_v18 }
 0x1ea   :  { %4319 = vlog2.f32 %v390_v15 }
 0x1eb   :  { %v395_v24 = vadd.f32 %v392_v22, %v379_v21 }
 0x1ed   :  { %4321 = vtanh.f32 %v395_v24 }
 0x1f0   :  { %v4320_v26 = vpop.eup %4319 }
 0x1f1   :  { %v394_v30 = vmul.f32 0.6931472, %v4320_v26 }
 0x1f3   :  { %v396_v33 = vadd.f32 %v394_v30, %v380_v29  ;;  %v4322_v35 = vpop.eup %4321 }
 0x1f4   :  { %v399_v38 = vmul.f32 %v4322_v35, %v374_v3 }
 0x1f5   :  { %4323 = vtanh.f32 %v396_v33 }
 0x1f6   :  { %437 = vmatmul.f32.vlgmr.msrb.gmra.mxu0 %v399_v38 }
 0x1fb   :  { %v4324_v39 = vpop.eup %4323 }
 0x1fc   :  { %v400_v40 = vmul.f32 %v4324_v39, %v377_v7 }
 0x1fe   :  { %440 = vmatmul.f32.gmra.mxu0 %v400_v40 }
 0x229   :  { %v496_v41 = vpop.permute.xlu2 %495 }
 0x22a   :  { %4042 = vmatpush.xpose.msk.msrb.mxu3 %vm250_vm0, %v496_v41 }
 0x22d   :  { %4043 = vmatmul.msk.f32.vlgmr.msrb.gmra.mxu3 %vm250_vm0, %v4833_v59 }
 0x231   :  { %v523_v43 = vpop.permute.xlu2 %522 }
 0x232   :  { %4044 = vmatpush.xpose.msk.msrb.mxu1 %vm250_vm0, %v523_v43 }
 0x235   :  { %4045 = vmatmul.msk.f32.vlgmr.msrb.gmra.mxu1 %vm250_vm0, %v4840_v0 }
 0x2b0   :  { %v518_v44 = vpop.f32.mrf.mxu3 }
 0x2b1   :  { %v548_v46 = vmul.f32 0.35355338, %v518_v44 }
 0x2b2   :  { %v545_v47 = vpop.f32.mrf.mxu1 }
 0x2b3   :  { %v549_v48 = vmul.f32 0.35355338, %v545_v47  ;;  %v550_v50 = vadd.f32 %v548_v46, %v4865_v45 }
 0x2b5   :  { %v552_v51 = vsel %vm250_vm0, %v550_v50, -inf  ;;  %v551_v52 = vadd.f32 %v549_v48, %v4865_v45 }
 0x2b6   :  { %553 = vmax.xlane.f32.xlu0 %v552_v51 }
 0x2b7   :  { %v555_v53 = vsel %vm250_vm0, %v551_v52, -inf }
 0x2b8   :  { %556 = vmax.xlane.f32.xlu1 %v555_v53 }
 0x2d1   :  { %600 = vrot.lane.b32.xlu1 %v4840_v0, %s4563_s14 }
 0x2d9   :  { %687 = vrot.lane.b32.xlu1 %v4840_v0, %s4564_s30 }
 0x2e1   :  { %822 = vrot.lane.b32.xlu1 %v4833_v59, %s4565_s6 }
 0x329   :  { %v554_v54 = vpop.xlane.xlu0 %553 }
 0x32a   :  { %v558_v55 = vsub.f32 %v550_v50, %v554_v54 }
 0x32b   :  { %v557_v56 = vpop.xlane.xlu1 %556 }
 0x32c   :  { %v560_v57 = vmul.f32 1.442695, %v558_v55  ;;  %v559_v58 = vsub.f32 %v551_v52, %v557_v56 }
 0x32e   :  { %4325 = vpow2.f32 %v560_v57  ;;  %v562_v60 = vmul.f32 1.442695, %v559_v58 }
 0x330   :  { %4327 = vpow2.f32 %v562_v60 }
 0x334   :  { %v4326_v61 = vpop.eup %4325 }
 0x335   :  { %v564_v62 = vsel %vm250_vm0, %v4326_v61, 0.0 }
 0x336   :  { %v4328_v63 = vpop.eup %4327  ;;  %565 = vadd.xlane.f32.xlu2 %v564_v62 }
 0x337   :  { %v567_v1 = vsel %vm250_vm0, %v4328_v63, 0.0 }
 0x338   :  { %568 = vadd.xlane.f32.xlu0 %v567_v1 }
 0x343   :  { %v601_v2 = vpop.permute.xlu1 %600 }
 0x344   :  { %621 = vmatpush.msra.mxu1 %v601_v2  ;;  %v4936_v2 = vpop.f32.mrf.mxu0 }
 0x34b   :  { %v688_v3 = vpop.permute.xlu1 %687 }
 0x34c   :  { %659 = vrot.lane.b32.xlu0 %v4833_v59, %s4564_s30  ;;  %4052 = vmatpush.xpose.msk.msrb.mxu1 %vm250_vm0, %v688_v3 }
 0x34e   :  { %574 = vrot.lane.b32.xlu2 %v4833_v59, %s4563_s14 }
 0x353   :  { %v823_v21 = vpop.permute.xlu1 %822 }
 0x354   :  { %685 = vrot.lane.b32.xlu0 %v4840_v0, %s4566_s20 }
 0x356   :  { %657 = vrot.lane.b32.xlu2 %v4833_v59, %s4566_s20 }
 0x35e   :  { %824 = vrot.lane.b32.xlu2 %v4833_v59, %s4567_s27 }
 0x3a9   :  { %v566_v5 = vpop.xlane.xlu2 %565 }
 0x3aa   :  { %4329 = vrcp.f32 %v566_v5  ;;  %v4938_v5 = vpop.f32.mrf.mxu0 }
 0x3ab   :  { %v569_v6 = vpop.xlane.xlu0 %568 }
 0x3ac   :  { %4331 = vrcp.f32 %v569_v6 }
 0x3b0   :  { %v4330_v7 = vpop.eup %4329 }
 0x3b1   :  { %v572_v8 = vmul.f32 %v4330_v7, %v4326_v61  ;;  %v575_v9 = vpop.permute.xlu2 %574 }
 0x3b2   :  { %v4332_v10 = vpop.eup %4331  ;;  %595 = vmatpush.msra.mxu3 %v575_v9 }
 0x3b3   :  { %v573_v11 = vmul.f32 %v4332_v10, %v4328_v63  ;;  %4046 = vmatmul.msk.f32.vlgmr.msra.gmra.mxu3 %vm250_vm0, %v572_v8 }
 0x3b5   :  { %4047 = vmatmul.msk.f32.vlgmr.msra.gmra.mxu1 %vm250_vm0, %v573_v11 }
 0x3b6   :  { %812 = vmatpush.msra.mxu1 %v486_v27 }
 0x3b9   :  { %v658_v12 = vpop.permute.xlu2 %657 }
 0x3be   :  { %v660_v13 = vpop.permute.xlu0 %659 }
 0x3bf   :  { %4050 = vmatpush.xpose.msk.msrb.mxu3 %vm250_vm0, %v660_v13 }
 0x3c1   :  { %v825_v14 = vpop.permute.xlu2 %824 }
 0x3c2   :  { %4051 = vmatmul.msk.f32.vlgmr.msrb.gmra.mxu3 %vm250_vm0, %v658_v12  ;;  %4058 = vmatpush.xpose.msk.msrb.mxu2 %vm250_vm0, %v825_v14  ;;  %v487_v12 = vld [vmem:[%s5648_s12 + $0x10] sm:$0xff] }
 0x3c6   :  { %v686_v15 = vpop.permute.xlu0 %685 }
 0x3c7   :  { %4053 = vmatmul.msk.f32.vlgmr.msrb.gmra.mxu1 %vm250_vm0, %v686_v15 }
 0x432   :  { %v623_v17 = vpop.f32.mrf.mxu1 }
 0x436   :  { %v597_v16 = vpop.f32.mrf.mxu3 }
 0x437   :  { %4048 = vmatmul.msk.f32.vlgmr.msra.gmra.mxu2 %vm250_vm0, %v597_v16 }
 0x43f   :  { %4049 = vmatmul.msk.f32.gmra.mxu2 %vm250_vm0, %v623_v17 }
 0x444   :  { %v710_v18 = vpop.f32.mrf.mxu1 }
 0x445   :  { %v714_v19 = vmul.f32 0.35355338, %v710_v18  ;;  %v682_v20 = vpop.f32.mrf.mxu3 }
 0x446   :  { %v713_v22 = vmul.f32 0.35355338, %v682_v20 }
 0x447   :  { %4059 = vmatmul.msk.f32.vlgmr.msrb.gmra.mxu2 %vm250_vm0, %v823_v21  ;;  %v716_v23 = vadd.f32 %v714_v19, %v4865_v45 }
 0x448   :  { %v715_v24 = vadd.f32 %v713_v22, %v4865_v45 }
 0x449   :  { %v720_v25 = vsel %vm250_vm0, %v716_v23, -inf }
 0x44a   :  { %721 = vmax.xlane.f32.xlu2 %v720_v25  ;;  %v717_v26 = vsel %vm250_vm0, %v715_v24, -inf }
 0x44b   :  { %718 = vmax.xlane.f32.xlu0 %v717_v26 }
 0x462   :  { %739 = vrot.lane.b32.xlu2 %v4833_v59, %s4568_s28 }
 0x46a   :  { %850 = vrot.lane.b32.xlu2 %v4840_v0, %s4565_s6 }
 0x472   :  { %989 = vrot.lane.b32.xlu2 %v4833_v59, %s5617_s1 }
 0x47a   :  { %1017 = vrot.lane.b32.xlu2 %v4840_v0, %s5617_s1 }
 0x4ba   :  { %v4913_v28 = vpop.f32.mrf.mxu2 }
 0x4bd   :  { %v722_v29 = vpop.xlane.xlu2 %721 }
 0x4be   :  { %v719_v30 = vpop.xlane.xlu0 %718  ;;  %v724_v35 = vsub.f32 %v716_v23, %v722_v29 }
 0x4bf   :  { %v723_v31 = vsub.f32 %v715_v24, %v719_v30 }
 0x4c0   :  { %v727_v37 = vmul.f32 1.442695, %v724_v35 }
 0x4c1   :  { %v725_v32 = vmul.f32 1.442695, %v723_v31 }
 0x4c2   :  { %v4915_v33 = vpop.f32.mrf.mxu2 }
 0x4c3   :  { %4333 = vpow2.f32 %v725_v32 }
 0x4c4   :  { %4335 = vpow2.f32 %v727_v37 }
 0x4c5   :  { %v740_v34 = vpop.permute.xlu2 %739 }
 0x4c6   :  { %760 = vmatpush.msra.mxu3 %v740_v34 }
 0x4c9   :  { %v4334_v36 = vpop.eup %4333 }
 0x4ca   :  { %v847_v38 = vpop.f32.mrf.mxu2  ;;  %v729_v39 = vsel %vm250_vm0, %v4334_v36, 0.0  ;;  %v4336_v46 = vpop.eup %4335 }
 0x4cb   :  { %v878_v40 = vmul.f32 0.35355338, %v847_v38  ;;  %730 = vadd.xlane.f32.xlu0 %v729_v39  ;;  %v732_v48 = vsel %vm250_vm0, %v4336_v46, 0.0 }
 0x4cd   :  { %v851_v41 = vpop.permute.xlu2 %850  ;;  %v880_v43 = vadd.f32 %v878_v40, %v4865_v45 }
 0x4cf   :  { %v882_v44 = vsel %vm250_vm0, %v880_v43, -inf }
 0x4d0   :  { %883 = vmax.xlane.f32.xlu1 %v882_v44 }
 0x4d5   :  { %v990_v47 = vpop.permute.xlu2 %989 }
 0x4d8   :  { %733 = vadd.xlane.f32.xlu1 %v732_v48 }
 0x4dd   :  { %v1018_v50 = vpop.permute.xlu2 %1017 }
 0x4de   :  { %4068 = vmatpush.xpose.msk.msrb.mxu1 %vm250_vm0, %v1018_v50 }
 0x4df   :  { %765 = vrot.lane.b32.xlu0 %v4840_v0, %s4568_s28 }
 0x4e7   :  { %904 = vrot.lane.b32.xlu0 %v4833_v59, %s4570_s2 }
 0x4ef   :  { %987 = vrot.lane.b32.xlu0 %v4833_v59, %s5615_s7 }
 0x4f7   :  { %1015 = vrot.lane.b32.xlu0 %v4840_v0, %s5615_s7 }
 0x53e   :  { %v731_v51 = vpop.xlane.xlu0 %730 }
 0x53f   :  { %4337 = vrcp.f32 %v731_v51 }
 0x543   :  { %v884_v52 = vpop.xlane.xlu1 %883 }
 0x544   :  { %v888_v53 = vsub.f32 %v880_v43, %v884_v52 }
 0x545   :  { %v4338_v54 = vpop.eup %4337 }
 0x546   :  { %v737_v55 = vmul.f32 %v4338_v54, %v4334_v36  ;;  %v890_v56 = vmul.f32 1.442695, %v888_v53  ;;  %v1251_v54 = vld [vmem:[%s5649_s11 + $0x18] sm:$0xff] }
 0x548   :  { %4339 = vpow2.f32 %v890_v56  ;;  %4054 = vmatmul.msk.f32.vlgmr.msra.gmra.mxu3 %vm250_vm0, %v737_v55  ;;  %v1250_v55 = vld [vmem:[%s5649_s11 + $0x10] sm:$0xff]  ;;  %v1249_v56 = vld [vmem:[%s5649_s11 + $0x8] sm:$0xff] }
 0x54b   :  { %v734_v57 = vpop.xlane.xlu1 %733 }
 0x54c   :  { %4341 = vrcp.f32 %v734_v57  ;;  %v1248_v57 = vld [vmem:[%s5649_s11] sm:$0xff] }
 0x54e   :  { %v4340_v58 = vpop.eup %4339 }
 0x54f   :  { %v894_v60 = vsel %vm250_vm0, %v4340_v58, 0.0 }
 0x550   :  { %895 = vadd.xlane.f32.xlu1 %v894_v60 }
 0x551   :  { %v766_v61 = vpop.permute.xlu0 %765 }
 0x552   :  { %v4342_v62 = vpop.eup %4341  ;;  %786 = vmatpush.msra.mxu0 %v766_v61 }
 0x553   :  { %v738_v63 = vmul.f32 %v4342_v62, %v4336_v46 }
 0x555   :  { %4055 = vmatmul.msk.f32.vlgmr.msra.gmra.mxu0 %vm250_vm0, %v738_v63  ;;  %v4296_v63 = vld [vmem:[%s5650_s15] ss:$0 sm:$0xff]  ;;  %s5660_s15 = sld [smem:[#allocation23_spill]] }
 0x559   :  { %v905_v1 = vpop.permute.xlu0 %904 }
 0x55a   :  { %925 = vmatpush.msrb.mxu0 %v905_v1 }
 0x55c   :  { %4066 = vmatpush.xpose.msk.msra.mxu0 %vm250_vm0, %v990_v47 }
 0x561   :  { %v988_v8 = vpop.permute.xlu0 %987 }
 0x569   :  { %852 = vrot.lane.b32.xlu1 %v4840_v0, %s4567_s27  ;;  %v1016_v10 = vpop.permute.xlu0 %1015 }
 0x5c3   :  { %v896_v3 = vpop.xlane.xlu1 %895 }
 0x5c4   :  { %4343 = vrcp.f32 %v896_v3  ;;  %v4979_v3 = vadd.f32 %v4296_v63, %v4936_v2 }
 0x5ca   :  { %v4344_v4 = vpop.eup %4343 }
 0x5cb   :  { %v902_v6 = vmul.f32 %v4344_v4, %v4340_v58  ;;  %v762_v7 = vpop.f32.mrf.mxu3  ;;  %v488_v58 = vld [vmem:[%s5648_s12 + $0x18] sm:$0xff] }
 0x5cc   :  { %4056 = vmatmul.msk.f32.vlgmr.msra.gmra.mxu1 %vm250_vm0, %v762_v7 }
 0x5cd   :  { %4062 = vmatmul.msk.f32.vlgmr.msrb.gmra.mxu0 %vm250_vm0, %v902_v6  ;;  %1142 = vmatpush.msra.mxu1 %v488_v58  ;;  %v4985_v6 = vadd.f32 %v4296_v63, %v4938_v5  ;;  %v5025_v58 = vld [vmem:[%s5655_s26] sm:$0x7] }
 0x5ce   :  { %v1208_v63 = vperm.slane %v5025_v58, 0 }
 0x5d2   :  { %v788_v9 = vpop.f32.mrf.mxu0 }
 0x5d4   :  { %4057 = vmatmul.msk.f32.gmra.mxu1 %vm250_vm0, %v788_v9 }
 0x5d5   :  { %4067 = vmatmul.msk.f32.vlgmr.msra.gmra.mxu0 %vm250_vm0, %v988_v8  ;;  %v4297_v8 = vld [vmem:[%s5651_s16] ss:$0 sm:$0xff] }
 0x5d6   :  { %v656_v9 = vadd.f32 %v4297_v8, %v4915_v33 }
 0x5db   :  { %v853_v11 = vpop.permute.xlu1 %852 }
 0x5dc   :  { %4060 = vmatpush.xpose.msk.msrb.mxu3 %vm250_vm0, %v853_v11  ;;  %4069 = vmatmul.msk.f32.vlgmr.msrb.gmra.mxu1 %vm250_vm0, %v1016_v10  ;;  %v655_v11 = vadd.f32 %v4297_v8, %v4913_v28 }
 0x5df   :  { %4061 = vmatmul.msk.f32.vlgmr.msrb.gmra.mxu3 %vm250_vm0, %v851_v41 }
 0x5e0   :  { %977 = vmatpush.msra.mxu3 %v487_v12 }
 0x5e2   :  { %1274 = vmatpush.msrb.mxu3 %v1251_v54 }
 0x5e4   :  { %1275 = vmatpush.msrb.mxu3 %v1250_v55  ;;  %v5022_v55 = vld [vmem:[%s5654_s23] sm:$0x7] }
 0x5e6   :  { %1276 = vmatpush.msrb.mxu3 %v1249_v56 }
 0x5e8   :  { %1277 = vmatpush.msrb.mxu3 %v1248_v57 }
 0x649   :  { %v4955_v22 = vpop.f32.mrf.mxu1 }
 0x64a   :  { %v927_v13 = vpop.f32.mrf.mxu0 }
 0x64b   :  { %4064 = vmatmul.msk.f32.vlgmr.msra.gmra.mxu3 %vm250_vm0, %v927_v13 }
 0x651   :  { %v4957_v23 = vpop.f32.mrf.mxu1 }
 0x652   :  { %v1012_v14 = vpop.f32.mrf.mxu0  ;;  %v821_v2 = vadd.f32 %v4957_v23, %v656_v9 }
 0x653   :  { %v1043_v15 = vmul.f32 0.35355338, %v1012_v14  ;;  %v820_v14 = vadd.f32 %v4955_v22, %v655_v11  ;;  %v4573_v22 = vmov 32.0  }
 0x655   :  { %v1045_v16 = vadd.f32 %v1043_v15, %v4865_v45 }
 0x657   :  { %v1047_v17 = vsel %vm250_vm0, %v1045_v16, -inf }
 0x658   :  { %1048 = vmax.xlane.f32.xlu2 %v1047_v17 }
 0x659   :  { %v1040_v29 = vpop.f32.mrf.mxu1 }
 0x65a   :  { %v1044_v31 = vmul.f32 0.35355338, %v1040_v29 }
 0x65c   :  { %v1046_v35 = vadd.f32 %v1044_v31, %v4865_v45 }
 0x65e   :  { %v1050_v38 = vsel %vm250_vm0, %v1046_v35, -inf }
 0x662   :  { %v875_v18 = vpop.f32.mrf.mxu3 }
 0x663   :  { %v879_v19 = vmul.f32 0.35355338, %v875_v18 }
 0x665   :  { %v881_v20 = vadd.f32 %v879_v19, %v4865_v45 }
 0x667   :  { %v885_v21 = vsel %vm250_vm0, %v881_v20, -inf }
 0x668   :  { %886 = vmax.xlane.f32.xlu1 %v885_v21 }
 0x670   :  { %930 = vrot.lane.b32.xlu2 %v4840_v0, %s4570_s2 }
 0x6cb   :  { %v1049_v24 = vpop.xlane.xlu2 %1048 }
 0x6cc   :  { %v1053_v25 = vsub.f32 %v1045_v16, %v1049_v24  ;;  %v4298_v16 = vld [vmem:[%s5652_s18] ss:$0 sm:$0xff] }
 0x6ce   :  { %v1055_v26 = vmul.f32 1.442695, %v1053_v25  ;;  %v979_v7 = vpop.f32.mrf.mxu3 }
 0x6cf   :  { %v985_v5 = vadd.f32 %v979_v7, %v820_v14 }
 0x6d0   :  { %4345 = vpow2.f32 %v1055_v26 }
 0x6d3   :  { %v931_v27 = vpop.permute.xlu2 %930 }
 0x6d4   :  { %951 = vmatpush.msra.mxu2 %v931_v27 }
 0x6d6   :  { %v4346_v30 = vpop.eup %4345 }
 0x6d7   :  { %v1059_v32 = vsel %vm250_vm0, %v4346_v30, 0.0 }
 0x6d8   :  { %1060 = vadd.xlane.f32.xlu1 %v1059_v32 }
 0x6db   :  { %v887_v34 = vpop.xlane.xlu1 %886 }
 0x6dc   :  { %v889_v36 = vsub.f32 %v881_v20, %v887_v34 }
 0x6de   :  { %v892_v37 = vmul.f32 1.442695, %v889_v36 }
 0x6e0   :  { %4347 = vpow2.f32 %v892_v37  ;;  %1051 = vmax.xlane.f32.xlu1 %v1050_v38 }
 0x6e6   :  { %v4348_v39 = vpop.eup %4347 }
 0x6e7   :  { %v897_v40 = vsel %vm250_vm0, %v4348_v39, 0.0 }
 0x6e8   :  { %898 = vadd.xlane.f32.xlu0 %v897_v40  ;;  %v1213_v40 = vld [vmem:[%s5653_s22 + $0x10] sm:$0xff] }
 0x6fc   :  { %1069 = vrot.lane.b32.xlu0 %v4833_v59, %s5613_s10 }
 0x74b   :  { %v1061_v41 = vpop.xlane.xlu1 %1060 }
 0x753   :  { %v1052_v43 = vpop.xlane.xlu1 %1051 }
 0x754   :  { %v1054_v44 = vsub.f32 %v1046_v35, %v1052_v43  ;;  %v1211_v43 = vld [vmem:[%s5653_s22] sm:$0xff] }
 0x756   :  { %v1057_v46 = vmul.f32 1.442695, %v1054_v44 }
 0x758   :  { %4349 = vpow2.f32 %v1057_v46 }
 0x75b   :  { %v899_v45 = vpop.xlane.xlu0 %898 }
 0x75c   :  { %4351 = vrcp.f32 %v899_v45 }
 0x75d   :  { %4353 = vrcp.f32 %v1061_v41  ;;  %v1212_v41 = vld [vmem:[%s5653_s22 + $0x8] sm:$0xff] }
 0x75e   :  { %v4350_v47 = vpop.eup %4349 }
 0x75f   :  { %v1062_v48 = vsel %vm250_vm0, %v4350_v47, 0.0 }
 0x760   :  { %1063 = vadd.xlane.f32.xlu1 %v1062_v48 }
 0x762   :  { %v4352_v50 = vpop.eup %4351 }
 0x763   :  { %v903_v51 = vmul.f32 %v4352_v50, %v4348_v39  ;;  %v4354_v59 = vpop.eup %4353  ;;  %v1214_v39 = vld [vmem:[%s5653_s22 + $0x18] sm:$0xff] }
 0x764   :  { %v1067_v52 = vmul.f32 %v4354_v59, %v4346_v30 }
 0x765   :  { %4063 = vmatmul.msk.f32.vlgmr.msra.gmra.mxu2 %vm250_vm0, %v903_v51 }
 0x76e   :  { %v1070_v53 = vpop.permute.xlu0 %1069 }
 0x76f   :  { %1090 = vmatpush.msrb.mxu2 %v1070_v53 }
 0x770   :  { %4070 = vmatmul.msk.f32.vlgmr.msrb.gmra.mxu2 %vm250_vm0, %v1067_v52 }
 0x771   :  { %1237 = vmatpush.msra.mxu2 %v1214_v39 }
 0x773   :  { %1238 = vmatpush.msra.mxu2 %v1213_v40 }
 0x775   :  { %1239 = vmatpush.msra.mxu2 %v1212_v41 }
 0x777   :  { %1240 = vmatpush.msra.mxu2 %v1211_v43 }
 0x779   :  { %1095 = vrot.lane.b32.xlu1 %v4840_v0, %s5613_s10  ;;  %s5661_s10 = sld [smem:[#allocation25_spill]] }
 0x7d3   :  { %v1064_v60 = vpop.xlane.xlu1 %1063 }
 0x7d4   :  { %4355 = vrcp.f32 %v1064_v60  ;;  %v1205_v60 = vperm.slane %v5022_v55, 0 }
 0x7d5   :  { %4357 = vrcp.f32 %v4573_v22 }
 0x7da   :  { %v4356_v61 = vpop.eup %4355 }
 0x7db   :  { %v1068_v0 = vmul.f32 %v4356_v61, %v4350_v47  ;;  %v4358_v23 = vpop.eup %4357 }
 0x7dc   :  { %v1161_v24 = vmul.f32 32.0, %v4358_v23  ;;  %vm1165_vm4 = vweird.f32 %v4358_v23 }
 0x7de   :  { %v1162_v25 = vsub.f32 1.0, %v1161_v24 }
 0x7e8   :  { %v953_v62 = vpop.f32.mrf.mxu2 }
 0x7e9   :  { %4065 = vmatmul.msk.f32.gmra.mxu3 %vm250_vm0, %v953_v62 }
 0x7eb   :  { %v1096_v1 = vpop.permute.xlu1 %1095 }
 0x7ec   :  { %1116 = vmatpush.msrb.mxu0 %v1096_v1 }
 0x7ed   :  { %4071 = vmatmul.msk.f32.vlgmr.msrb.gmra.mxu0 %vm250_vm0, %v1068_v0 }
 0x7f1   :  { %4076 = vmatmul.msk.f32.vlgmr.msrb.gmra.mxu3 %vm349_vm3, %v4979_v3 }
 0x7f3   :  { %v1092_v4 = vpop.f32.mrf.mxu2 }
 0x7f4   :  { %4072 = vmatmul.msk.f32.vlgmr.msra.gmra.mxu1 %vm250_vm0, %v1092_v4 }
 0x7f9   :  { %4077 = vmatmul.msk.f32.gmra.mxu3 %vm349_vm3, %v4985_v6 }
 0x86a   :  { %v1118_v10 = vpop.f32.mrf.mxu0 }
 0x86b   :  { %4073 = vmatmul.msk.f32.gmra.mxu1 %vm250_vm0, %v1118_v10 }
 0x86c   :  { %v982_v12 = vpop.f32.mrf.mxu3 }
 0x86d   :  { %v986_v13 = vadd.f32 %v982_v12, %v821_v2 }
 0x871   :  { %v1144_v15 = vpop.f32.mrf.mxu1 }
 0x872   :  { %v1150_v17 = vadd.f32 %v1144_v15, %v985_v5 }
 0x874   :  { %v1279_v18 = vpop.f32.mrf.mxu3  ;;  %v1152_v19 = vadd.f32 %v1150_v17, %v4819_v42  ;;  %v1163_v42 = vmul.f32 %v4358_v23, %v1162_v25  ;;  %v4299_v17 = vld [vmem:[%s5656_s0] ss:$0 sm:$0xff] }
 0x875   :  { %v4997_v20 = vadd.f32 %v4298_v16, %v1279_v18 }
 0x876   :  { %v1154_v33 = vsel %vm349_vm3, %v1152_v19, 0.0  ;;  %v1164_v26 = vadd.f32 %v4358_v23, %v1163_v42  ;;  %v5055_v42 = vld [vmem:[%s5657_s5] sm:$0xff] }
 0x877   :  { %1155 = vadd.xlane.f32.xlu0 %v1154_v33  ;;  %4078 = vmatpush.xpose.msk.msra.mxu0 %vm250_vm0, %v4997_v20 }
 0x878   :  { %v5006_v29 = vsel %vm1165_vm4, %v4358_v23, %v1164_v26 }
 0x87c   :  { %v1282_v28 = vpop.f32.mrf.mxu3 }
 0x87d   :  { %v5002_v21 = vadd.f32 %v4298_v16, %v1282_v28 }
 0x87f   :  { %4080 = vmatpush.xpose.msk.msrb.mxu0 %vm250_vm0, %v5002_v21 }
 0x8e8   :  { %v1147_v27 = vpop.f32.mrf.mxu1 }
 0x8e9   :  { %v1151_v30 = vadd.f32 %v1147_v27, %v986_v13 }
 0x8ea   :  { %v1156_v31 = vpop.xlane.xlu0 %1155 }
 0x8eb   :  { %v1167_v32 = vmul.f32 %v5006_v29, %v1156_v31  ;;  %v1153_v34 = vadd.f32 %v1151_v30, %v4825_v49 }
 0x8ed   :  { %v1169_v35 = vsub.f32 %v1152_v19, %v1167_v32  ;;  %v1157_v36 = vsel %vm349_vm3, %v1153_v34, 0.0 }
 0x8ee   :  { %1158 = vadd.xlane.f32.xlu1 %v1157_v36 }
 0x8ef   :  { %v1171_v37 = vmul.f32 %v1169_v35, %v1169_v35 }
 0x8f1   :  { %v1173_v38 = vsel %vm349_vm3, %v1171_v37, 0.0 }
 0x8f2   :  { %1174 = vadd.xlane.f32.xlu2 %v1173_v38 }
 0x90a   :  { %1457 = vrot.lane.b32.xlu2 %v4997_v20, %s4566_s20 }
 0x961   :  { %v1159_v49 = vpop.xlane.xlu1 %1158 }
 0x962   :  { %v1168_v44 = vmul.f32 %v5006_v29, %v1159_v49 }
 0x964   :  { %v1170_v46 = vsub.f32 %v1153_v34, %v1168_v44 }
 0x965   :  { %v1175_v45 = vpop.xlane.xlu2 %1174 }
 0x966   :  { %v1179_v47 = vmul.f32 %v1175_v45, %v5006_v29  ;;  %v1172_v48 = vmul.f32 %v1170_v46, %v1170_v46 }
 0x968   :  { %v1181_v50 = vadd.f32 1e-05, %v1179_v47  ;;  %v1176_v51 = vsel %vm349_vm3, %v1172_v48, 0.0 }
 0x969   :  { %1177 = vadd.xlane.f32.xlu0 %v1176_v51 }
 0x96a   :  { %4359 = vrsqrt.f32 %v1181_v50  ;;  %vm1189_vm6 = vweird.f32 %v1181_v50 }
 0x96d   :  { %v1458_v33 = vpop.permute.xlu2 %1457 }
 0x970   :  { %v4360_v59 = vpop.eup %4359 }
 0x971   :  { %v1184_v52 = vmul.f32 %v4360_v59, %v1181_v50  ;;  %vm1190_vm5 = vweird.f32 %v4360_v59 }
 0x972   :  { %vm1191_vm7 = vmor %vm1189_vm6, %vm1190_vm5 }
 0x973   :  { %v1185_v53 = vmul.f32 %v4360_v59, %v1184_v52 }
 0x975   :  { %v1186_v54 = vmul.f32 0.5, %v1185_v53 }
 0x977   :  { %v1187_v56 = vsub.f32 1.5, %v1186_v54 }
 0x979   :  { %v1188_v57 = vmul.f32 %v4360_v59, %v1187_v56 }
 0x97b   :  { %v1192_v61 = vsel %vm1191_vm7, %v4360_v59, %v1188_v57 }
 0x97c   :  { %v1203_v62 = vmul.f32 %v1192_v61, %v1169_v35 }
 0x97e   :  { %v1206_v0 = vmul.f32 %v1205_v60, %v1203_v62 }
 0x980   :  { %v5029_v1 = vadd.f32 %v1208_v63, %v1206_v0 }
 0x982   :  { %4074 = vmatmul.msk.f32.vlgmr.msra.gmra.mxu2 %vm349_vm3, %v5029_v1 }
 0x9dc   :  { %v1178_v4 = vpop.xlane.xlu0 %1177 }
 0x9dd   :  { %v1180_v7 = vmul.f32 %v1178_v4, %v5006_v29 }
 0x9df   :  { %v1182_v8 = vadd.f32 1e-05, %v1180_v7 }
 0x9e1   :  { %4361 = vrsqrt.f32 %v1182_v8  ;;  %vm1199_vm9 = vweird.f32 %v1182_v8 }
 0x9e7   :  { %v4362_v9 = vpop.eup %4361 }
 0x9e8   :  { %v1194_v10 = vmul.f32 %v4362_v9, %v1182_v8  ;;  %vm1200_vm8 = vweird.f32 %v4362_v9  ;;  %v1285_v8 = vld [vmem:[%s5658_s17] sm:$0xff] }
 0x9e9   :  { %vm1201_vm10 = vmor %vm1199_vm9, %vm1200_vm8  ;;  %1445 = vmatpush.msra.mxu3 %v1285_v8 }
 0x9ea   :  { %v1195_v2 = vmul.f32 %v4362_v9, %v1194_v10 }
 0x9ec   :  { %v1196_v11 = vmul.f32 0.5, %v1195_v2 }
 0x9ee   :  { %v1197_v12 = vsub.f32 1.5, %v1196_v11 }
 0x9f0   :  { %v1198_v13 = vmul.f32 %v4362_v9, %v1197_v12 }
 0x9f2   :  { %v1202_v14 = vsel %vm1201_vm10, %v4362_v9, %v1198_v13 }
 0x9f3   :  { %v1204_v5 = vmul.f32 %v1202_v14, %v1170_v46 }
 0x9f5   :  { %v1207_v15 = vmul.f32 %v1205_v60, %v1204_v5 }
 0x9f7   :  { %v5034_v16 = vadd.f32 %v1208_v63, %v1207_v15 }
 0x9f9   :  { %4075 = vmatmul.msk.f32.gmra.mxu2 %vm349_vm3, %v5034_v16 }
 0xa05   :  { %v1242_v18 = vpop.f32.mrf.mxu2 }
 0xa06   :  { %v5039_v19 = vadd.f32 %v4299_v17, %v1242_v18 }
 0xa08   :  { %4079 = vmatmul.msk.f32.vlgmr.msra.gmra.mxu0 %vm250_vm0, %v5039_v19  ;;  %1455 = vrot.lane.b32.xlu0 %v5039_v19, %s4566_s20 }
 0xa09   :  { %4086 = vmatpush.xpose.msk.msra.mxu0 %vm250_vm0, %v1458_v33 }
 0xa10   :  { %1372 = vrot.lane.b32.xlu0 %v4997_v20, %s4562_s25 }
 0xa7a   :  { %v1456_v28 = vpop.permute.xlu0 %1455 }
 0xa7c   :  { %v1245_v22 = vpop.f32.mrf.mxu2 }
 0xa7d   :  { %v5048_v23 = vadd.f32 %v4299_v17, %v1245_v22 }
 0xa7f   :  { %1483 = vrot.lane.b32.xlu0 %v5048_v23, %s4566_s20  ;;  %4081 = vmatmul.msk.f32.vlgmr.msrb.gmra.mxu0 %vm250_vm0, %v5048_v23 }
 0xa82   :  { %v1373_v24 = vpop.permute.xlu0 %1372 }
 0xa83   :  { %1393 = vmatpush.msrb.mxu1 %v1373_v24 }
 0xa85   :  { %v1317_v25 = vpop.f32.mrf.mxu0 }
 0xa86   :  { %v1346_v26 = vmul.f32 0.35355338, %v1317_v25 }
 0xa87   :  { %4087 = vmatmul.msk.f32.vlgmr.msra.gmra.mxu0 %vm250_vm0, %v1456_v28  ;;  %v1286_v28 = vld [vmem:[%s5658_s17 + $0x8] sm:$0xff] }
 0xa88   :  { %v1348_v27 = vadd.f32 %v1346_v26, %v5055_v42 }
 0xa8a   :  { %v1350_v30 = vsel %vm250_vm0, %v1348_v27, -inf }
 0xa8b   :  { %1351 = vmax.xlane.f32.xlu1 %v1350_v30 }
 0xaa4   :  { %1485 = vrot.lane.b32.xlu1 %v5002_v21, %s4566_s20 }
 0xaf1   :  { %v1484_v45 = vpop.permute.xlu0 %1483 }
 0xafc   :  { %v1343_v31 = vpop.f32.mrf.mxu0 }
 0xafd   :  { %v1347_v32 = vmul.f32 0.35355338, %v1343_v31 }
 0xafe   :  { %v1352_v34 = vpop.xlane.xlu1 %1351 }
 0xaff   :  { %v1356_v35 = vsub.f32 %v1348_v27, %v1352_v34  ;;  %v1349_v36 = vadd.f32 %v1347_v32, %v5055_v42 }
 0xb01   :  { %v1358_v37 = vmul.f32 1.442695, %v1356_v35  ;;  %v1353_v38 = vsel %vm250_vm0, %v1349_v36, -inf }
 0xb02   :  { %1354 = vmax.xlane.f32.xlu0 %v1353_v38 }
 0xb03   :  { %4363 = vpow2.f32 %v1358_v37 }
 0xb04   :  { %v1480_v39 = vpop.f32.mrf.mxu0 }
 0xb05   :  { %v1511_v40 = vmul.f32 0.35355338, %v1480_v39 }
 0xb07   :  { %v1513_v41 = vadd.f32 %v1511_v40, %v5055_v42 }
 0xb09   :  { %v4364_v43 = vpop.eup %4363  ;;  %v1515_v49 = vsel %vm250_vm0, %v1513_v41, -inf }
 0xb0a   :  { %1516 = vmax.xlane.f32.xlu1 %v1515_v49  ;;  %v1362_v44 = vsel %vm250_vm0, %v4364_v43, 0.0 }
 0xb0b   :  { %1363 = vadd.xlane.f32.xlu2 %v1362_v44 }
 0xb16   :  { %1537 = vrot.lane.b32.xlu0 %v4997_v20, %s4564_s30  ;;  %v1486_v46 = vpop.permute.xlu1 %1485 }
 0xb17   :  { %4088 = vmatpush.xpose.msk.msra.mxu1 %vm250_vm0, %v1486_v46 }
 0xb23   :  { %1622 = vrot.lane.b32.xlu1 %v4997_v20, %s4565_s6  ;;  %1398 = vrot.lane.b32.xlu2 %v5002_v21, %s4562_s25 }
 0xb2b   :  { %1563 = vrot.lane.b32.xlu1 %v5002_v21, %s4564_s30 }
 0xb75   :  { %v1355_v47 = vpop.xlane.xlu0 %1354 }
 0xb76   :  { %v1357_v48 = vsub.f32 %v1349_v36, %v1355_v47 }
 0xb78   :  { %v1360_v50 = vmul.f32 1.442695, %v1357_v48 }
 0xb7a   :  { %4365 = vpow2.f32 %v1360_v50 }
 0xb7d   :  { %v1517_v51 = vpop.xlane.xlu1 %1516 }
 0xb7e   :  { %v1521_v59 = vsub.f32 %v1513_v41, %v1517_v51  ;;  %v1364_v52 = vpop.xlane.xlu2 %1363 }
 0xb7f   :  { %4367 = vrcp.f32 %v1364_v52 }
 0xb80   :  { %v4366_v53 = vpop.eup %4365  ;;  %v1523_v54 = vmul.f32 1.442695, %v1521_v59 }
 0xb81   :  { %v1365_v56 = vsel %vm250_vm0, %v4366_v53, 0.0 }
 0xb82   :  { %4369 = vpow2.f32 %v1523_v54  ;;  %1366 = vadd.xlane.f32.xlu2 %v1365_v56 }
 0xb85   :  { %v4368_v57 = vpop.eup %4367 }
 0xb86   :  { %v1370_v60 = vmul.f32 %v4368_v57, %v4364_v43  ;;  %v1399_v61 = vpop.permute.xlu2 %1398 }
 0xb87   :  { %1419 = vmatpush.msrb.mxu2 %v1399_v61 }
 0xb88   :  { %v4370_v62 = vpop.eup %4369  ;;  %v1538_v63 = vpop.permute.xlu0 %1537  ;;  %4082 = vmatmul.msk.f32.vlgmr.msrb.gmra.mxu1 %vm250_vm0, %v1370_v60 }
 0xb89   :  { %1558 = vmatpush.msra.mxu2 %v1538_v63  ;;  %v1527_v0 = vsel %vm250_vm0, %v4370_v62, 0.0  ;;  %1610 = vmatpush.msrb.mxu1 %v1286_v28  ;;  %v1287_v63 = vld [vmem:[%s5658_s17 + $0x10] sm:$0xff] }
 0xb8a   :  { %1528 = vadd.xlane.f32.xlu2 %v1527_v0 }
 0xb90   :  { %4089 = vmatmul.msk.f32.vlgmr.msra.gmra.mxu1 %vm250_vm0, %v1484_v45 }
 0xb95   :  { %v1623_v4 = vpop.permute.xlu1 %1622 }
 0xb9d   :  { %v1564_v7 = vpop.permute.xlu1 %1563 }
 0xb9e   :  { %1584 = vmatpush.msrb.mxu0 %v1564_v7 }
 0xba2   :  { %1620 = vrot.lane.b32.xlu2 %v5039_v19, %s4565_s6 }
 0xbf5   :  { %v1367_v9 = vpop.xlane.xlu2 %1366 }
 0xbf6   :  { %4371 = vrcp.f32 %v1367_v9 }
 0xbfc   :  { %v4372_v10 = vpop.eup %4371 }
 0xbfd   :  { %v1371_v2 = vmul.f32 %v4372_v10, %v4366_v53  ;;  %v1529_v11 = vpop.xlane.xlu2 %1528 }
 0xbfe   :  { %4373 = vrcp.f32 %v1529_v11 }
 0xbff   :  { %4083 = vmatmul.msk.f32.vlgmr.msrb.gmra.mxu2 %vm250_vm0, %v1371_v2 }
 0xc00   :  { %4094 = vmatpush.xpose.msk.msrb.mxu2 %vm250_vm0, %v1623_v4 }
 0xc04   :  { %v4374_v12 = vpop.eup %4373 }
 0xc05   :  { %v1535_v13 = vmul.f32 %v4374_v12, %v4370_v62  ;;  %v1395_v14 = vpop.f32.mrf.mxu1  ;;  %v1621_v15 = vpop.permute.xlu2 %1620 }
 0xc06   :  { %4084 = vmatmul.msk.f32.vlgmr.msra.gmra.mxu3 %vm250_vm0, %v1395_v14 }
 0xc07   :  { %4090 = vmatmul.msk.f32.vlgmr.msra.gmra.mxu2 %vm250_vm0, %v1535_v13 }
 0xc0d   :  { %v1508_v5 = vpop.f32.mrf.mxu1 }
 0xc0e   :  { %v1512_v17 = vmul.f32 0.35355338, %v1508_v5 }
 0xc0f   :  { %4095 = vmatmul.msk.f32.vlgmr.msrb.gmra.mxu2 %vm250_vm0, %v1621_v15 }
 0xc10   :  { %v1514_v18 = vadd.f32 %v1512_v17, %v5055_v42 }
 0xc12   :  { %v1518_v33 = vsel %vm250_vm0, %v1514_v18, -inf }
 0xc13   :  { %1519 = vmax.xlane.f32.xlu0 %v1518_v33 }
 0xc27   :  { %1648 = vrot.lane.b32.xlu0 %v5048_v23, %s4565_s6 }
 0xc2f   :  { %1787 = vrot.lane.b32.xlu0 %v4997_v20, %s5615_s7 }
 0xc82   :  { %v1421_v22 = vpop.f32.mrf.mxu2 }
 0xc83   :  { %4085 = vmatmul.msk.f32.gmra.mxu3 %vm250_vm0, %v1421_v22 }
 0xc86   :  { %v1520_v24 = vpop.xlane.xlu0 %1519 }
 0xc87   :  { %v1522_v25 = vsub.f32 %v1514_v18, %v1520_v24 }
 0xc89   :  { %v1525_v26 = vmul.f32 1.442695, %v1522_v25  ;;  %v5115_v47 = vpop.f32.mrf.mxu3 }
 0xc8a   :  { %v1560_v27 = vpop.f32.mrf.mxu2 }
 0xc8b   :  { %4375 = vpow2.f32 %v1525_v26  ;;  %4092 = vmatmul.msk.f32.vlgmr.msrb.gmra.mxu1 %vm250_vm0, %v1560_v27 }
 0xc91   :  { %v4376_v30 = vpop.eup %4375 }
 0xc92   :  { %v1645_v31 = vpop.f32.mrf.mxu2  ;;  %v1530_v32 = vsel %vm250_vm0, %v4376_v30, 0.0 }
 0xc93   :  { %v1676_v34 = vmul.f32 0.35355338, %v1645_v31  ;;  %1531 = vadd.xlane.f32.xlu2 %v1530_v32 }
 0xc95   :  { %v1678_v35 = vadd.f32 %v1676_v34, %v5055_v42 }
 0xc97   :  { %v1680_v36 = vsel %vm250_vm0, %v1678_v35, -inf }
 0xc98   :  { %1681 = vmax.xlane.f32.xlu1 %v1680_v36 }
 0xc99   :  { %v1649_v44 = vpop.permute.xlu0 %1648 }
 0xca1   :  { %v1788_v45 = vpop.permute.xlu0 %1787 }
 0xcab   :  { %1650 = vrot.lane.b32.xlu2 %v5002_v21, %s4565_s6 }
 0xcb1   :  { %1702 = vrot.lane.b32.xlu1 %v4997_v20, %s4567_s27 }
 0xcb3   :  { %1785 = vrot.lane.b32.xlu2 %v5039_v19, %s5615_s7 }
 0xcbb   :  { %1813 = vrot.lane.b32.xlu2 %v5048_v23, %s5615_s7 }
 0xd06   :  { %v1532_v37 = vpop.xlane.xlu2 %1531  ;;  %v5117_v50 = vpop.f32.mrf.mxu3 }
 0xd07   :  { %4377 = vrcp.f32 %v1532_v37 }
 0xd08   :  { %v5127_v4 = vpop.f32.mrf.mxu1 }
 0xd0b   :  { %v1682_v38 = vpop.xlane.xlu1 %1681 }
 0xd0c   :  { %v1686_v39 = vsub.f32 %v1678_v35, %v1682_v38 }
 0xd0d   :  { %v4378_v40 = vpop.eup %4377 }
 0xd0e   :  { %v1536_v41 = vmul.f32 %v4378_v40, %v4376_v30  ;;  %v1688_v43 = vmul.f32 1.442695, %v1686_v39  ;;  %v1651_v49 = vpop.permute.xlu2 %1650 }
 0xd0f   :  { %4096 = vmatpush.xpose.msk.msrb.mxu3 %vm250_vm0, %v1651_v49 }
 0xd10   :  { %4379 = vpow2.f32 %v1688_v43  ;;  %4091 = vmatmul.msk.f32.vlgmr.msrb.gmra.mxu0 %vm250_vm0, %v1536_v41 }
 0xd12   :  { %4097 = vmatmul.msk.f32.vlgmr.msrb.gmra.mxu3 %vm250_vm0, %v1649_v44 }
 0xd13   :  { %1775 = vmatpush.msra.mxu3 %v1287_v63 }
 0xd16   :  { %v4380_v19 = vpop.eup %4379  ;;  %v1786_v56 = vpop.permute.xlu2 %1785 }
 0xd17   :  { %v1692_v46 = vsel %vm250_vm0, %v4380_v19, 0.0 }
 0xd18   :  { %1693 = vadd.xlane.f32.xlu0 %v1692_v46  ;;  %v1288_v46 = vld [vmem:[%s5658_s17 + $0x18] sm:$0xff] }
 0xd1e   :  { %v1814_v62 = vpop.permute.xlu2 %1813 }
 0xd23   :  { %v1703_v23 = vpop.permute.xlu1 %1702 }
 0xd24   :  { %1723 = vmatpush.msra.mxu0 %v1703_v23 }
 0xd26   :  { %4102 = vmatpush.xpose.msk.msrb.mxu0 %vm250_vm0, %v1788_v45  ;;  %v4300_v45 = vld [vmem:[%s5659_s21] ss:$0 sm:$0xff] }
 0xd2c   :  { %1815 = vrot.lane.b32.xlu0 %v5002_v21, %s5615_s7  ;;  %s5662_s7 = sld [smem:[#allocation24_spill]] }
 0xd8b   :  { %v1694_v48 = vpop.xlane.xlu0 %1693 }
 0xd8c   :  { %4381 = vrcp.f32 %v1694_v48  ;;  %v1453_v48 = vadd.f32 %v4300_v45, %v5115_v47 }
 0xd8d   :  { %v1586_v51 = vpop.f32.mrf.mxu0 }
 0xd8e   :  { %4093 = vmatmul.msk.f32.gmra.mxu1 %vm250_vm0, %v1586_v51 }
 0xd92   :  { %v4382_v59 = vpop.eup %4381 }
 0xd93   :  { %v1700_v52 = vmul.f32 %v4382_v59, %v4380_v19  ;;  %v1618_v59 = vadd.f32 %v5127_v4, %v1453_v48 }
 0xd95   :  { %v1673_v53 = vpop.f32.mrf.mxu3  ;;  %4098 = vmatmul.msk.f32.vlgmr.msra.gmra.mxu0 %vm250_vm0, %v1700_v52 }
 0xd96   :  { %v1677_v54 = vmul.f32 0.35355338, %v1673_v53 }
 0xd98   :  { %v1679_v57 = vadd.f32 %v1677_v54, %v5055_v42 }
 0xd9a   :  { %v1683_v60 = vsel %vm250_vm0, %v1679_v57, -inf }
 0xd9b   :  { %1684 = vmax.xlane.f32.xlu0 %v1683_v60 }
 0xd9d   :  { %4103 = vmatmul.msk.f32.vlgmr.msrb.gmra.mxu0 %vm250_vm0, %v1786_v56  ;;  %v1454_v56 = vadd.f32 %v4300_v45, %v5117_v50 }
 0xd9e   :  { %v1816_v61 = vpop.permute.xlu0 %1815 }
 0xd9f   :  { %4104 = vmatpush.xpose.msk.msra.mxu1 %vm250_vm0, %v1816_v61 }
 0xda2   :  { %4105 = vmatmul.msk.f32.vlgmr.msra.gmra.mxu1 %vm250_vm0, %v1814_v62 }
 0xda3   :  { %1940 = vmatpush.msrb.mxu1 %v1288_v46 }
 0xe0b   :  { %v5130_v10 = vpop.f32.mrf.mxu1 }
 0xe0c   :  { %v1619_v61 = vadd.f32 %v5130_v10, %v1454_v56  ;;  %v2065_v56 = vld [vmem:[%s5661_s10 + $0x40] sm:$0xff] }
 0xe0e   :  { %v1685_v0 = vpop.xlane.xlu0 %1684 }
 0xe0f   :  { %v1687_v7 = vsub.f32 %v1679_v57, %v1685_v0 }
 0xe11   :  { %v1690_v8 = vmul.f32 1.442695, %v1687_v7 }
 0xe12   :  { %v1725_v9 = vpop.f32.mrf.mxu0 }
 0xe13   :  { %4383 = vpow2.f32 %v1690_v8  ;;  %4100 = vmatmul.msk.f32.vlgmr.msra.gmra.mxu3 %vm250_vm0, %v1725_v9 }
 0xe19   :  { %v4384_v2 = vpop.eup %4383 }
 0xe1a   :  { %v1810_v11 = vpop.f32.mrf.mxu0  ;;  %v1695_v12 = vsel %vm250_vm0, %v4384_v2, 0.0 }
 0xe1b   :  { %v1841_v13 = vmul.f32 0.35355338, %v1810_v11  ;;  %1696 = vadd.xlane.f32.xlu0 %v1695_v12 }
 0xe1d   :  { %v1843_v14 = vadd.f32 %v1841_v13, %v5055_v42 }
 0xe1f   :  { %v1838_v5 = vpop.f32.mrf.mxu1  ;;  %v1845_v15 = vsel %vm250_vm0, %v1843_v14, -inf }
 0xe20   :  { %v1842_v17 = vmul.f32 0.35355338, %v1838_v5  ;;  %1846 = vmax.xlane.f32.xlu2 %v1845_v15  ;;  %v2004_v5 = vld [vmem:[%s5660_s15 + $0x10] sm:$0xff]  ;;  %v2003_v15 = vld [vmem:[%s5660_s15 + $0x8] sm:$0xff] }
 0xe22   :  { %v1844_v18 = vadd.f32 %v1842_v17, %v5055_v42  ;;  %v2002_v17 = vld [vmem:[%s5660_s15] sm:$0xff] }
 0xe24   :  { %v1848_v33 = vsel %vm250_vm0, %v1844_v18, -inf }
 0xe25   :  { %1849 = vmax.xlane.f32.xlu1 %v1848_v33 }
 0xe2f   :  { %1867 = vrot.lane.b32.xlu0 %v4997_v20, %s5617_s1 }
 0xe3e   :  { %1728 = vrot.lane.b32.xlu1 %v5002_v21, %s4567_s27 }
 0xe8e   :  { %v1697_v32 = vpop.xlane.xlu0 %1696 }
 0xe93   :  { %v1847_v28 = vpop.xlane.xlu2 %1846 }
 0xe94   :  { %v1851_v22 = vsub.f32 %v1843_v14, %v1847_v28  ;;  %v2005_v14 = vld [vmem:[%s5660_s15 + $0x18] sm:$0xff] }
 0xe96   :  { %v1853_v24 = vmul.f32 1.442695, %v1851_v22  ;;  %v1777_v51 = vpop.f32.mrf.mxu3  ;;  %v2072_v22 = vld [vmem:[%s5661_s10 + $0x78] sm:$0xff] }
 0xe97   :  { %v1783_v52 = vadd.f32 %v1777_v51, %v1618_v59  ;;  %2077 = vmatpush.msrb.mxu3 %v2072_v22 }
 0xe98   :  { %4385 = vpow2.f32 %v1853_v24  ;;  %v1850_v25 = vpop.xlane.xlu1 %1849  ;;  %v2071_v24 = vld [vmem:[%s5661_s10 + $0x70] sm:$0xff] }
 0xe99   :  { %v1852_v26 = vsub.f32 %v1844_v18, %v1850_v25  ;;  %v2070_v25 = vld [vmem:[%s5661_s10 + $0x68] sm:$0xff]  ;;  %2078 = vmatpush.msrb.mxu3 %v2071_v24 }
 0xe9b   :  { %v1855_v27 = vmul.f32 1.442695, %v1852_v26  ;;  %2079 = vmatpush.msrb.mxu3 %v2070_v25 }
 0xe9d   :  { %4387 = vpow2.f32 %v1855_v27 }
 0xe9e   :  { %v4386_v30 = vpop.eup %4385  ;;  %4389 = vrcp.f32 %v1697_v32 }
 0xe9f   :  { %v1857_v42 = vsel %vm250_vm0, %v4386_v30, 0.0 }
 0xea0   :  { %1858 = vadd.xlane.f32.xlu2 %v1857_v42 }
 0xea1   :  { %v1868_v37 = vpop.permute.xlu0 %1867 }
 0xea3   :  { %v4388_v31 = vpop.eup %4387 }
 0xea4   :  { %v1860_v20 = vsel %vm250_vm0, %v4388_v31, 0.0  ;;  %v4390_v34 = vpop.eup %4389 }
 0xea5   :  { %v1701_v35 = vmul.f32 %v4390_v34, %v4384_v2 }
 0xea8   :  { %1861 = vadd.xlane.f32.xlu2 %v1860_v20 }
 0xeb0   :  { %v1729_v36 = vpop.permute.xlu1 %1728 }
 0xeb1   :  { %1749 = vmatpush.msra.mxu2 %v1729_v36 }
 0xeb2   :  { %4099 = vmatmul.msk.f32.vlgmr.msra.gmra.mxu2 %vm250_vm0, %v1701_v35 }
 0xeb3   :  { %1888 = vmatpush.msrb.mxu2 %v1868_v37 }
 0xeb5   :  { %2028 = vmatpush.msra.mxu2 %v2005_v14 }
 0xeb7   :  { %2029 = vmatpush.msra.mxu2 %v2004_v5 }
 0xeb9   :  { %2030 = vmatpush.msra.mxu2 %v2003_v15 }
 0xebb   :  { %2031 = vmatpush.msra.mxu2 %v2002_v17 }
 0xec0   :  { %1893 = vrot.lane.b32.xlu2 %v5002_v21, %s5617_s1  ;;  %s5663_s1 = sld [smem:[#allocation26_spill]] }
 0xf13   :  { %v1859_v38 = vpop.xlane.xlu2 %1858 }
 0xf14   :  { %4391 = vrcp.f32 %v1859_v38 }
 0xf1a   :  { %v4392_v39 = vpop.eup %4391 }
 0xf1b   :  { %v1865_v40 = vmul.f32 %v4392_v39, %v4386_v30  ;;  %v1862_v41 = vpop.xlane.xlu2 %1861  ;;  %v2069_v30 = vld [vmem:[%s5661_s10 + $0x60] sm:$0xff]  ;;  %v1996_v39 = vperm.slane %v5022_v55, 1 }
 0xf1c   :  { %4393 = vrcp.f32 %v1862_v41  ;;  %2080 = vmatpush.msrb.mxu3 %v2069_v30  ;;  %v4302_v30 = vld [vmem:[%s5663_s1] ss:$0 sm:$0xff] }
 0xf1d   :  { %4106 = vmatmul.msk.f32.vlgmr.msrb.gmra.mxu2 %vm250_vm0, %v1865_v40 }
 0xf22   :  { %v4394_v43 = vpop.eup %4393 }
 0xf23   :  { %v1866_v49 = vmul.f32 %v4394_v43, %v4388_v31  ;;  %v1894_v44 = vpop.permute.xlu2 %1893 }
 0xf24   :  { %1914 = vmatpush.msra.mxu0 %v1894_v44 }
 0xf25   :  { %4107 = vmatmul.msk.f32.vlgmr.msra.gmra.mxu0 %vm250_vm0, %v1866_v49  ;;  %v1999_v49 = vperm.slane %v5025_v58, 1 }
 0xf35   :  { %v1751_v19 = vpop.f32.mrf.mxu2 }
 0xf36   :  { %4101 = vmatmul.msk.f32.gmra.mxu3 %vm250_vm0, %v1751_v19 }
 0xfa0   :  { %v1890_v21 = vpop.f32.mrf.mxu2 }
 0xfa1   :  { %4108 = vmatmul.msk.f32.vlgmr.msrb.gmra.mxu1 %vm250_vm0, %v1890_v21 }
 0xfa2   :  { %v1916_v23 = vpop.f32.mrf.mxu0 }
 0xfa9   :  { %4109 = vmatmul.msk.f32.gmra.mxu1 %vm250_vm0, %v1916_v23 }
 0xfb9   :  { %v1780_v60 = vpop.f32.mrf.mxu3 }
 0xfba   :  { %v1784_v63 = vadd.f32 %v1780_v60, %v1619_v61  ;;  %v2063_v60 = vld [vmem:[%s5661_s10 + $0x30] sm:$0xff]  ;;  %v2062_v61 = vld [vmem:[%s5661_s10 + $0x28] sm:$0xff] }
0x101e   :  { %v1942_v53 = vpop.f32.mrf.mxu1 }
0x101f   :  { %v1948_v54 = vadd.f32 %v1942_v53, %v1783_v52  ;;  %v2068_v52 = vld [vmem:[%s5661_s10 + $0x58] sm:$0xff]  ;;  %v2067_v53 = vld [vmem:[%s5661_s10 + $0x50] sm:$0xff] }
0x1020   :  { %2081 = vmatpush.msrb.mxu3 %v2068_v52 }
0x1021   :  { %v1950_v57 = vadd.f32 %v1948_v54, %v5029_v1  ;;  %v2066_v54 = vld [vmem:[%s5661_s10 + $0x48] sm:$0xff] }
0x1022   :  { %2082 = vmatpush.msrb.mxu3 %v2067_v53 }
0x1023   :  { %v1952_v62 = vsel %vm349_vm3, %v1950_v57, 0.0 }
0x1024   :  { %1953 = vadd.xlane.f32.xlu0 %v1952_v62  ;;  %2083 = vmatpush.msrb.mxu3 %v2066_v54  ;;  %v2061_v62 = vld [vmem:[%s5661_s10 + $0x20] sm:$0xff] }
0x1026   :  { %v1945_v0 = vpop.f32.mrf.mxu1  ;;  %2084 = vmatpush.msrb.mxu3 %v2065_v56 }
0x1027   :  { %v1949_v7 = vadd.f32 %v1945_v0, %v1784_v63  ;;  %v2060_v63 = vld [vmem:[%s5661_s10 + $0x18] sm:$0xff]  ;;  %v2059_v0 = vld [vmem:[%s5661_s10 + $0x10] sm:$0xff] }
0x1029   :  { %v1951_v47 = vadd.f32 %v1949_v7, %v5034_v16  ;;  %v2058_v7 = vld [vmem:[%s5661_s10 + $0x8] sm:$0xff] }
0x102b   :  { %v1955_v4 = vsel %vm349_vm3, %v1951_v47, 0.0 }
0x102c   :  { %1956 = vadd.xlane.f32.xlu1 %v1955_v4  ;;  %v4301_v4 = vld [vmem:[%s5662_s7] ss:$0 sm:$0xff] }
0x1097   :  { %v1954_v8 = vpop.xlane.xlu0 %1953 }
0x1098   :  { %v1958_v1 = vmul.f32 %v1954_v8, %v5006_v29 }
0x109a   :  { %v1960_v50 = vsub.f32 %v1950_v57, %v1958_v1  ;;  %v2064_v57 = vld [vmem:[%s5661_s10 + $0x38] sm:$0xff] }
0x109b   :  { %2085 = vmatpush.msrb.mxu3 %v2064_v57 }
0x109c   :  { %v1962_v9 = vmul.f32 %v1960_v50, %v1960_v50 }
0x109d   :  { %2086 = vmatpush.msrb.mxu3 %v2063_v60 }
0x109e   :  { %v1964_v10 = vsel %vm349_vm3, %v1962_v9, 0.0 }
0x109f   :  { %1965 = vadd.xlane.f32.xlu2 %v1964_v10  ;;  %v1957_v2 = vpop.xlane.xlu1 %1956  ;;  %2087 = vmatpush.msrb.mxu3 %v2062_v61 }
0x10a0   :  { %v1959_v11 = vmul.f32 %v1957_v2, %v5006_v29 }
0x10a1   :  { %2088 = vmatpush.msrb.mxu3 %v2061_v62 }
0x10a2   :  { %v1961_v12 = vsub.f32 %v1951_v47, %v1959_v11  ;;  %v2057_v47 = vld [vmem:[%s5661_s10] sm:$0xff] }
0x10a3   :  { %2089 = vmatpush.msrb.mxu3 %v2060_v63 }
0x10a4   :  { %v1963_v16 = vmul.f32 %v1961_v12, %v1961_v12 }
0x10a5   :  { %2090 = vmatpush.msrb.mxu3 %v2059_v0 }
0x10a6   :  { %v1967_v13 = vsel %vm349_vm3, %v1963_v16, 0.0 }
0x10a7   :  { %1968 = vadd.xlane.f32.xlu0 %v1967_v13  ;;  %2091 = vmatpush.msrb.mxu3 %v2058_v7 }
0x10a9   :  { %2092 = vmatpush.msrb.mxu3 %v2057_v47 }
0x1112   :  { %v1966_v18 = vpop.xlane.xlu2 %1965 }
0x1113   :  { %v1970_v33 = vmul.f32 %v1966_v18, %v5006_v29 }
0x1115   :  { %v1972_v28 = vadd.f32 1e-05, %v1970_v33 }
0x1117   :  { %4395 = vrsqrt.f32 %v1972_v28  ;;  %vm1980_vm12 = vweird.f32 %v1972_v28 }
0x111a   :  { %v1969_v26 = vpop.xlane.xlu0 %1968 }
0x111b   :  { %v1971_v27 = vmul.f32 %v1969_v26, %v5006_v29 }
0x111d   :  { %v4396_v42 = vpop.eup %4395  ;;  %v1973_v31 = vadd.f32 1e-05, %v1971_v27 }
0x111e   :  { %v1975_v32 = vmul.f32 %v4396_v42, %v1972_v28  ;;  %vm1981_vm11 = vweird.f32 %v4396_v42 }
0x111f   :  { %4397 = vrsqrt.f32 %v1973_v31  ;;  %vm1982_vm13 = vmor %vm1980_vm12, %vm1981_vm11  ;;  %vm1990_vm15 = vweird.f32 %v1973_v31 }
0x1120   :  { %v1976_v20 = vmul.f32 %v4396_v42, %v1975_v32 }
0x1122   :  { %v1977_v34 = vmul.f32 0.5, %v1976_v20 }
0x1124   :  { %v1978_v35 = vsub.f32 1.5, %v1977_v34 }
0x1125   :  { %v4398_v36 = vpop.eup %4397 }
0x1126   :  { %v1979_v37 = vmul.f32 %v4396_v42, %v1978_v35  ;;  %v1985_v38 = vmul.f32 %v4398_v36, %v1973_v31  ;;  %vm1991_vm14 = vweird.f32 %v4398_v36 }
0x1127   :  { %vm1992_vm1 = vmor %vm1990_vm15, %vm1991_vm14 }
0x1128   :  { %v1983_v40 = vsel %vm1982_vm13, %v4396_v42, %v1979_v37  ;;  %v1986_v41 = vmul.f32 %v4398_v36, %v1985_v38 }
0x1129   :  { %v1994_v43 = vmul.f32 %v1983_v40, %v1960_v50 }
0x112a   :  { %v1987_v44 = vmul.f32 0.5, %v1986_v41 }
0x112b   :  { %v1997_v19 = vmul.f32 %v1996_v39, %v1994_v43 }
0x112c   :  { %v1988_v46 = vsub.f32 1.5, %v1987_v44 }
0x112d   :  { %v5177_v21 = vadd.f32 %v1999_v49, %v1997_v19 }
0x112e   :  { %v1989_v23 = vmul.f32 %v4398_v36, %v1988_v46 }
0x112f   :  { %4110 = vmatmul.msk.f32.vlgmr.msra.gmra.mxu2 %vm349_vm3, %v5177_v21 }
0x1130   :  { %v1993_v45 = vsel %vm1992_vm1, %v4398_v36, %v1989_v23  ;;  %v4117_v23 = vld [vmem:[%s4683_s3 + $0x38] sm:$0xff] }
0x1131   :  { %v1995_v48 = vmul.f32 %v1993_v45, %v1961_v12  ;;  %2184 = vmatpush.msrb.mxu0 %v4117_v23  ;;  %v4116_v45 = vld [vmem:[%s4683_s3 + $0x30] sm:$0xff] }
0x1133   :  { %v1998_v51 = vmul.f32 %v1996_v39, %v1995_v48  ;;  %2185 = vmatpush.msrb.mxu0 %v4116_v45  ;;  %v4115_v48 = vld [vmem:[%s4683_s3 + $0x28] sm:$0xff] }
0x1135   :  { %v2001_v59 = vadd.f32 %v1999_v49, %v1998_v51  ;;  %2186 = vmatpush.msrb.mxu0 %v4115_v48  ;;  %v4114_v51 = vld [vmem:[%s4683_s3 + $0x20] sm:$0xff]  ;;  %s5664_s3 = smov 72  }
0x1137   :  { %4111 = vmatmul.msk.f32.gmra.mxu2 %vm349_vm3, %v2001_v59  ;;  %2187 = vmatpush.msrb.mxu0 %v4114_v51 }
0x11b2   :  { %v2033_v8 = vpop.f32.mrf.mxu2 }
0x11b3   :  { %v2034_v1 = vadd.f32 %v4301_v4, %v2033_v8  ;;  %v2146_v8 = vperm.slane %v5022_v55, 2 }
0x11b5   :  { %v2041_v50 = vmul.f32 0.044715, %v2034_v1  ;;  %v2039_v33 = vmul.f32 0.5, %v2034_v1 }
0x11b7   :  { %v2043_v9 = vmul.f32 %v2041_v50, %v2034_v1 }
0x11b9   :  { %v2045_v10 = vmul.f32 %v2043_v9, %v2034_v1 }
0x11ba   :  { %v2036_v2 = vpop.f32.mrf.mxu2 }
0x11bb   :  { %v2037_v11 = vadd.f32 %v4301_v4, %v2036_v2  ;;  %v2047_v12 = vadd.f32 %v2045_v10, %v2034_v1  ;;  %v2149_v10 = vperm.slane %v5025_v58, 2  ;;  %v4303_v58 = vld [vmem:[%s5644_s9 + $0x1] ss:$0 sm:$0xff]  ;;  %s5665_s9 = smov 104  }
0x11bd   :  { %v2049_v16 = vmul.f32 0.7978846, %v2047_v12  ;;  %v2042_v13 = vmul.f32 0.044715, %v2037_v11  ;;  %v2040_v25 = vmul.f32 0.5, %v2037_v11 }
0x11bf   :  { %4399 = vtanh.f32 %v2049_v16  ;;  %v2044_v14 = vmul.f32 %v2042_v13, %v2037_v11 }
0x11c1   :  { %v2046_v5 = vmul.f32 %v2044_v14, %v2037_v11 }
0x11c3   :  { %v2048_v15 = vadd.f32 %v2046_v5, %v2037_v11 }
0x11c5   :  { %v4400_v17 = vpop.eup %4399  ;;  %v2050_v18 = vmul.f32 0.7978846, %v2048_v15 }
0x11c6   :  { %v2053_v28 = vadd.f32 1.0, %v4400_v17 }
0x11c7   :  { %4401 = vtanh.f32 %v2050_v18 }
0x11c8   :  { %v2055_v22 = vmul.f32 %v2053_v28, %v2039_v33 }
0x11ca   :  { %2093 = vmatmul.f32.vlgmr.msrb.gmra.mxu3 %v2055_v22 }
0x11cd   :  { %v4402_v24 = vpop.eup %4401 }
0x11ce   :  { %v2054_v26 = vadd.f32 1.0, %v4402_v24 }
0x11d0   :  { %v2056_v27 = vmul.f32 %v2054_v26, %v2040_v25  ;;  %v4121_v25 = vld [vmem:[%s5648_s12 + $0x20] sm:$0xff] }
0x11d2   :  { %2096 = vmatmul.f32.gmra.mxu3 %v2056_v27 }
0x124d   :  { %v2094_v42 = vpop.f32.mrf.mxu3 }
0x124e   :  { %v2095_v31 = vadd.f32 %v4302_v30, %v2094_v42 }
0x1250   :  { %v2100_v32 = vadd.f32 %v2095_v31, %v5177_v21 }
0x1252   :  { %v2102_v20 = vsel %vm349_vm3, %v2100_v32, 0.0 }
0x1253   :  { %2103 = vadd.xlane.f32.xlu1 %v2102_v20 }
0x1255   :  { %v2097_v34 = vpop.f32.mrf.mxu3 }
0x1256   :  { %v2098_v35 = vadd.f32 %v4302_v30, %v2097_v34  ;;  %v5248_v34 = vld [vmem:[%s5647_s8] sm:$0xff]  ;;  %s5666_s8 = smov 40  }
0x1258   :  { %v2101_v36 = vadd.f32 %v2098_v35, %v2001_v59 }
0x125a   :  { %v2105_v37 = vsel %vm349_vm3, %v2101_v36, 0.0 }
0x125b   :  { %2106 = vadd.xlane.f32.xlu0 %v2105_v37 }
0x12c6   :  { %v2104_v38 = vpop.xlane.xlu1 %2103 }
0x12c7   :  { %v2108_v39 = vmul.f32 %v2104_v38, %v5006_v29 }
0x12c9   :  { %v2110_v40 = vsub.f32 %v2100_v32, %v2108_v39 }
0x12cb   :  { %v2112_v41 = vmul.f32 %v2110_v40, %v2110_v40 }
0x12cd   :  { %v2114_v43 = vsel %vm349_vm3, %v2112_v41, 0.0 }
0x12ce   :  { %v2107_v49 = vpop.xlane.xlu0 %2106  ;;  %2115 = vadd.xlane.f32.xlu1 %v2114_v43 }
0x12cf   :  { %v2109_v44 = vmul.f32 %v2107_v49, %v5006_v29 }
0x12d1   :  { %v2111_v19 = vsub.f32 %v2101_v36, %v2109_v44 }
0x12d3   :  { %v2113_v46 = vmul.f32 %v2111_v19, %v2111_v19 }
0x12d5   :  { %v2117_v21 = vsel %vm349_vm3, %v2113_v46, 0.0 }
0x12d6   :  { %2118 = vadd.xlane.f32.xlu2 %v2117_v21 }
0x1341   :  { %v2116_v59 = vpop.xlane.xlu1 %2115 }
0x1342   :  { %v2120_v52 = vmul.f32 %v2116_v59, %v5006_v29 }
0x1344   :  { %v2122_v53 = vadd.f32 1e-05, %v2120_v52 }
0x1346   :  { %4403 = vrsqrt.f32 %v2122_v53  ;;  %vm2130_vm5 = vweird.f32 %v2122_v53 }
0x1349   :  { %v2119_v54 = vpop.xlane.xlu2 %2118 }
0x134a   :  { %v2121_v56 = vmul.f32 %v2119_v54, %v5006_v29 }
0x134c   :  { %v4404_v57 = vpop.eup %4403  ;;  %v2123_v60 = vadd.f32 1e-05, %v2121_v56 }
0x134d   :  { %v2125_v61 = vmul.f32 %v4404_v57, %v2122_v53  ;;  %vm2131_vm4 = vweird.f32 %v4404_v57 }
0x134e   :  { %4405 = vrsqrt.f32 %v2123_v60  ;;  %vm2132_vm6 = vmor %vm2130_vm5, %vm2131_vm4  ;;  %vm2140_vm8 = vweird.f32 %v2123_v60 }
0x134f   :  { %v2126_v62 = vmul.f32 %v4404_v57, %v2125_v61 }
0x1351   :  { %v2127_v63 = vmul.f32 0.5, %v2126_v62 }
0x1353   :  { %v2128_v0 = vsub.f32 1.5, %v2127_v63 }
0x1354   :  { %v4406_v7 = vpop.eup %4405 }
0x1355   :  { %v2129_v47 = vmul.f32 %v4404_v57, %v2128_v0  ;;  %v2135_v4 = vmul.f32 %v4406_v7, %v2123_v60  ;;  %vm2141_vm7 = vweird.f32 %v4406_v7 }
0x1356   :  { %vm2142_vm9 = vmor %vm2140_vm8, %vm2141_vm7 }
0x1357   :  { %v2133_v1 = vsel %vm2132_vm6, %v4404_v57, %v2129_v47  ;;  %v2136_v50 = vmul.f32 %v4406_v7, %v2135_v4 }
0x1358   :  { %v2144_v9 = vmul.f32 %v2133_v1, %v2110_v40 }
0x1359   :  { %v2137_v2 = vmul.f32 0.5, %v2136_v50 }
0x135a   :  { %v2147_v11 = vmul.f32 %v2146_v8, %v2144_v9 }
0x135b   :  { %v2138_v12 = vsub.f32 1.5, %v2137_v2 }
0x135c   :  { %v5211_v16 = vadd.f32 %v2149_v10, %v2147_v11 }
0x135d   :  { %v2139_v13 = vmul.f32 %v4406_v7, %v2138_v12 }
0x135e   :  { %4119 = vmatmul.msk.f32.vlgmr.msrb.gmra.mxu0 %vm349_vm3, %v5211_v16 }
0x135f   :  { %v2143_v55 = vsel %vm2142_vm9, %v4406_v7, %v2139_v13 }
0x1360   :  { %v2145_v14 = vmul.f32 %v2143_v55, %v2111_v19 }
0x1362   :  { %v2148_v5 = vmul.f32 %v2146_v8, %v2145_v14 }
0x1364   :  { %v5215_v15 = vadd.f32 %v2149_v10, %v2148_v5 }
0x1366   :  { %4120 = vmatmul.msk.f32.gmra.mxu0 %vm349_vm3, %v5215_v15 }
0x13db   :  { %v2189_v17 = vpop.f32.mrf.mxu0 }
0x13dc   :  { %v5220_v18 = vadd.f32 %v4303_v58, %v2189_v17 }
0x13de   :  { %2207 = vrot.lane.b32.xlu0 %v5220_v18, %s4562_s25 }
0x13e3   :  { %v2192_v33 = vpop.f32.mrf.mxu0 }
0x13e4   :  { %v5224_v28 = vadd.f32 %v4303_v58, %v2192_v33  ;;  %v5282_v58 = vld [vmem:[%s5651_s16 + $0x1] ss:$0 sm:$0xff] }
0x13e6   :  { %2234 = vrot.lane.b32.xlu1 %v5224_v28, %s4562_s25 }
0x13ee   :  { %2286 = vrot.lane.b32.xlu1 %v5220_v18, %s4563_s14 }
0x13f6   :  { %2371 = vrot.lane.b32.xlu1 %v5220_v18, %s4564_s30 }
0x13fe   :  { %2369 = vrot.lane.b32.xlu1 %v5220_v18, %s4566_s20 }
0x1406   :  { %2399 = vrot.lane.b32.xlu1 %v5224_v28, %s4564_s30 }
0x140e   :  { %2536 = vrot.lane.b32.xlu1 %v5220_v18, %s4567_s27 }
0x1450   :  { %v2208_v22 = vpop.permute.xlu0 %2207 }
0x1451   :  { %4126 = vmatpush.xpose.msk.msra.mxu1 %vm250_vm0, %v2208_v22 }
0x1454   :  { %4127 = vmatmul.msk.f32.vlgmr.msra.gmra.mxu1 %vm250_vm0, %v5220_v18 }
0x1458   :  { %v2235_v24 = vpop.permute.xlu1 %2234 }
0x1459   :  { %4128 = vmatpush.xpose.msk.msrb.mxu2 %vm250_vm0, %v2235_v24 }
0x145c   :  { %4129 = vmatmul.msk.f32.vlgmr.msrb.gmra.mxu2 %vm250_vm0, %v5224_v28 }
0x145d   :  { %2359 = vmatpush.msra.mxu2 %v4121_v25 }
0x1460   :  { %v2287_v26 = vpop.permute.xlu1 %2286 }
0x1461   :  { %2307 = vmatpush.msra.mxu0 %v2287_v26 }
0x1468   :  { %v2372_v27 = vpop.permute.xlu1 %2371 }
0x1469   :  { %4134 = vmatpush.xpose.msk.msrb.mxu0 %vm250_vm0, %v2372_v27 }
0x1470   :  { %v2370_v30 = vpop.permute.xlu1 %2369 }
0x1478   :  { %v2400_v42 = vpop.permute.xlu1 %2399 }
0x1480   :  { %v2537_v31 = vpop.permute.xlu1 %2536 }
0x1481   :  { %4142 = vmatpush.xpose.msk.msrb.mxu2 %vm250_vm0, %v2537_v31 }
0x14d1   :  { %v2230_v32 = vpop.f32.mrf.mxu1 }
0x14d2   :  { %v2260_v20 = vmul.f32 0.35355338, %v2230_v32 }
0x14d4   :  { %v2262_v35 = vadd.f32 %v5248_v34, %v2260_v20 }
0x14d6   :  { %v2264_v36 = vsel %vm250_vm0, %v2262_v35, -inf }
0x14d7   :  { %2265 = vmax.xlane.f32.xlu2 %v2264_v36 }
0x14df   :  { %v2257_v37 = vpop.f32.mrf.mxu2 }
0x14e0   :  { %v2261_v38 = vmul.f32 0.35355338, %v2257_v37  ;;  %v4122_v37 = vld [vmem:[%s5648_s12 + $0x28] sm:$0xff] }
0x14e2   :  { %v2263_v39 = vadd.f32 %v5248_v34, %v2261_v38 }
0x14e4   :  { %v2267_v40 = vsel %vm250_vm0, %v2263_v39, -inf }
0x14e5   :  { %2268 = vmax.xlane.f32.xlu2 %v2267_v40 }
0x154a   :  { %v2266_v41 = vpop.xlane.xlu2 %2265 }
0x154b   :  { %v2270_v43 = vsub.f32 %v2262_v35, %v2266_v41 }
0x154d   :  { %v2272_v49 = vmul.f32 1.442695, %v2270_v43 }
0x154f   :  { %4407 = vpow2.f32 %v2272_v49 }
0x1555   :  { %v4408_v44 = vpop.eup %4407 }
0x1556   :  { %v2276_v19 = vsel %vm250_vm0, %v4408_v44, 0.0 }
0x1557   :  { %2277 = vadd.xlane.f32.xlu0 %v2276_v19 }
0x1558   :  { %v2269_v46 = vpop.xlane.xlu2 %2268 }
0x1559   :  { %v2271_v21 = vsub.f32 %v2263_v39, %v2269_v46 }
0x155b   :  { %v2274_v23 = vmul.f32 1.442695, %v2271_v21 }
0x155d   :  { %4409 = vpow2.f32 %v2274_v23 }
0x1563   :  { %v4410_v45 = vpop.eup %4409 }
0x1564   :  { %v2279_v48 = vsel %vm250_vm0, %v4410_v45, 0.0 }
0x1565   :  { %2280 = vadd.xlane.f32.xlu2 %v2279_v48 }
0x157d   :  { %2312 = vrot.lane.b32.xlu2 %v5224_v28, %s4563_s14 }
0x1585   :  { %2397 = vrot.lane.b32.xlu2 %v5224_v28, %s4566_s20 }
0x158d   :  { %2534 = vrot.lane.b32.xlu2 %v5220_v18, %s4565_s6 }
0x15ca   :  { %v2278_v51 = vpop.xlane.xlu0 %2277 }
0x15cb   :  { %4411 = vrcp.f32 %v2278_v51 }
0x15d1   :  { %v4412_v59 = vpop.eup %4411 }
0x15d2   :  { %v2284_v52 = vmul.f32 %v4412_v59, %v4408_v44 }
0x15d4   :  { %4130 = vmatmul.msk.f32.vlgmr.msra.gmra.mxu0 %vm250_vm0, %v2284_v52 }
0x15d8   :  { %v2281_v53 = vpop.xlane.xlu2 %2280 }
0x15d9   :  { %4413 = vrcp.f32 %v2281_v53 }
0x15dc   :  { %4135 = vmatmul.msk.f32.vlgmr.msrb.gmra.mxu0 %vm250_vm0, %v2370_v30 }
0x15df   :  { %v4414_v54 = vpop.eup %4413 }
0x15e0   :  { %v2285_v56 = vmul.f32 %v4414_v54, %v4410_v45  ;;  %v2313_v57 = vpop.permute.xlu2 %2312 }
0x15e1   :  { %2333 = vmatpush.msrb.mxu1 %v2313_v57 }
0x15e2   :  { %4131 = vmatmul.msk.f32.vlgmr.msrb.gmra.mxu1 %vm250_vm0, %v2285_v56 }
0x15e3   :  { %4136 = vmatpush.xpose.msk.msra.mxu1 %vm250_vm0, %v2400_v42 }
0x15e7   :  { %2524 = vmatpush.msrb.mxu1 %v4122_v37 }
0x15e8   :  { %v2398_v60 = vpop.permute.xlu2 %2397 }
0x15ea   :  { %4137 = vmatmul.msk.f32.vlgmr.msra.gmra.mxu1 %vm250_vm0, %v2398_v60 }
0x15f0   :  { %v2535_v4 = vpop.permute.xlu2 %2534 }
0x1651   :  { %v2309_v61 = vpop.f32.mrf.mxu0 }
0x1652   :  { %4132 = vmatmul.msk.f32.vlgmr.msra.gmra.mxu2 %vm250_vm0, %v2309_v61 }
0x1659   :  { %v2394_v62 = vpop.f32.mrf.mxu0 }
0x165a   :  { %v2425_v63 = vmul.f32 0.35355338, %v2394_v62 }
0x165c   :  { %v2427_v0 = vadd.f32 %v5248_v34, %v2425_v63 }
0x165e   :  { %v2429_v7 = vsel %vm250_vm0, %v2427_v0, -inf }
0x165f   :  { %2430 = vmax.xlane.f32.xlu0 %v2429_v7  ;;  %v2335_v47 = vpop.f32.mrf.mxu1 }
0x1660   :  { %4133 = vmatmul.msk.f32.gmra.mxu2 %vm250_vm0, %v2335_v47 }
0x1667   :  { %v2422_v8 = vpop.f32.mrf.mxu1 }
0x1668   :  { %v2426_v1 = vmul.f32 0.35355338, %v2422_v8  ;;  %4143 = vmatmul.msk.f32.vlgmr.msrb.gmra.mxu2 %vm250_vm0, %v2535_v4 }
0x166a   :  { %v2428_v50 = vadd.f32 %v5248_v34, %v2426_v1 }
0x166c   :  { %v2432_v9 = vsel %vm250_vm0, %v2428_v50, -inf }
0x166d   :  { %2433 = vmax.xlane.f32.xlu1 %v2432_v9 }
0x1673   :  { %2451 = vrot.lane.b32.xlu0 %v5220_v18, %s4568_s28 }
0x1686   :  { %2564 = vrot.lane.b32.xlu1 %v5224_v28, %s4567_s27 }
0x16d2   :  { %v2431_v10 = vpop.xlane.xlu0 %2430 }
0x16d3   :  { %v2435_v2 = vsub.f32 %v2427_v0, %v2431_v10  ;;  %v4123_v0 = vld [vmem:[%s5648_s12 + $0x30] sm:$0xff] }
0x16d5   :  { %v2437_v11 = vmul.f32 1.442695, %v2435_v2  ;;  %v5278_v12 = vpop.f32.mrf.mxu2 }
0x16d6   :  { %v2367_v7 = vadd.f32 %v5282_v58, %v5278_v12 }
0x16d7   :  { %4415 = vpow2.f32 %v2437_v11 }
0x16dd   :  { %v4416_v13 = vpop.eup %4415 }
0x16de   :  { %v2441_v55 = vsel %vm250_vm0, %v4416_v13, 0.0 }
0x16df   :  { %2442 = vadd.xlane.f32.xlu0 %v2441_v55 }
0x16e0   :  { %v2434_v14 = vpop.xlane.xlu1 %2433 }
0x16e1   :  { %v2436_v5 = vsub.f32 %v2428_v50, %v2434_v14 }
0x16e3   :  { %v2439_v17 = vmul.f32 1.442695, %v2436_v5  ;;  %v2364_v33 = vpop.f32.mrf.mxu2 }
0x16e4   :  { %v5285_v22 = vadd.f32 %v5282_v58, %v2364_v33 }
0x16e5   :  { %4417 = vpow2.f32 %v2439_v17  ;;  %v2452_v24 = vpop.permute.xlu0 %2451 }
0x16e6   :  { %2472 = vmatpush.msra.mxu3 %v2452_v24 }
0x16eb   :  { %v4418_v25 = vpop.eup %4417  ;;  %v2559_v26 = vpop.f32.mrf.mxu2 }
0x16ec   :  { %v2590_v27 = vmul.f32 0.35355338, %v2559_v26  ;;  %v2444_v30 = vsel %vm250_vm0, %v4418_v25, 0.0 }
0x16ed   :  { %2445 = vadd.xlane.f32.xlu0 %v2444_v30 }
0x16ee   :  { %v2592_v42 = vadd.f32 %v5248_v34, %v2590_v27 }
0x16f0   :  { %v2594_v31 = vsel %vm250_vm0, %v2592_v42, -inf }
0x16f1   :  { %2595 = vmax.xlane.f32.xlu2 %v2594_v31 }
0x16f8   :  { %v2565_v32 = vpop.permute.xlu1 %2564 }
0x16f9   :  { %4144 = vmatpush.xpose.msk.msrb.mxu3 %vm250_vm0, %v2565_v32 }
0x1701   :  { %2616 = vrot.lane.b32.xlu0 %v5220_v18, %s4570_s2 }
0x1709   :  { %2477 = vrot.lane.b32.xlu2 %v5224_v28, %s4568_s28 }
0x1711   :  { %2562 = vrot.lane.b32.xlu2 %v5224_v28, %s4565_s6 }
0x1719   :  { %2701 = vrot.lane.b32.xlu2 %v5220_v18, %s5664_s3 }
0x1721   :  { %2729 = vrot.lane.b32.xlu2 %v5224_v28, %s5664_s3 }
0x1752   :  { %v2443_v20 = vpop.xlane.xlu0 %2442 }
0x1753   :  { %4419 = vrcp.f32 %v2443_v20 }
0x1759   :  { %v4420_v35 = vpop.eup %4419 }
0x175a   :  { %v2449_v36 = vmul.f32 %v4420_v35, %v4416_v13  ;;  %v4168_v35 = vld [vmem:[%s5649_s11 + $0x38] sm:$0xff] }
0x175c   :  { %4138 = vmatmul.msk.f32.vlgmr.msra.gmra.mxu3 %vm250_vm0, %v2449_v36  ;;  %v4167_v36 = vld [vmem:[%s5649_s11 + $0x30] sm:$0xff] }
0x175d   :  { %2689 = vmatpush.msra.mxu3 %v4123_v0 }
0x1760   :  { %v2446_v38 = vpop.xlane.xlu0 %2445 }
0x1761   :  { %4421 = vrcp.f32 %v2446_v38  ;;  %v4165_v38 = vld [vmem:[%s5649_s11 + $0x20] sm:$0xff] }
0x1764   :  { %v2596_v39 = vpop.xlane.xlu2 %2595 }
0x1765   :  { %v2600_v40 = vsub.f32 %v2592_v42, %v2596_v39 }
0x1767   :  { %v2602_v41 = vmul.f32 1.442695, %v2600_v40  ;;  %v4422_v43 = vpop.eup %4421 }
0x1768   :  { %v2450_v49 = vmul.f32 %v4422_v43, %v4418_v25 }
0x1769   :  { %4423 = vpow2.f32 %v2602_v41 }
0x176c   :  { %v2478_v44 = vpop.permute.xlu2 %2477 }
0x176d   :  { %2498 = vmatpush.msra.mxu0 %v2478_v44 }
0x176e   :  { %4139 = vmatmul.msk.f32.vlgmr.msra.gmra.mxu0 %vm250_vm0, %v2450_v49 }
0x176f   :  { %v4424_v19 = vpop.eup %4423 }
0x1770   :  { %v2606_v46 = vsel %vm250_vm0, %v4424_v19, 0.0 }
0x1771   :  { %2607 = vadd.xlane.f32.xlu1 %v2606_v46 }
0x1773   :  { %v2617_v21 = vpop.permute.xlu0 %2616 }
0x1774   :  { %2637 = vmatpush.msrb.mxu0 %v2617_v21  ;;  %v2563_v23 = vpop.permute.xlu2 %2562  ;;  %v4124_v21 = vld [vmem:[%s5648_s12 + $0x38] sm:$0xff] }
0x1775   :  { %4145 = vmatmul.msk.f32.vlgmr.msrb.gmra.mxu3 %vm250_vm0, %v2563_v23 }
0x1776   :  { %2977 = vmatpush.msrb.mxu3 %v4168_v35 }
0x1778   :  { %2978 = vmatpush.msrb.mxu3 %v4167_v36 }
0x177c   :  { %v2702_v45 = vpop.permute.xlu2 %2701 }
0x177d   :  { %4150 = vmatpush.xpose.msk.msra.mxu0 %vm250_vm0, %v2702_v45 }
0x1784   :  { %v2730_v48 = vpop.permute.xlu2 %2729 }
0x1785   :  { %4152 = vmatpush.xpose.msk.msra.mxu1 %vm250_vm0, %v2730_v48 }
0x178a   :  { %2699 = vrot.lane.b32.xlu1 %v5220_v18, %s5665_s9 }
0x1792   :  { %2727 = vrot.lane.b32.xlu1 %v5224_v28, %s5665_s9 }
0x17df   :  { %v2474_v51 = vpop.f32.mrf.mxu3 }
0x17e0   :  { %4140 = vmatmul.msk.f32.vlgmr.msrb.gmra.mxu1 %vm250_vm0, %v2474_v51 }
0x17e1   :  { %2854 = vmatpush.msrb.mxu1 %v4124_v21 }
0x17e4   :  { %v2608_v59 = vpop.xlane.xlu1 %2607 }
0x17e5   :  { %4425 = vrcp.f32 %v2608_v59 }
0x17eb   :  { %v4426_v52 = vpop.eup %4425  ;;  %v2500_v53 = vpop.f32.mrf.mxu0 }
0x17ec   :  { %v2614_v54 = vmul.f32 %v4426_v52, %v4424_v19  ;;  %4141 = vmatmul.msk.f32.gmra.mxu1 %vm250_vm0, %v2500_v53 }
0x17ee   :  { %4146 = vmatmul.msk.f32.vlgmr.msrb.gmra.mxu0 %vm250_vm0, %v2614_v54  ;;  %v4305_v54 = vld [vmem:[%s5652_s18 + $0x1] ss:$0 sm:$0xff] }
0x17f8   :  { %v2587_v56 = vpop.f32.mrf.mxu3 }
0x17f9   :  { %v2591_v57 = vmul.f32 0.35355338, %v2587_v56 }
0x17fb   :  { %v2593_v60 = vadd.f32 %v5248_v34, %v2591_v57 }
0x17fc   :  { %v2700_v61 = vpop.permute.xlu1 %2699 }
0x17fd   :  { %4151 = vmatmul.msk.f32.vlgmr.msra.gmra.mxu0 %vm250_vm0, %v2700_v61  ;;  %v2597_v62 = vsel %vm250_vm0, %v2593_v60, -inf }
0x17fe   :  { %2598 = vmax.xlane.f32.xlu2 %v2597_v62 }
0x1804   :  { %v2728_v63 = vpop.permute.xlu1 %2727 }
0x1805   :  { %4153 = vmatmul.msk.f32.vlgmr.msra.gmra.mxu1 %vm250_vm0, %v2728_v63 }
0x185d   :  { %v2526_v47 = vpop.f32.mrf.mxu1 }
0x185e   :  { %v5322_v4 = vadd.f32 %v2526_v47, %v2367_v7 }
0x1869   :  { %v2529_v8 = vpop.f32.mrf.mxu1 }
0x186a   :  { %v5325_v1 = vadd.f32 %v2529_v8, %v5285_v22 }
0x186b   :  { %v2639_v50 = vpop.f32.mrf.mxu0 }
0x186c   :  { %4148 = vmatmul.msk.f32.vlgmr.msra.gmra.mxu3 %vm250_vm0, %v2639_v50 }
0x1871   :  { %v2599_v9 = vpop.xlane.xlu2 %2598 }
0x1872   :  { %v2601_v10 = vsub.f32 %v2593_v60, %v2599_v9 }
0x1874   :  { %v2604_v2 = vmul.f32 1.442695, %v2601_v10 }
0x1876   :  { %4427 = vpow2.f32 %v2604_v2 }
0x187a   :  { %v2724_v11 = vpop.f32.mrf.mxu0 }
0x187b   :  { %v2755_v13 = vmul.f32 0.35355338, %v2724_v11  ;;  %v4161_v11 = vld [vmem:[%s5653_s22 + $0x38] sm:$0xff] }
0x187c   :  { %v4428_v55 = vpop.eup %4427 }
0x187d   :  { %v2609_v14 = vsel %vm250_vm0, %v4428_v55, 0.0  ;;  %v2757_v12 = vadd.f32 %v5248_v34, %v2755_v13  ;;  %v4160_v13 = vld [vmem:[%s5653_s22 + $0x30] sm:$0xff] }
0x187e   :  { %2610 = vadd.xlane.f32.xlu0 %v2609_v14  ;;  %v4158_v14 = vld [vmem:[%s5653_s22 + $0x20] sm:$0xff] }
0x187f   :  { %v2759_v5 = vsel %vm250_vm0, %v2757_v12, -inf }
0x1880   :  { %2760 = vmax.xlane.f32.xlu1 %v2759_v5 }
0x1882   :  { %v2752_v22 = vpop.f32.mrf.mxu1 }
0x1883   :  { %v2756_v26 = vmul.f32 0.35355338, %v2752_v22 }
0x1892   :  { %2781 = vrot.lane.b32.xlu0 %v5220_v18, %s5666_s8  ;;  %v2758_v18 = vadd.f32 %v5248_v34, %v2756_v26  ;;  %v4166_v34 = vld [vmem:[%s5649_s11 + $0x28] sm:$0xff] }
0x1893   :  { %2979 = vmatpush.msrb.mxu3 %v4166_v34 }
0x1895   :  { %2980 = vmatpush.msrb.mxu3 %v4165_v38 }
0x1899   :  { %2642 = vrot.lane.b32.xlu1 %v5224_v28, %s4570_s2 }
0x189a   :  { %2807 = vrot.lane.b32.xlu0 %v5224_v28, %s5666_s8  ;;  %v2762_v28 = vsel %vm250_vm0, %v2758_v18, -inf }
0x18ef   :  { %v2691_v59 = vpop.f32.mrf.mxu3 }
0x18f0   :  { %v2697_v60 = vadd.f32 %v2691_v59, %v5322_v4  ;;  %v4306_v59 = vld [vmem:[%s5656_s0 + $0x1] ss:$0 sm:$0xff] }
0x18f1   :  { %v2611_v24 = vpop.xlane.xlu0 %2610 }
0x18f3   :  { %v2761_v58 = vpop.xlane.xlu1 %2760 }
0x18f4   :  { %v2765_v17 = vsub.f32 %v2757_v12, %v2761_v58 }
0x18f6   :  { %v2767_v33 = vmul.f32 1.442695, %v2765_v17 }
0x18f8   :  { %4429 = vpow2.f32 %v2767_v33 }
0x18f9   :  { %4431 = vrcp.f32 %v2611_v24 }
0x18fe   :  { %v4430_v25 = vpop.eup %4429 }
0x18ff   :  { %v2771_v27 = vsel %vm250_vm0, %v4430_v25, 0.0  ;;  %v4432_v42 = vpop.eup %4431 }
0x1900   :  { %2772 = vadd.xlane.f32.xlu2 %v2771_v27  ;;  %v2615_v31 = vmul.f32 %v4432_v42, %v4428_v55  ;;  %v4159_v55 = vld [vmem:[%s5653_s22 + $0x28] sm:$0xff]  ;;  %v5386_v42 = vld [vmem:[%s5655_s26 + $0x4] sm:$0x7] }
0x1901   :  { %v2913_v35 = vperm.slane %v5386_v42, 0 }
0x1904   :  { %v2782_v30 = vpop.permute.xlu0 %2781 }
0x1908   :  { %2763 = vmax.xlane.f32.xlu2 %v2762_v28 }
0x190b   :  { %v2643_v32 = vpop.permute.xlu1 %2642 }
0x190c   :  { %2663 = vmatpush.msra.mxu2 %v2643_v32  ;;  %v2808_v20 = vpop.permute.xlu0 %2807 }
0x190d   :  { %4147 = vmatmul.msk.f32.vlgmr.msra.gmra.mxu2 %vm250_vm0, %v2615_v31  ;;  %2828 = vmatpush.msrb.mxu0 %v2808_v20 }
0x190e   :  { %2802 = vmatpush.msrb.mxu2 %v2782_v30  ;;  %v5383_v30 = vld [vmem:[%s5654_s23 + $0x4] sm:$0x7] }
0x190f   :  { %v2910_v32 = vperm.slane %v5383_v30, 0 }
0x1910   :  { %2944 = vmatpush.msra.mxu2 %v4161_v11 }
0x1912   :  { %2945 = vmatpush.msra.mxu2 %v4160_v13 }
0x1914   :  { %2946 = vmatpush.msra.mxu2 %v4159_v55 }
0x1916   :  { %2947 = vmatpush.msra.mxu2 %v4158_v14 }
0x1973   :  { %v2773_v37 = vpop.xlane.xlu2 %2772 }
0x1974   :  { %4433 = vrcp.f32 %v2773_v37 }
0x197a   :  { %v4434_v39 = vpop.eup %4433 }
0x197b   :  { %v2779_v40 = vmul.f32 %v4434_v39, %v4430_v25  ;;  %v2764_v41 = vpop.xlane.xlu2 %2763 }
0x197c   :  { %v2766_v43 = vsub.f32 %v2758_v18, %v2764_v41 }
0x197d   :  { %4154 = vmatmul.msk.f32.vlgmr.msrb.gmra.mxu2 %vm250_vm0, %v2779_v40 }
0x197e   :  { %v2769_v49 = vmul.f32 1.442695, %v2766_v43 }
0x1980   :  { %4435 = vpow2.f32 %v2769_v49 }
0x1986   :  { %v4436_v44 = vpop.eup %4435 }
0x1987   :  { %v2774_v19 = vsel %vm250_vm0, %v4436_v44, 0.0 }
0x1988   :  { %2775 = vadd.xlane.f32.xlu2 %v2774_v19 }
0x1990   :  { %v2665_v46 = vpop.f32.mrf.mxu2 }
0x1991   :  { %4149 = vmatmul.msk.f32.gmra.mxu3 %vm250_vm0, %v2665_v46 }
0x1999   :  { %4170 = vmatmul.msk.f32.vlgmr.msrb.gmra.mxu3 %vm349_vm3, %v4979_v3 }
0x19a1   :  { %4171 = vmatmul.msk.f32.gmra.mxu3 %vm349_vm3, %v4985_v6 }
0x19fb   :  { %v2776_v23 = vpop.xlane.xlu2 %2775 }
0x19fc   :  { %4437 = vrcp.f32 %v2776_v23 }
0x1a00   :  { %v2804_v45 = vpop.f32.mrf.mxu2 }
0x1a01   :  { %4156 = vmatmul.msk.f32.vlgmr.msrb.gmra.mxu1 %vm250_vm0, %v2804_v45 }
0x1a02   :  { %v4438_v48 = vpop.eup %4437 }
0x1a03   :  { %v2780_v51 = vmul.f32 %v4438_v48, %v4436_v44 }
0x1a05   :  { %4155 = vmatmul.msk.f32.vlgmr.msrb.gmra.mxu0 %vm250_vm0, %v2780_v51 }
0x1a14   :  { %v2694_v52 = vpop.f32.mrf.mxu3 }
0x1a15   :  { %v2698_v53 = vadd.f32 %v2694_v52, %v5325_v1 }
0x1a1c   :  { %v2982_v3 = vpop.f32.mrf.mxu3 }
0x1a1d   :  { %v5357_v56 = vadd.f32 %v4305_v54, %v2982_v3 }
0x1a1f   :  { %4177 = vmatpush.xpose.msk.msra.mxu0 %vm250_vm0, %v5357_v56 }
0x1a24   :  { %v2985_v6 = vpop.f32.mrf.mxu3 }
0x1a25   :  { %v5361_v57 = vadd.f32 %v4305_v54, %v2985_v6 }
0x1a27   :  { %4179 = vmatpush.xpose.msk.msrb.mxu0 %vm250_vm0, %v5361_v57 }
0x1a7e   :  { %v2856_v61 = vpop.f32.mrf.mxu1 }
0x1a7f   :  { %v2862_v62 = vadd.f32 %v2856_v61, %v2697_v60 }
0x1a81   :  { %v2864_v63 = vadd.f32 %v2862_v62, %v5211_v16  ;;  %v5412_v62 = vld [vmem:[%s5657_s5] sm:$0xff] }
0x1a82   :  { %v2830_v0 = vpop.f32.mrf.mxu0 }
0x1a83   :  { %4157 = vmatmul.msk.f32.gmra.mxu1 %vm250_vm0, %v2830_v0  ;;  %v2866_v7 = vsel %vm349_vm3, %v2864_v63, 0.0 }
0x1a84   :  { %2867 = vadd.xlane.f32.xlu2 %v2866_v7 }
0x1af7   :  { %v2868_v47 = vpop.xlane.xlu2 %2867 }
0x1af8   :  { %v2872_v8 = vmul.f32 %v2868_v47, %v5006_v29 }
0x1afa   :  { %v2874_v1 = vsub.f32 %v2864_v63, %v2872_v8 }
0x1afc   :  { %v2876_v50 = vmul.f32 %v2874_v1, %v2874_v1 }
0x1afe   :  { %v2878_v4 = vsel %vm349_vm3, %v2876_v50, 0.0 }
0x1aff   :  { %2879 = vadd.xlane.f32.xlu1 %v2878_v4 }
0x1b00   :  { %v2859_v9 = vpop.f32.mrf.mxu1 }
0x1b01   :  { %v2863_v16 = vadd.f32 %v2859_v9, %v2698_v53 }
0x1b03   :  { %v2865_v10 = vadd.f32 %v2863_v16, %v5215_v15 }
0x1b05   :  { %v2869_v2 = vsel %vm349_vm3, %v2865_v10, 0.0 }
0x1b06   :  { %2870 = vadd.xlane.f32.xlu0 %v2869_v2 }
0x1b1a   :  { %3077 = vrot.lane.b32.xlu0 %v5357_v56, %s4562_s25 }
0x1b72   :  { %v2880_v12 = vpop.xlane.xlu1 %2879 }
0x1b73   :  { %v2884_v5 = vmul.f32 %v2880_v12, %v5006_v29 }
0x1b75   :  { %v2886_v15 = vadd.f32 1e-05, %v2884_v5 }
0x1b77   :  { %4439 = vrsqrt.f32 %v2886_v15  ;;  %vm2894_vm11 = vweird.f32 %v2886_v15 }
0x1b79   :  { %v2871_v58 = vpop.xlane.xlu0 %2870 }
0x1b7a   :  { %v2873_v17 = vmul.f32 %v2871_v58, %v5006_v29 }
0x1b7c   :  { %v2875_v33 = vsub.f32 %v2865_v10, %v2873_v17 }
0x1b7d   :  { %v4440_v22 = vpop.eup %4439 }
0x1b7e   :  { %v2889_v24 = vmul.f32 %v4440_v22, %v2886_v15  ;;  %v2877_v25 = vmul.f32 %v2875_v33, %v2875_v33  ;;  %vm2895_vm10 = vweird.f32 %v4440_v22 }
0x1b7f   :  { %vm2896_vm12 = vmor %vm2894_vm11, %vm2895_vm10 }
0x1b80   :  { %v2890_v26 = vmul.f32 %v4440_v22, %v2889_v24  ;;  %v2881_v27 = vsel %vm349_vm3, %v2877_v25, 0.0 }
0x1b81   :  { %2882 = vadd.xlane.f32.xlu2 %v2881_v27 }
0x1b82   :  { %v2891_v18 = vmul.f32 0.5, %v2890_v26 }
0x1b84   :  { %v2892_v28 = vsub.f32 1.5, %v2891_v18 }
0x1b86   :  { %v2893_v31 = vmul.f32 %v4440_v22, %v2892_v28 }
0x1b88   :  { %v2897_v20 = vsel %vm2896_vm12, %v4440_v22, %v2893_v31 }
0x1b89   :  { %v2908_v36 = vmul.f32 %v2897_v20, %v2874_v1 }
0x1b8b   :  { %v2911_v37 = vmul.f32 %v2910_v32, %v2908_v36 }
0x1b8c   :  { %v3078_v34 = vpop.permute.xlu0 %3077 }
0x1b8d   :  { %v5390_v38 = vadd.f32 %v2913_v35, %v2911_v37  ;;  %3098 = vmatpush.msra.mxu1 %v3078_v34  ;;  %v4172_v34 = vld [vmem:[%s5658_s17 + $0x20] sm:$0xff] }
0x1b8e   :  { %3150 = vmatpush.msra.mxu3 %v4172_v34 }
0x1b8f   :  { %4163 = vmatmul.msk.f32.vlgmr.msra.gmra.mxu2 %vm349_vm3, %v5390_v38 }
0x1b99   :  { %3162 = vrot.lane.b32.xlu2 %v5357_v56, %s4566_s20 }
0x1bf4   :  { %v2883_v39 = vpop.xlane.xlu2 %2882 }
0x1bf5   :  { %v2885_v40 = vmul.f32 %v2883_v39, %v5006_v29 }
0x1bf7   :  { %v2887_v41 = vadd.f32 1e-05, %v2885_v40 }
0x1bf9   :  { %4441 = vrsqrt.f32 %v2887_v41  ;;  %vm2904_vm14 = vweird.f32 %v2887_v41 }
0x1bfc   :  { %v3163_v54 = vpop.permute.xlu2 %3162 }
0x1bff   :  { %v4442_v43 = vpop.eup %4441 }
0x1c00   :  { %v2899_v49 = vmul.f32 %v4442_v43, %v2887_v41  ;;  %vm2905_vm13 = vweird.f32 %v4442_v43 }
0x1c01   :  { %vm2906_vm15 = vmor %vm2904_vm14, %vm2905_vm13 }
0x1c02   :  { %v2900_v44 = vmul.f32 %v4442_v43, %v2899_v49 }
0x1c04   :  { %v2901_v19 = vmul.f32 0.5, %v2900_v44 }
0x1c06   :  { %v2902_v46 = vsub.f32 1.5, %v2901_v19 }
0x1c08   :  { %v2903_v21 = vmul.f32 %v4442_v43, %v2902_v46 }
0x1c0a   :  { %v2907_v23 = vsel %vm2906_vm15, %v4442_v43, %v2903_v21 }
0x1c0b   :  { %v2909_v45 = vmul.f32 %v2907_v23, %v2875_v33 }
0x1c0d   :  { %v2912_v48 = vmul.f32 %v2910_v32, %v2909_v45 }
0x1c0f   :  { %v5397_v51 = vadd.f32 %v2913_v35, %v2912_v48 }
0x1c11   :  { %4164 = vmatmul.msk.f32.gmra.mxu2 %vm349_vm3, %v5397_v51 }
0x1c12   :  { %v2949_v52 = vpop.f32.mrf.mxu2 }
0x1c13   :  { %v5402_v53 = vadd.f32 %v4306_v59, %v2949_v52 }
0x1c15   :  { %3160 = vrot.lane.b32.xlu2 %v5402_v53, %s4566_s20  ;;  %4178 = vmatmul.msk.f32.vlgmr.msra.gmra.mxu0 %vm250_vm0, %v5402_v53 }
0x1c16   :  { %4185 = vmatpush.xpose.msk.msra.mxu0 %vm250_vm0, %v3163_v54 }
0x1c6f   :  { %v3161_v7 = vpop.permute.xlu2 %3160 }
0x1c92   :  { %v3022_v3 = vpop.f32.mrf.mxu0 }
0x1c93   :  { %v3051_v6 = vmul.f32 0.35355338, %v3022_v3 }
0x1c94   :  { %v2952_v60 = vpop.f32.mrf.mxu2 }
0x1c95   :  { %v5409_v61 = vadd.f32 %v4306_v59, %v2952_v60  ;;  %v3053_v63 = vadd.f32 %v5412_v62, %v3051_v6  ;;  %v4173_v59 = vld [vmem:[%s5658_s17 + $0x28] sm:$0xff] }
0x1c97   :  { %3188 = vrot.lane.b32.xlu0 %v5409_v61, %s4566_s20  ;;  %4180 = vmatmul.msk.f32.vlgmr.msrb.gmra.mxu0 %vm250_vm0, %v5409_v61  ;;  %v3055_v0 = vsel %vm250_vm0, %v3053_v63, -inf }
0x1c98   :  { %3056 = vmax.xlane.f32.xlu1 %v3055_v0 }
0x1c9f   :  { %4186 = vmatmul.msk.f32.vlgmr.msra.gmra.mxu0 %vm250_vm0, %v3161_v7 }
0x1cb1   :  { %3190 = vrot.lane.b32.xlu1 %v5361_v57, %s4566_s20 }
0x1d09   :  { %v3189_v5 = vpop.permute.xlu0 %3188 }
0x1d0b   :  { %v3057_v47 = vpop.xlane.xlu1 %3056 }
0x1d0c   :  { %v3061_v8 = vsub.f32 %v3053_v63, %v3057_v47 }
0x1d0e   :  { %v3063_v1 = vmul.f32 1.442695, %v3061_v8 }
0x1d10   :  { %4443 = vpow2.f32 %v3063_v1 }
0x1d14   :  { %v3048_v50 = vpop.f32.mrf.mxu0 }
0x1d15   :  { %v3052_v4 = vmul.f32 0.35355338, %v3048_v50 }
0x1d16   :  { %v4444_v9 = vpop.eup %4443 }
0x1d17   :  { %v3067_v16 = vsel %vm250_vm0, %v4444_v9, 0.0  ;;  %v3054_v10 = vadd.f32 %v5412_v62, %v3052_v4 }
0x1d18   :  { %3068 = vadd.xlane.f32.xlu2 %v3067_v16 }
0x1d19   :  { %v3058_v2 = vsel %vm250_vm0, %v3054_v10, -inf }
0x1d1a   :  { %3059 = vmax.xlane.f32.xlu0 %v3058_v2 }
0x1d1c   :  { %v3185_v11 = vpop.f32.mrf.mxu0 }
0x1d1d   :  { %v3216_v13 = vmul.f32 0.35355338, %v3185_v11 }
0x1d1f   :  { %v3218_v55 = vadd.f32 %v5412_v62, %v3216_v13 }
0x1d21   :  { %v3220_v14 = vsel %vm250_vm0, %v3218_v55, -inf }
0x1d22   :  { %3221 = vmax.xlane.f32.xlu1 %v3220_v14 }
0x1d23   :  { %v3191_v12 = vpop.permute.xlu1 %3190 }
0x1d24   :  { %4187 = vmatpush.xpose.msk.msrb.mxu1 %vm250_vm0, %v3191_v12 }
0x1d2e   :  { %3242 = vrot.lane.b32.xlu0 %v5357_v56, %s4564_s30 }
0x1d30   :  { %3103 = vrot.lane.b32.xlu2 %v5361_v57, %s4562_s25  ;;  %s5667_s25 = sld [smem:[#allocation27_spill]] }
0x1d3b   :  { %3327 = vrot.lane.b32.xlu1 %v5357_v56, %s4565_s6 }
0x1d43   :  { %3268 = vrot.lane.b32.xlu1 %v5361_v57, %s4564_s30  ;;  %s4511_s30 = scalar_lea.hbm %s4783_s29, 1 }
0x1d8b   :  { %v3069_v15 = vpop.xlane.xlu2 %3068 }
0x1d8c   :  { %4445 = vrcp.f32 %v3069_v15 }
0x1d8d   :  { %v3060_v58 = vpop.xlane.xlu0 %3059 }
0x1d8e   :  { %v3062_v17 = vsub.f32 %v3054_v10, %v3060_v58 }
0x1d90   :  { %v3065_v33 = vmul.f32 1.442695, %v3062_v17 }
0x1d92   :  { %v4446_v22 = vpop.eup %4445  ;;  %4447 = vpow2.f32 %v3065_v33 }
0x1d93   :  { %v3075_v24 = vmul.f32 %v4446_v22, %v4444_v9  ;;  %v3104_v25 = vpop.permute.xlu2 %3103 }
0x1d94   :  { %3124 = vmatpush.msrb.mxu2 %v3104_v25 }
0x1d95   :  { %v3222_v26 = vpop.xlane.xlu1 %3221  ;;  %4181 = vmatmul.msk.f32.vlgmr.msra.gmra.mxu1 %vm250_vm0, %v3075_v24 }
0x1d96   :  { %v3226_v27 = vsub.f32 %v3218_v55, %v3222_v26  ;;  %3315 = vmatpush.msra.mxu1 %v4173_v59 }
0x1d98   :  { %v4448_v18 = vpop.eup %4447  ;;  %v3228_v28 = vmul.f32 1.442695, %v3226_v27 }
0x1d99   :  { %v3070_v31 = vsel %vm250_vm0, %v4448_v18, 0.0 }
0x1d9a   :  { %4449 = vpow2.f32 %v3228_v28  ;;  %3071 = vadd.xlane.f32.xlu2 %v3070_v31  ;;  %v4174_v31 = vld [vmem:[%s5658_s17 + $0x30] sm:$0xff] }
0x1d9d   :  { %4188 = vmatmul.msk.f32.vlgmr.msrb.gmra.mxu1 %vm250_vm0, %v3189_v5 }
0x1da0   :  { %v4450_v32 = vpop.eup %4449  ;;  %v3243_v20 = vpop.permute.xlu0 %3242 }
0x1da1   :  { %3263 = vmatpush.msra.mxu2 %v3243_v20  ;;  %v3232_v35 = vsel %vm250_vm0, %v4450_v32, 0.0 }
0x1da2   :  { %3233 = vadd.xlane.f32.xlu2 %v3232_v35 }
0x1dad   :  { %v3328_v36 = vpop.permute.xlu1 %3327 }
0x1db5   :  { %v3269_v37 = vpop.permute.xlu1 %3268 }
0x1db6   :  { %3289 = vmatpush.msrb.mxu0 %v3269_v37 }
0x1dba   :  { %3325 = vrot.lane.b32.xlu2 %v5402_v53, %s4565_s6 }
0x1e0d   :  { %v3072_v39 = vpop.xlane.xlu2 %3071 }
0x1e0e   :  { %4451 = vrcp.f32 %v3072_v39 }
0x1e12   :  { %v3100_v40 = vpop.f32.mrf.mxu1 }
0x1e13   :  { %4183 = vmatmul.msk.f32.vlgmr.msra.gmra.mxu3 %vm250_vm0, %v3100_v40 }
0x1e14   :  { %v4452_v41 = vpop.eup %4451 }
0x1e15   :  { %v3076_v43 = vmul.f32 %v4452_v41, %v4448_v18  ;;  %v3234_v49 = vpop.xlane.xlu2 %3233 }
0x1e16   :  { %4453 = vrcp.f32 %v3234_v49 }
0x1e17   :  { %4182 = vmatmul.msk.f32.vlgmr.msrb.gmra.mxu2 %vm250_vm0, %v3076_v43 }
0x1e18   :  { %4193 = vmatpush.xpose.msk.msrb.mxu2 %vm250_vm0, %v3328_v36 }
0x1e1a   :  { %v3213_v44 = vpop.f32.mrf.mxu1 }
0x1e1b   :  { %v3217_v19 = vmul.f32 0.35355338, %v3213_v44 }
0x1e1c   :  { %v4454_v46 = vpop.eup %4453 }
0x1e1d   :  { %v3240_v21 = vmul.f32 %v4454_v46, %v4450_v32  ;;  %v3219_v23 = vadd.f32 %v5412_v62, %v3217_v19  ;;  %v3326_v48 = vpop.permute.xlu2 %3325 }
0x1e1f   :  { %4189 = vmatmul.msk.f32.vlgmr.msra.gmra.mxu2 %vm250_vm0, %v3240_v21  ;;  %v3223_v45 = vsel %vm250_vm0, %v3219_v23, -inf }
0x1e20   :  { %3224 = vmax.xlane.f32.xlu2 %v3223_v45 }
0x1e27   :  { %4194 = vmatmul.msk.f32.vlgmr.msrb.gmra.mxu2 %vm250_vm0, %v3326_v48 }
0x1e38   :  { %3353 = vrot.lane.b32.xlu2 %v5409_v61, %s4565_s6 }
0x1e93   :  { %v3225_v52 = vpop.xlane.xlu2 %3224 }
0x1e94   :  { %v3227_v54 = vsub.f32 %v3219_v23, %v3225_v52 }
0x1e96   :  { %v3230_v3 = vmul.f32 1.442695, %v3227_v54  ;;  %v5477_v5 = vpop.f32.mrf.mxu3 }
0x1e98   :  { %4455 = vpow2.f32 %v3230_v3 }
0x1e9a   :  { %v3126_v6 = vpop.f32.mrf.mxu2 }
0x1e9b   :  { %4184 = vmatmul.msk.f32.gmra.mxu3 %vm250_vm0, %v3126_v6 }
0x1e9e   :  { %v4456_v60 = vpop.eup %4455 }
0x1e9f   :  { %v3235_v63 = vsel %vm250_vm0, %v4456_v60, 0.0 }
0x1ea0   :  { %3236 = vadd.xlane.f32.xlu0 %v3235_v63 }
0x1ea2   :  { %v3265_v0 = vpop.f32.mrf.mxu2 }
0x1ea3   :  { %4191 = vmatmul.msk.f32.vlgmr.msra.gmra.mxu1 %vm250_vm0, %v3265_v0 }
0x1eaa   :  { %v3350_v7 = vpop.f32.mrf.mxu2 }
0x1eab   :  { %v3381_v47 = vmul.f32 0.35355338, %v3350_v7 }
0x1ead   :  { %v3383_v8 = vadd.f32 %v5412_v62, %v3381_v47 }
0x1eaf   :  { %v3385_v1 = vsel %vm250_vm0, %v3383_v8, -inf }
0x1eb0   :  { %3386 = vmax.xlane.f32.xlu1 %v3385_v1 }
0x1eb4   :  { %3355 = vrot.lane.b32.xlu0 %v5361_v57, %s4565_s6 }
0x1ebc   :  { %3492 = vrot.lane.b32.xlu0 %v5357_v56, %s5665_s9 }
0x1ec4   :  { %3490 = vrot.lane.b32.xlu0 %v5402_v53, %s5665_s9  ;;  %v3354_v53 = vpop.permute.xlu2 %3353 }
0x1ec9   :  { %3407 = vrot.lane.b32.xlu1 %v5357_v56, %s4567_s27 }
0x1ecc   :  { %3518 = vrot.lane.b32.xlu0 %v5409_v61, %s5665_s9 }
0x1f13   :  { %v3237_v50 = vpop.xlane.xlu0 %3236 }
0x1f14   :  { %4457 = vrcp.f32 %v3237_v50 }
0x1f1a   :  { %v4458_v4 = vpop.eup %4457 }
0x1f1b   :  { %v3241_v9 = vmul.f32 %v4458_v4, %v4456_v60 }
0x1f1d   :  { %4190 = vmatmul.msk.f32.vlgmr.msrb.gmra.mxu0 %vm250_vm0, %v3241_v9 }
0x1f1e   :  { %v5479_v17 = vpop.f32.mrf.mxu3 }
0x1f20   :  { %v5488_v32 = vpop.f32.mrf.mxu1 }
0x1f23   :  { %v3387_v16 = vpop.xlane.xlu1 %3386 }
0x1f24   :  { %v3391_v10 = vsub.f32 %v3383_v8, %v3387_v16 }
0x1f26   :  { %v3393_v2 = vmul.f32 1.442695, %v3391_v10  ;;  %v3356_v11 = vpop.permute.xlu0 %3355 }
0x1f27   :  { %4195 = vmatpush.xpose.msk.msrb.mxu3 %vm250_vm0, %v3356_v11 }
0x1f28   :  { %4459 = vpow2.f32 %v3393_v2 }
0x1f2a   :  { %4196 = vmatmul.msk.f32.vlgmr.msrb.gmra.mxu3 %vm250_vm0, %v3354_v53  ;;  %v4175_v53 = vld [vmem:[%s5658_s17 + $0x38] sm:$0xff] }
0x1f2b   :  { %3480 = vmatpush.msra.mxu3 %v4174_v31 }
0x1f2e   :  { %v4460_v13 = vpop.eup %4459  ;;  %v3493_v14 = vpop.permute.xlu0 %3492 }
0x1f2f   :  { %v3397_v55 = vsel %vm250_vm0, %v4460_v13, 0.0 }
0x1f30   :  { %3398 = vadd.xlane.f32.xlu2 %v3397_v55  ;;  %v4307_v55 = vld [vmem:[%s5659_s21 + $0x1] ss:$0 sm:$0xff] }
0x1f36   :  { %v3491_v58 = vpop.permute.xlu0 %3490 }
0x1f3b   :  { %v3408_v61 = vpop.permute.xlu1 %3407 }
0x1f3c   :  { %3428 = vmatpush.msra.mxu0 %v3408_v61  ;;  %v3158_v61 = vadd.f32 %v4307_v55, %v5477_v5 }
0x1f3e   :  { %4201 = vmatpush.xpose.msk.msrb.mxu0 %vm250_vm0, %v3493_v14  ;;  %v3519_v26 = vpop.permute.xlu0 %3518 }
0x1f48   :  { %3520 = vrot.lane.b32.xlu2 %v5361_v57, %s5665_s9 }
0x1f9a   :  { %v3291_v12 = vpop.f32.mrf.mxu0 }
0x1f9b   :  { %4192 = vmatmul.msk.f32.gmra.mxu1 %vm250_vm0, %v3291_v12  ;;  %v3323_v12 = vadd.f32 %v5488_v32, %v3158_v61 }
0x1fa3   :  { %v3399_v15 = vpop.xlane.xlu2 %3398 }
0x1fa4   :  { %4461 = vrcp.f32 %v3399_v15 }
0x1faa   :  { %v4462_v33 = vpop.eup %4461 }
0x1fab   :  { %v3405_v22 = vmul.f32 %v4462_v33, %v4460_v13  ;;  %v3521_v24 = vpop.permute.xlu2 %3520 }
0x1fac   :  { %4203 = vmatpush.xpose.msk.msrb.mxu1 %vm250_vm0, %v3521_v24 }
0x1fad   :  { %v3378_v25 = vpop.f32.mrf.mxu3  ;;  %4197 = vmatmul.msk.f32.vlgmr.msra.gmra.mxu0 %vm250_vm0, %v3405_v22 }
0x1fae   :  { %v3382_v27 = vmul.f32 0.35355338, %v3378_v25  ;;  %v3159_v25 = vadd.f32 %v4307_v55, %v5479_v17 }
0x1faf   :  { %4204 = vmatmul.msk.f32.vlgmr.msrb.gmra.mxu1 %vm250_vm0, %v3519_v26 }
0x1fb0   :  { %v3384_v18 = vadd.f32 %v5412_v62, %v3382_v27  ;;  %3645 = vmatpush.msra.mxu1 %v4175_v53 }
0x1fb2   :  { %v3388_v28 = vsel %vm250_vm0, %v3384_v18, -inf }
0x1fb3   :  { %3389 = vmax.xlane.f32.xlu2 %v3388_v28 }
0x1fb5   :  { %4202 = vmatmul.msk.f32.vlgmr.msrb.gmra.mxu0 %vm250_vm0, %v3491_v58 }
0x2018   :  { %v5490_v20 = vpop.f32.mrf.mxu1 }
0x2019   :  { %v3324_v27 = vadd.f32 %v5490_v20, %v3159_v25  ;;  %v4220_v25 = vld [vmem:[%s5661_s10 + $0xa0] sm:$0xff] }
0x2026   :  { %v3390_v35 = vpop.xlane.xlu2 %3389 }
0x2027   :  { %v3392_v36 = vsub.f32 %v3384_v18, %v3390_v35 }
0x2029   :  { %v3395_v37 = vmul.f32 1.442695, %v3392_v36 }
0x202a   :  { %v3430_v34 = vpop.f32.mrf.mxu0 }
0x202b   :  { %4463 = vpow2.f32 %v3395_v37  ;;  %4199 = vmatmul.msk.f32.vlgmr.msra.gmra.mxu3 %vm250_vm0, %v3430_v34 }
0x202c   :  { %v3543_v39 = vpop.f32.mrf.mxu1 }
0x202d   :  { %v3547_v40 = vmul.f32 0.35355338, %v3543_v39 }
0x202f   :  { %v3549_v41 = vadd.f32 %v5412_v62, %v3547_v40 }
0x2031   :  { %v4464_v43 = vpop.eup %4463  ;;  %v3553_v49 = vsel %vm250_vm0, %v3549_v41, -inf }
0x2032   :  { %v3515_v44 = vpop.f32.mrf.mxu0  ;;  %3554 = vmax.xlane.f32.xlu0 %v3553_v49  ;;  %v3400_v19 = vsel %vm250_vm0, %v4464_v43, 0.0  ;;  %v4210_v49 = vld [vmem:[%s5660_s15 + $0x28] sm:$0xff] }
0x2033   :  { %v3546_v46 = vmul.f32 0.35355338, %v3515_v44  ;;  %3401 = vadd.xlane.f32.xlu2 %v3400_v19  ;;  %v4209_v44 = vld [vmem:[%s5660_s15 + $0x20] sm:$0xff] }
0x2035   :  { %v3548_v21 = vadd.f32 %v5412_v62, %v3546_v46 }
0x2037   :  { %v3550_v23 = vsel %vm250_vm0, %v3548_v21, -inf }
0x2038   :  { %3551 = vmax.xlane.f32.xlu1 %v3550_v23 }
0x2046   :  { %3572 = vrot.lane.b32.xlu0 %v5357_v56, %s5664_s3 }
0x204b   :  { %3433 = vrot.lane.b32.xlu2 %v5361_v57, %s4567_s27 }
0x20a5   :  { %v3555_v48 = vpop.xlane.xlu0 %3554 }
0x20a6   :  { %v3402_v45 = vpop.xlane.xlu2 %3401  ;;  %v3557_v3 = vsub.f32 %v3549_v41, %v3555_v48  ;;  %v4212_v41 = vld [vmem:[%s5660_s15 + $0x38] sm:$0xff] }
0x20a7   :  { %4465 = vrcp.f32 %v3402_v45 }
0x20a8   :  { %v3560_v62 = vmul.f32 1.442695, %v3557_v3  ;;  %v4229_v3 = vld [vmem:[%s5661_s10 + $0xe8] sm:$0xff] }
0x20ab   :  { %v3552_v59 = vpop.xlane.xlu1 %3551 }
0x20ac   :  { %v3556_v52 = vsub.f32 %v3548_v21, %v3552_v59  ;;  %v4231_v59 = vld [vmem:[%s5661_s10 + $0xf8] sm:$0xff] }
0x20ad   :  { %v4466_v54 = vpop.eup %4465  ;;  %3786 = vmatpush.msrb.mxu3 %v4231_v59  ;;  %v4309_v59 = vld [vmem:[%s5663_s1 + $0x1] ss:$0 sm:$0xff] }
0x20ae   :  { %v3406_v6 = vmul.f32 %v4466_v54, %v4464_v43  ;;  %v3558_v60 = vmul.f32 1.442695, %v3556_v52  ;;  %v3434_v63 = vpop.permute.xlu2 %3433  ;;  %v3482_v14 = vpop.f32.mrf.mxu3  ;;  %v4211_v43 = vld [vmem:[%s5660_s15 + $0x30] sm:$0xff] }
0x20af   :  { %3454 = vmatpush.msra.mxu2 %v3434_v63  ;;  %v3488_v15 = vadd.f32 %v3482_v14, %v3323_v12  ;;  %v4230_v52 = vld [vmem:[%s5661_s10 + $0xf0] sm:$0xff]  ;;  %v4227_v14 = vld [vmem:[%s5661_s10 + $0xd8] sm:$0xff] }
0x20b0   :  { %4467 = vpow2.f32 %v3558_v60  ;;  %4198 = vmatmul.msk.f32.vlgmr.msra.gmra.mxu2 %vm250_vm0, %v3406_v6  ;;  %3787 = vmatpush.msrb.mxu3 %v4230_v52  ;;  %v4226_v12 = vld [vmem:[%s5661_s10 + $0xd0] sm:$0xff] }
0x20b1   :  { %4469 = vpow2.f32 %v3560_v62  ;;  %v4228_v62 = vld [vmem:[%s5661_s10 + $0xe0] sm:$0xff] }
0x20b2   :  { %3788 = vmatpush.msrb.mxu3 %v4229_v3 }
0x20b4   :  { %3789 = vmatpush.msrb.mxu3 %v4228_v62 }
0x20b6   :  { %v4468_v0 = vpop.eup %4467  ;;  %3790 = vmatpush.msrb.mxu3 %v4227_v14 }
0x20b7   :  { %v3562_v56 = vsel %vm250_vm0, %v4468_v0, 0.0  ;;  %v4470_v47 = vpop.eup %4469 }
0x20b8   :  { %3563 = vadd.xlane.f32.xlu1 %v3562_v56  ;;  %v3573_v7 = vpop.permute.xlu0 %3572  ;;  %v3565_v8 = vsel %vm250_vm0, %v4470_v47, 0.0  ;;  %v3701_v56 = vperm.slane %v5383_v30, 1  ;;  %3791 = vmatpush.msrb.mxu3 %v4226_v12 }
0x20b9   :  { %3593 = vmatpush.msrb.mxu2 %v3573_v7 }
0x20bb   :  { %3735 = vmatpush.msra.mxu2 %v4212_v41 }
0x20bd   :  { %3736 = vmatpush.msra.mxu2 %v4211_v43 }
0x20bf   :  { %3737 = vmatpush.msra.mxu2 %v4210_v49 }
0x20c0   :  { %3566 = vadd.xlane.f32.xlu1 %v3565_v8  ;;  %v3704_v8 = vperm.slane %v5386_v42, 1 }
0x20c1   :  { %3738 = vmatpush.msra.mxu2 %v4209_v44 }
0x20d9   :  { %3598 = vrot.lane.b32.xlu1 %v5361_v57, %s5664_s3 }
0x212b   :  { %v3564_v1 = vpop.xlane.xlu1 %3563 }
0x212c   :  { %4471 = vrcp.f32 %v3564_v1 }
0x2132   :  { %v4472_v50 = vpop.eup %4471 }
0x2133   :  { %v3570_v4 = vmul.f32 %v4472_v50, %v4468_v0  ;;  %v3456_v9 = vpop.f32.mrf.mxu2  ;;  %v3567_v16 = vpop.xlane.xlu1 %3566 }
0x2134   :  { %4200 = vmatmul.msk.f32.gmra.mxu3 %vm250_vm0, %v3456_v9  ;;  %4473 = vrcp.f32 %v3567_v16 }
0x2135   :  { %4205 = vmatmul.msk.f32.vlgmr.msrb.gmra.mxu2 %vm250_vm0, %v3570_v4 }
0x213a   :  { %v4474_v10 = vpop.eup %4473 }
0x213b   :  { %v3571_v2 = vmul.f32 %v4474_v10, %v4470_v47 }
0x214b   :  { %v3599_v11 = vpop.permute.xlu1 %3598 }
0x214c   :  { %3619 = vmatpush.msra.mxu0 %v3599_v11 }
0x214d   :  { %4206 = vmatmul.msk.f32.vlgmr.msra.gmra.mxu0 %vm250_vm0, %v3571_v2 }
0x21b7   :  { %v3485_v26 = vpop.f32.mrf.mxu3 }
0x21b8   :  { %v3595_v57 = vpop.f32.mrf.mxu2  ;;  %v3489_v18 = vadd.f32 %v3485_v26, %v3324_v27  ;;  %v4219_v26 = vld [vmem:[%s5661_s10 + $0x98] sm:$0xff]  ;;  %v4218_v27 = vld [vmem:[%s5661_s10 + $0x90] sm:$0xff] }
0x21b9   :  { %4207 = vmatmul.msk.f32.vlgmr.msra.gmra.mxu1 %vm250_vm0, %v3595_v57 }
0x21ca   :  { %v3621_v13 = vpop.f32.mrf.mxu0 }
0x21cb   :  { %4208 = vmatmul.msk.f32.gmra.mxu1 %vm250_vm0, %v3621_v13 }
0x2236   :  { %v3647_v58 = vpop.f32.mrf.mxu1 }
0x2237   :  { %v3653_v33 = vadd.f32 %v3647_v58, %v3488_v15  ;;  %v4225_v15 = vld [vmem:[%s5661_s10 + $0xc8] sm:$0xff]  ;;  %v4224_v58 = vld [vmem:[%s5661_s10 + $0xc0] sm:$0xff] }
0x2238   :  { %3792 = vmatpush.msrb.mxu3 %v4225_v15 }
0x2239   :  { %v3655_v22 = vadd.f32 %v3653_v33, %v5390_v38  ;;  %v4223_v33 = vld [vmem:[%s5661_s10 + $0xb8] sm:$0xff] }
0x223a   :  { %3793 = vmatpush.msrb.mxu3 %v4224_v58 }
0x223b   :  { %v3657_v24 = vsel %vm349_vm3, %v3655_v22, 0.0 }
0x223c   :  { %3658 = vadd.xlane.f32.xlu0 %v3657_v24  ;;  %3794 = vmatpush.msrb.mxu3 %v4223_v33  ;;  %v4221_v24 = vld [vmem:[%s5661_s10 + $0xa8] sm:$0xff] }
0x2248   :  { %v3650_v28 = vpop.f32.mrf.mxu1 }
0x2249   :  { %v3654_v31 = vadd.f32 %v3650_v28, %v3489_v18  ;;  %v4217_v18 = vld [vmem:[%s5661_s10 + $0x88] sm:$0xff]  ;;  %v4216_v28 = vld [vmem:[%s5661_s10 + $0x80] sm:$0xff] }
0x224b   :  { %v3656_v5 = vadd.f32 %v3654_v31, %v5397_v51  ;;  %v4308_v31 = vld [vmem:[%s5662_s7 + $0x1] ss:$0 sm:$0xff] }
0x224d   :  { %v3660_v32 = vsel %vm349_vm3, %v3656_v5, 0.0 }
0x224e   :  { %3661 = vadd.xlane.f32.xlu2 %v3660_v32 }
0x22af   :  { %v3659_v35 = vpop.xlane.xlu0 %3658 }
0x22b0   :  { %v3663_v38 = vmul.f32 %v3659_v35, %v5006_v29 }
0x22b2   :  { %v3665_v36 = vsub.f32 %v3655_v22, %v3663_v38  ;;  %v4222_v22 = vld [vmem:[%s5661_s10 + $0xb0] sm:$0xff] }
0x22b3   :  { %3795 = vmatpush.msrb.mxu3 %v4222_v22  ;;  %v3855_v22 = vperm.slane %v5383_v30, 2 }
0x22b4   :  { %v3667_v17 = vmul.f32 %v3665_v36, %v3665_v36 }
0x22b5   :  { %3796 = vmatpush.msrb.mxu3 %v4221_v24 }
0x22b6   :  { %v3669_v37 = vsel %vm349_vm3, %v3667_v17, 0.0 }
0x22b7   :  { %3670 = vadd.xlane.f32.xlu1 %v3669_v37  ;;  %3797 = vmatpush.msrb.mxu3 %v4220_v25 }
0x22b9   :  { %3798 = vmatpush.msrb.mxu3 %v4219_v26  ;;  %v3858_v26 = vperm.slane %v5386_v42, 2 }
0x22bb   :  { %3799 = vmatpush.msrb.mxu3 %v4218_v27 }
0x22bd   :  { %3800 = vmatpush.msrb.mxu3 %v4217_v18 }
0x22bf   :  { %3801 = vmatpush.msrb.mxu3 %v4216_v28 }
0x22c1   :  { %v3662_v20 = vpop.xlane.xlu2 %3661 }
0x22c2   :  { %v3664_v34 = vmul.f32 %v3662_v20, %v5006_v29 }
0x22c4   :  { %v3666_v39 = vsub.f32 %v3656_v5, %v3664_v34 }
0x22c6   :  { %v3668_v40 = vmul.f32 %v3666_v39, %v3666_v39 }
0x22c8   :  { %v3672_v51 = vsel %vm349_vm3, %v3668_v40, 0.0 }
0x22c9   :  { %3673 = vadd.xlane.f32.xlu0 %v3672_v51 }
0x232a   :  { %v3671_v19 = vpop.xlane.xlu1 %3670 }
0x232b   :  { %v3675_v46 = vmul.f32 %v3671_v19, %v5006_v29 }
0x232d   :  { %v3677_v21 = vadd.f32 1e-05, %v3675_v46 }
0x232f   :  { %4475 = vrsqrt.f32 %v3677_v21  ;;  %vm3685_vm1 = vweird.f32 %v3677_v21 }
0x2335   :  { %v4476_v23 = vpop.eup %4475 }
0x2336   :  { %v3680_v45 = vmul.f32 %v4476_v23, %v3677_v21  ;;  %vm3686_vm0 = vweird.f32 %v4476_v23 }
0x2337   :  { %vm3687_vm4 = vmor %vm3685_vm1, %vm3686_vm0 }
0x2338   :  { %v3681_v48 = vmul.f32 %v4476_v23, %v3680_v45 }
0x233a   :  { %v3682_v54 = vmul.f32 0.5, %v3681_v48 }
0x233c   :  { %v3683_v6 = vsub.f32 1.5, %v3682_v54  ;;  %v3674_v60 = vpop.xlane.xlu0 %3673 }
0x233d   :  { %v3676_v63 = vmul.f32 %v3674_v60, %v5006_v29 }
0x233e   :  { %v3684_v0 = vmul.f32 %v4476_v23, %v3683_v6 }
0x233f   :  { %v3678_v7 = vadd.f32 1e-05, %v3676_v63 }
0x2340   :  { %v3688_v47 = vsel %vm3687_vm4, %v4476_v23, %v3684_v0 }
0x2341   :  { %v3699_v1 = vmul.f32 %v3688_v47, %v3665_v36  ;;  %4477 = vrsqrt.f32 %v3678_v7  ;;  %vm3695_vm6 = vweird.f32 %v3678_v7 }
0x2343   :  { %v3702_v50 = vmul.f32 %v3701_v56, %v3699_v1 }
0x2345   :  { %v5538_v4 = vadd.f32 %v3704_v8, %v3702_v50 }
0x2347   :  { %v4478_v9 = vpop.eup %4477  ;;  %4214 = vmatmul.msk.f32.vlgmr.msra.gmra.mxu2 %vm349_vm3, %v5538_v4 }
0x2348   :  { %v3690_v16 = vmul.f32 %v4478_v9, %v3678_v7  ;;  %vm3696_vm5 = vweird.f32 %v4478_v9 }
0x2349   :  { %vm3697_vm7 = vmor %vm3695_vm6, %vm3696_vm5 }
0x234a   :  { %v3691_v10 = vmul.f32 %v4478_v9, %v3690_v16 }
0x234c   :  { %v3692_v2 = vmul.f32 0.5, %v3691_v10 }
0x234e   :  { %v3693_v11 = vsub.f32 1.5, %v3692_v2 }
0x2350   :  { %v3694_v53 = vmul.f32 %v4478_v9, %v3693_v11 }
0x2352   :  { %v3698_v57 = vsel %vm3697_vm7, %v4478_v9, %v3694_v53 }
0x2353   :  { %v3700_v13 = vmul.f32 %v3698_v57, %v3666_v39 }
0x2355   :  { %v3703_v55 = vmul.f32 %v3701_v56, %v3700_v13 }
0x2357   :  { %v3706_v61 = vadd.f32 %v3704_v8, %v3703_v55 }
0x2359   :  { %4215 = vmatmul.msk.f32.gmra.mxu2 %vm349_vm3, %v3706_v61 }
0x23ca   :  { %v3740_v5 = vpop.f32.mrf.mxu2 }
0x23cb   :  { %v3741_v32 = vadd.f32 %v4308_v31, %v3740_v5 }
0x23cd   :  { %v3748_v35 = vmul.f32 0.044715, %v3741_v32  ;;  %v3746_v40 = vmul.f32 0.5, %v3741_v32 }
0x23cf   :  { %v3750_v38 = vmul.f32 %v3748_v35, %v3741_v32 }
0x23d1   :  { %v3752_v36 = vmul.f32 %v3750_v38, %v3741_v32 }
0x23d3   :  { %v3754_v17 = vadd.f32 %v3752_v36, %v3741_v32 }
0x23d5   :  { %v3756_v37 = vmul.f32 0.7978846, %v3754_v17 }
0x23d7   :  { %4479 = vtanh.f32 %v3756_v37 }
0x23dc   :  { %v3743_v20 = vpop.f32.mrf.mxu2 }
0x23dd   :  { %v4480_v34 = vpop.eup %4479  ;;  %v3744_v39 = vadd.f32 %v4308_v31, %v3743_v20 }
0x23de   :  { %v3760_v51 = vadd.f32 1.0, %v4480_v34 }
0x23df   :  { %v3749_v41 = vmul.f32 0.044715, %v3744_v39  ;;  %v3747_v23 = vmul.f32 0.5, %v3744_v39 }
0x23e0   :  { %v3762_v43 = vmul.f32 %v3760_v51, %v3746_v40 }
0x23e1   :  { %v3751_v49 = vmul.f32 %v3749_v41, %v3744_v39 }
0x23e2   :  { %3802 = vmatmul.f32.vlgmr.msrb.gmra.mxu3 %v3762_v43 }
0x23e3   :  { %v3753_v44 = vmul.f32 %v3751_v49, %v3744_v39 }
0x23e5   :  { %v3755_v19 = vadd.f32 %v3753_v44, %v3744_v39 }
0x23e7   :  { %v3757_v46 = vmul.f32 0.7978846, %v3755_v19 }
0x23e9   :  { %4481 = vtanh.f32 %v3757_v46 }
0x23ef   :  { %v4482_v21 = vpop.eup %4481 }
0x23f0   :  { %v3761_v45 = vadd.f32 1.0, %v4482_v21  ;;  %v3920_v21 = vld [vmem:[%s4773_s24 + $0x18] sm:$0xff] }
0x23f1   :  { %3943 = vmatpush.msrb.mxu0 %v3920_v21 }
0x23f2   :  { %v3763_v48 = vmul.f32 %v3761_v45, %v3747_v23  ;;  %v3919_v23 = vld [vmem:[%s4773_s24 + $0x10] sm:$0xff]  ;;  %v3918_v45 = vld [vmem:[%s4773_s24 + $0x8] sm:$0xff] }
0x23f3   :  { %3944 = vmatpush.msrb.mxu0 %v3919_v23 }
0x23f4   :  { %3805 = vmatmul.f32.gmra.mxu3 %v3763_v48  ;;  %v3917_v48 = vld [vmem:[%s4773_s24] sm:$0xff] }
0x23f5   :  { %3945 = vmatpush.msrb.mxu0 %v3918_v45 }
0x23f7   :  { %3946 = vmatpush.msrb.mxu0 %v3917_v48 }
0x2465   :  { %v3803_v52 = vpop.f32.mrf.mxu3 }
0x2466   :  { %v3804_v54 = vadd.f32 %v4309_v59, %v3803_v52 }
0x2468   :  { %v3809_v3 = vadd.f32 %v3804_v54, %v5538_v4 }
0x246a   :  { %v3811_v6 = vsel %vm349_vm3, %v3809_v3, 0.0 }
0x246b   :  { %3812 = vadd.xlane.f32.xlu2 %v3811_v6 }
0x2477   :  { %v3806_v60 = vpop.f32.mrf.mxu3 }
0x2478   :  { %v3807_v63 = vadd.f32 %v4309_v59, %v3806_v60 }
0x247a   :  { %v3810_v62 = vadd.f32 %v3807_v63, %v3706_v61 }
0x247c   :  { %v3814_v0 = vsel %vm349_vm3, %v3810_v62, 0.0 }
0x247d   :  { %3815 = vadd.xlane.f32.xlu0 %v3814_v0 }
0x24de   :  { %v3813_v56 = vpop.xlane.xlu2 %3812 }
0x24df   :  { %v3817_v7 = vmul.f32 %v3813_v56, %v5006_v29 }
0x24e1   :  { %v3819_v47 = vsub.f32 %v3809_v3, %v3817_v7 }
0x24e3   :  { %v3821_v8 = vmul.f32 %v3819_v47, %v3819_v47 }
0x24e5   :  { %v3823_v1 = vsel %vm349_vm3, %v3821_v8, 0.0 }
0x24e6   :  { %3824 = vadd.xlane.f32.xlu2 %v3823_v1 }
0x24f0   :  { %v3816_v50 = vpop.xlane.xlu0 %3815 }
0x24f1   :  { %v3818_v4 = vmul.f32 %v3816_v50, %v5006_v29  ;;  %v4311_v50 = vld [vmem:[%s4768_s4] ss:$0 sm:$0xff]  ;;  %s3981_s4 = sshll.u32 %s4783_s29, 4  ;;  %s3982_s4 = int_to_ptr.hbm [resolvable:$true] %s3981_s4 }
0x24f3   :  { %v3820_v9 = vsub.f32 %v3810_v62, %v3818_v4 }
0x24f5   :  { %v3822_v16 = vmul.f32 %v3820_v9, %v3820_v9 }
0x24f7   :  { %v3826_v10 = vsel %vm349_vm3, %v3822_v16, 0.0 }
0x24f8   :  { %3827 = vadd.xlane.f32.xlu0 %v3826_v10 }
0x2559   :  { %v3825_v2 = vpop.xlane.xlu2 %3824 }
0x255a   :  { %v3829_v11 = vmul.f32 %v3825_v2, %v5006_v29 }
0x255c   :  { %v3831_v53 = vadd.f32 1e-05, %v3829_v11 }
0x255e   :  { %4483 = vrsqrt.f32 %v3831_v53  ;;  %vm3839_vm9 = vweird.f32 %v3831_v53 }
0x2564   :  { %v4484_v57 = vpop.eup %4483 }
0x2565   :  { %v3834_v13 = vmul.f32 %v4484_v57, %v3831_v53  ;;  %vm3840_vm8 = vweird.f32 %v4484_v57 }
0x2566   :  { %vm3841_vm10 = vmor %vm3839_vm9, %vm3840_vm8 }
0x2567   :  { %v3835_v55 = vmul.f32 %v4484_v57, %v3834_v13 }
0x2569   :  { %v3836_v61 = vmul.f32 0.5, %v3835_v55 }
0x256b   :  { %v3837_v14 = vsub.f32 1.5, %v3836_v61  ;;  %v3828_v12 = vpop.xlane.xlu0 %3827 }
0x256c   :  { %v3830_v15 = vmul.f32 %v3828_v12, %v5006_v29  ;;  %v4312_v12 = vld [vmem:[%s4778_s19] ss:$0 sm:$0xff]  ;;  %s4574_s19 = smov [#allocation2]  }
0x256d   :  { %v3838_v58 = vmul.f32 %v4484_v57, %v3837_v14  ;;  %s3979_s24 = sshll.u32 %s4574_s19, 4  ;;  %s3980_s24 = int_to_ptr.vmem [resolvable:$true] %s3979_s24 }
0x256e   :  { %v3832_v33 = vadd.f32 1e-05, %v3830_v15 }
0x256f   :  { %v3842_v24 = vsel %vm3841_vm10, %v4484_v57, %v3838_v58 }
0x2570   :  { %4485 = vrsqrt.f32 %v3832_v33  ;;  %v3853_v25 = vmul.f32 %v3842_v24, %v3819_v47  ;;  %vm3849_vm12 = vweird.f32 %v3832_v33  ;;  %v4310_v47 = vld [vmem:[%s5667_s25] ss:$0 sm:$0xff] }
0x2572   :  { %v3856_v27 = vmul.f32 %v3855_v22, %v3853_v25 }
0x2574   :  { %v3859_v18 = vadd.f32 %v3858_v26, %v3856_v27 }
0x2576   :  { %v4486_v28 = vpop.eup %4485  ;;  %v3863_v31 = vsel %vm349_vm3, %v3859_v18, 0.0 }
0x2577   :  { %v3844_v5 = vmul.f32 %v4486_v28, %v3832_v33  ;;  %3864 = vadd.xlane.f32.xlu1 %v3863_v31  ;;  %vm3850_vm11 = vweird.f32 %v4486_v28  ;;  %v4493_v33 = vld [vmem:[%s4593_s13] sm:$0xff] }
0x2578   :  { %vm3851_vm13 = vmor %vm3849_vm12, %vm3850_vm11 }
0x2579   :  { %v3845_v32 = vmul.f32 %v4486_v28, %v3844_v5 }
0x257b   :  { %v3846_v35 = vmul.f32 0.5, %v3845_v32 }
0x257d   :  { %v3847_v38 = vsub.f32 1.5, %v3846_v35 }
0x257f   :  { %v3848_v36 = vmul.f32 %v4486_v28, %v3847_v38 }
0x2581   :  { %v3852_v30 = vsel %vm3851_vm13, %v4486_v28, %v3848_v36 }
0x2582   :  { %v3854_v17 = vmul.f32 %v3852_v30, %v3820_v9 }
0x2584   :  { %v3857_v37 = vmul.f32 %v3855_v22, %v3854_v17 }
0x2586   :  { %v3860_v20 = vadd.f32 %v3858_v26, %v3857_v37 }
0x2588   :  { %v3866_v42 = vsel %vm349_vm3, %v3860_v20, 0.0 }
0x2589   :  { %3867 = vadd.xlane.f32.xlu2 %v3866_v42 }
0x25ea   :  { %v3865_v34 = vpop.xlane.xlu1 %3864 }
0x25eb   :  { %v3869_v39 = vmul.f32 %v3865_v34, %v5006_v29 }
0x25ed   :  { %v3871_v40 = vsub.f32 %v3859_v18, %v3869_v39  ;;  %v4494_v18 = vld [vmem:[%s4593_s13 + $0x8] sm:$0xff]  ;;  %s4507_s13 = sshra.s32 %s3982_s4, 4  ;;  %s4508_s13 = int_to_ptr.hbm [resolvable:$true] %s4507_s13 }
0x25ee   :  { %s4509_s14 = scalar_lea.hbm %s4508_s13, 1  ;;  %p4512_p1 = scmp.lt.s32.totalorder %s4508_s13, %s4783_s29 }
0x25ef   :  { %v3873_v51 = vmul.f32 %v3871_v40, %v3871_v40  ;;  %p4510_p0 = scmp.ne.s32.totalorder %s4508_s13, %s4509_s14  ;;  %p4513_p2 = scmp.lt.s32.totalorder %s4511_s30, %s4509_s14 }
0x25f1   :  { %v3875_v41 = vsel %vm349_vm3, %v3873_v51, 0.0  ;;  %p4514_p3 = por %p4513_p2, %p4512_p1 }
0x25f2   :  { %3876 = vadd.xlane.f32.xlu0 %v3875_v41 }
0x25f3   :  { %p4515_p4 = pnand %p4514_p3, %p4510_p0 }
0x25fc   :  { %v3868_v43 = vpop.xlane.xlu2 %3867 }
0x25fd   :  { %v3870_v49 = vmul.f32 %v3868_v43, %v5006_v29 }
0x25ff   :  { %v3872_v44 = vsub.f32 %v3860_v20, %v3870_v49 }
0x2601   :  { %v3874_v19 = vmul.f32 %v3872_v44, %v3872_v44 }
0x2603   :  { %v3878_v46 = vsel %vm349_vm3, %v3874_v19, 0.0 }
0x2604   :  { %3879 = vadd.xlane.f32.xlu1 %v3878_v46 }
0x2665   :  { %v3877_v59 = vpop.xlane.xlu0 %3876 }
0x2666   :  { %v3881_v52 = vmul.f32 %v3877_v59, %v5006_v29 }
0x2668   :  { %v3883_v54 = vadd.f32 1e-05, %v3881_v52 }
0x266a   :  { %4487 = vrsqrt.f32 %v3883_v54  ;;  %vm3891_vm15 = vweird.f32 %v3883_v54 }
0x2670   :  { %v4488_v3 = vpop.eup %4487 }
0x2671   :  { %v3886_v6 = vmul.f32 %v4488_v3, %v3883_v54  ;;  %vm3892_vm14 = vweird.f32 %v4488_v3 }
0x2672   :  { %vm3893_vm0 = vmor %vm3891_vm15, %vm3892_vm14 }
0x2673   :  { %v3887_v60 = vmul.f32 %v4488_v3, %v3886_v6 }
0x2675   :  { %v3888_v63 = vmul.f32 0.5, %v3887_v60 }
0x2677   :  { %v3889_v62 = vsub.f32 1.5, %v3888_v63  ;;  %v3880_v0 = vpop.xlane.xlu1 %3879 }
0x2678   :  { %v3882_v56 = vmul.f32 %v3880_v0, %v5006_v29 }
0x2679   :  { %v3890_v7 = vmul.f32 %v4488_v3, %v3889_v62 }
0x267a   :  { %v3884_v8 = vadd.f32 1e-05, %v3882_v56 }
0x267b   :  { %v3894_v1 = vsel %vm3893_vm0, %v4488_v3, %v3890_v7 }
0x267c   :  { %v3905_v4 = vmul.f32 %v3894_v1, %v3871_v40  ;;  %4489 = vrsqrt.f32 %v3884_v8  ;;  %vm3901_vm4 = vweird.f32 %v3884_v8 }
0x267e   :  { %v3910_v9 = vmul.f32 %v4310_v47, %v3905_v4 }
0x2680   :  { %v3915_v16 = vadd.f32 %v4311_v50, %v3910_v9 }
0x2682   :  { %v4490_v10 = vpop.eup %4489  ;;  %4233 = vmatmul.msk.f32.vlgmr.msrb.gmra.mxu0 %vm349_vm3, %v3915_v16 }
0x2683   :  { %v3896_v2 = vmul.f32 %v4490_v10, %v3884_v8  ;;  %vm3902_vm1 = vweird.f32 %v4490_v10 }
0x2684   :  { %vm3903_vm5 = vmor %vm3901_vm4, %vm3902_vm1 }
0x2685   :  { %v3897_v11 = vmul.f32 %v4490_v10, %v3896_v2 }
0x2687   :  { %v3898_v53 = vmul.f32 0.5, %v3897_v11 }
0x2689   :  { %v3899_v29 = vsub.f32 1.5, %v3898_v53 }
0x268b   :  { %v3900_v57 = vmul.f32 %v4490_v10, %v3899_v29 }
0x268d   :  { %v3904_v13 = vsel %vm3903_vm5, %v4490_v10, %v3900_v57 }
0x268e   :  { %v3906_v55 = vmul.f32 %v3904_v13, %v3872_v44 }
0x2690   :  { %v3911_v61 = vmul.f32 %v4310_v47, %v3906_v55 }
0x2692   :  { %v3916_v14 = vadd.f32 %v4311_v50, %v3911_v61 }
0x2694   :  { %4234 = vmatmul.msk.f32.gmra.mxu0 %vm349_vm3, %v3916_v14  ;;  %vm3972_vm3 = vcmask 0  }
0x26ff   :  { %v3948_v15 = vpop.f32.mrf.mxu0 }
0x2700   :  { %v3949_v58 = vadd.f32 %v4312_v12, %v3948_v15 }
0x2702   :  { %v3954_v22 = vsub.f32 %v3949_v58, %v4493_v33 }
0x2704   :  { %v3956_v24 = vmul.f32 %v3954_v22, %v3954_v22 }
0x2706   :  { %v3958_v25 = vsel %vm206_vm2, %v3956_v24, 0.0 }
0x2707   :  { %3959 = vadd.xlane.f32.xlu2 %v3958_v25 }
0x2711   :  { %v3951_v26 = vpop.f32.mrf.mxu0 }
0x2712   :  { %v3952_v27 = vadd.f32 %v4312_v12, %v3951_v26 }
0x2714   :  { %v3955_v28 = vsub.f32 %v3952_v27, %v4494_v18 }
0x2716   :  { %v3957_v31 = vmul.f32 %v3955_v28, %v3955_v28 }
0x2718   :  { %v3961_v5 = vsel %vm206_vm2, %v3957_v31, 0.0 }
0x2719   :  { %3962 = vadd.xlane.f32.xlu0 %v3961_v5 }
0x277a   :  { %v3960_v32 = vpop.xlane.xlu2 %3959 }
0x278c   :  { %v3963_v35 = vpop.xlane.xlu0 %3962 }
0x278d   :  { %v3964_v38 = vadd.f32 %v3963_v35, %v3960_v32 }
0x278f   :  { %v3965_v36 = vrot.slane %v3964_v38, 4 }
0x2791   :  { %v3966_v30 = vadd.f32 %v3965_v36, %v3964_v38 }
0x2793   :  { %v3967_v17 = vrot.slane %v3966_v30, 2 }
0x2795   :  { %v3968_v37 = vadd.f32 %v3967_v17, %v3966_v30 }
0x2797   :  { %v3969_v20 = vrot.slane %v3968_v37, 1 }
0x2799   :  { %v3970_v42 = vadd.f32 %v3969_v20, %v3968_v37 }
0x279b   :  { %v3971_v34 = vmul.f32 0.015625, %v3970_v42 }
0x279d   :  { %3973 = vst.msk [vmem:[#allocation2] sm:$0x1] %vm3972_vm3, %v3971_v34 }
0x279e   :  { %4518 = shalt.err (!%p4515_p4)
}
0x279f   :  { %3984 = dma.vmem_to_hbm [thread:$0]  %s3980_s24, 16, %s3982_s4, [#allocation3]  }
0x27a0   :  { %4519 = dma.done.wait [#allocation3], 16  }
0x27a1   :  { %4520 = vsyncadd [#allocation3], 4294967280 }
0x27a2   :  { %3989 = vsyncpa [#allocation3], 1 }

</bundles_post_ra>
